<compile_context>
chip_gen: v7x
topology: tpu7x:2x2x1
jax: 0.10.0
libtpu: 0.0.40
codegen_flags: <defaults>
</compile_context>

<pallas_src>
import functools

import jax
import jax.numpy as jnp
from jax.experimental import pallas as pl
from jax.experimental.pallas import tpu as pltpu

# ----------------------------- configuration --------------------------------
BS = 2                # batch
C_IN = 4              # n_vars
CONTEXT_WINDOW = 48
TARGET_WINDOW = 24
PATCH_LEN = 8
STRIDE = 8
N_LAYERS = 2
D_MODEL = 32
N_HEADS = 4
D_FF = 64

PATCH_NUM = (CONTEXT_WINDOW - PATCH_LEN) // STRIDE + 1   # 6
D_K = D_MODEL // N_HEADS
D_V = D_MODEL // N_HEADS
HEAD_NF = D_MODEL * PATCH_NUM
EPS_BN = 1e-5
EPS_REVIN = 1e-5

_VMEM = pl.BlockSpec(memory_space=pltpu.MemorySpace.VMEM)


# ------------------------------ helpers --------------------------------------
def _erf(x):
    # Abramowitz & Stegun 7.1.26 rational approximation (|err| < ~1.5e-7 with an
    # exact reciprocal); the reciprocal rides the EUP slot (approx=True) to keep
    # the VALU free on this fully serial kernel.
    a1, a2, a3, a4, a5 = 0.254829592, -0.284496736, 1.421413741, -1.453152027, 1.061405429
    p = 0.3275911
    s = jnp.where(x >= 0.0, 1.0, -1.0)
    ax = jnp.abs(x)
    t = pl.reciprocal(1.0 + p * ax, approx=True)
    poly = ((((a5 * t + a4) * t + a3) * t + a2) * t + a1) * t
    return s * (1.0 - poly * jnp.exp(-ax * ax))


def _gelu(x):
    # exact (erf-based) GELU, matching PyTorch nn.GELU() default
    return 0.5 * x * (1.0 + _erf(x * 0.7071067811865476))


# ------------------------------- fused kernel ---------------------------------
def fused_forward_kernel(x_ref, wl_ref, vl_ref, sh_ref, out_ref, src_ref,
                         *, norm_len, masked_patch_num, patch_len, q_len,
                         d_ff, n_heads, n_layers):
    f32 = jnp.float32
    bn = x_ref.shape[0]                       # batch * n_vars
    seq_len = x_ref.shape[1] - 3              # x_pack = [z | rw | rb | inv_rw]
    d_model = sh_ref.shape[1]
    d_k = d_model // n_heads
    rows = bn * q_len
    target_window = out_ref.shape[1]

    # shared-table row offsets (must match host packing)
    pos_off = patch_len
    hw_off = pos_off + rows
    hb_off = hw_off + q_len * d_model

    # -------------------- unpack activation buffer --------------------
    z = x_ref[:, 0:seq_len]                          # [bn, L]
    rw = x_ref[:, seq_len:seq_len + 1]               # RevIN affine weight
    rb = x_ref[:, seq_len + 1:seq_len + 2]           # RevIN affine bias
    inv_rw = x_ref[:, seq_len + 2:seq_len + 3]       # 1/(rw + eps^2), host side

    # -------------------- RevIN 'norm' --------------------
    # TODO(synk): RevIN(random_mask) source not provided; statistics are taken
    # over the LAST `norm_len` (= unmasked_original_len) time steps.
    tail = z[:, seq_len - norm_len:]
    mean = jnp.mean(tail, axis=1, keepdims=True)                 # [bn, 1]
    var = jnp.mean((tail - mean) ** 2, axis=1, keepdims=True)
    inv_std = jax.lax.rsqrt(var + EPS_REVIN)                     # EUP, no divide
    std = (var + EPS_REVIN) * inv_std                            # == sqrt(var+eps)
    zn = (z - mean) * inv_std * rw + rb                          # [bn, L]

    # -------------------- patching + masking + embedding --------------------
    # stride == patch_len, so patch p is the lane slice [p*PL, (p+1)*PL).
    # Row layout: r = p*bn + b (patch-major).  posadd rows already hold
    # W_pos + b_P + mask[p]*W_P[patch_len]; masked patches contribute no data
    # term.  Each slab is written straight into the src scratch (no concat).
    wp = sh_ref[0:patch_len, :]                                  # [PL, d_model]
    for p in range(q_len):
        pos_slab = sh_ref[pos_off + p * bn:pos_off + (p + 1) * bn, :]
        if p < masked_patch_num:
            src_ref[p * bn:(p + 1) * bn, :] = pos_slab
        else:
            patch = zn[:, p * patch_len:(p + 1) * patch_len]     # [bn, PL]
            src_ref[p * bn:(p + 1) * bn, :] = pos_slab + jnp.dot(
                patch, wp, preferred_element_type=f32)
    src = src_ref[...]                                           # [rows, d_model]

    # Block-diagonal attention mask, generated in-registers:
    # rows attend only within the same sample (r % bn == c % bn).
    ri = jax.lax.broadcasted_iota(jnp.int32, (rows, rows), 0)
    ci = jax.lax.broadcasted_iota(jnp.int32, (rows, rows), 1)
    if bn & (bn - 1) == 0:
        same = (ri & (bn - 1)) == (ci & (bn - 1))
    else:
        same = (ri % bn) == (ci % bn)
    neg_big = jnp.float32(-1e30)

    prev = [None] * n_heads        # residual attention scores (pre-softmax)
    wm_rows = 2 * d_model + d_ff   # per-layer rows in the packed matrix buffer

    # -------------------- encoder layers (res_attention=True) --------------------
    for lyr in range(n_layers):
        base = lyr * wm_rows
        # packed per-layer matrices: [Wq*scale | Wk | Wv@Wo per head], w1, w2
        wcomb = wl_ref[base:base + d_model, :]                            # [32, 192]
        w1 = wl_ref[base + d_model:base + 2 * d_model, 0:d_ff]            # [32, 64]
        w2 = wl_ref[base + 2 * d_model:base + 2 * d_model + d_ff, 0:d_model]  # [64, 32]
        # packed per-layer vectors (one aligned [8, 192] load, then vreg slices)
        vvec = vl_ref[lyr * 8:(lyr + 1) * 8, :]
        bcomb = vvec[0:1, :]
        bo = vvec[1:2, 0:d_model]
        g1 = vvec[2:3, 0:d_model]
        be1 = vvec[3:4, 0:d_model]
        b1 = vvec[4:5, 0:d_ff]
        b2 = vvec[5:6, 0:d_model]
        g2 = vvec[6:7, 0:d_model]
        be2 = vvec[7:8, 0:d_model]

        # one batched projection: Q*scale | K | per-head (V @ W_o)
        proj = jnp.dot(src, wcomb, preferred_element_type=f32) + bcomb    # [rows, 192]

        attn_acc = None
        for h in range(n_heads):
            qh = proj[:, h * d_k:(h + 1) * d_k]                           # [rows, 8]
            kh = proj[:, d_model + h * d_k:d_model + (h + 1) * d_k]       # [rows, 8]
            vh = proj[:, 2 * d_model + h * d_model:
                      2 * d_model + (h + 1) * d_model]                    # [rows, 32]
            sc = jax.lax.dot_general(qh, kh, (((1,), (1,)), ((), ())),
                                     preferred_element_type=f32)          # [rows, rows]
            if prev[h] is not None:
                sc = sc + prev[h]            # residual attention
            prev[h] = sc                     # carry pre-softmax scores to next layer
            scm = jnp.where(same, sc, neg_big)
            m = jnp.max(scm, axis=-1, keepdims=True)
            e = jnp.exp(scm - m)
            attn = e * pl.reciprocal(jnp.sum(e, axis=-1, keepdims=True), approx=True)
            contrib = jnp.dot(attn, vh, preferred_element_type=f32)       # [rows, 32]
            attn_acc = contrib if attn_acc is None else attn_acc + contrib
        src2 = attn_acc + bo

        # residual + BatchNorm1d(d_model) — training-mode batch stats,
        # two-pass biased variance (numerically safe).
        x = src + src2
        mu = jnp.mean(x, axis=0, keepdims=True)
        var1 = jnp.mean((x - mu) ** 2, axis=0, keepdims=True)
        x = (x - mu) * jax.lax.rsqrt(var1 + EPS_BN) * g1 + be1

        # position-wise FFN: Linear -> GELU -> Linear
        h1 = _gelu(jnp.dot(x, w1, preferred_element_type=f32) + b1)
        y = x + jnp.dot(h1, w2, preferred_element_type=f32) + b2
        mu2 = jnp.mean(y, axis=0, keepdims=True)
        var2 = jnp.mean((y - mu2) ** 2, axis=0, keepdims=True)
        src = (y - mu2) * jax.lax.rsqrt(var2 + EPS_BN) * g2 + be2

    # -------------------- flatten head: accumulating matmuls (no lane concat) ----
    yhat = None
    for p in range(q_len):
        slab = src[p * bn:(p + 1) * bn, :]                                # [bn, 32]
        hw_p = sh_ref[hw_off + p * d_model:hw_off + (p + 1) * d_model,
                      0:target_window]                                    # [32, 24]
        c = jnp.dot(slab, hw_p, preferred_element_type=f32)
        yhat = c if yhat is None else yhat + c
    yhat = yhat + sh_ref[hb_off:hb_off + 1, 0:target_window]              # [bn, 24]

    # -------------------- RevIN 'denorm' --------------------
    out_ref[...] = (yhat - rb) * inv_rw * std + mean


# --------------------------- forward wrapper ------------------------------
@functools.partial(jax.jit, static_argnums=(1,))
def patchtst_random_mask_forward(z, random_len, params):
    """z: [bs, c_in, context_window]; random_len: python int (# masked patches)."""
    bs, c_in, L = z.shape
    bn = bs * c_in
    masked = int(random_len)
    unmasked = PATCH_NUM - masked
    norm_len = (unmasked - 2) * STRIDE + PATCH_LEN      # verbatim from reference forward
    assert 0 < norm_len <= L
    f32 = jnp.float32

    # ---- host-side packing (tiny, one-time; collapses 20 DMAs into 4) ----
    # buffer 1: activations + RevIN params  -> [bn, L+3]
    z2d = z.reshape(bn, L).astype(f32)
    rw = jnp.tile(params['revin_w'].reshape(1, c_in), (bs, 1)).reshape(bn, 1)
    rb = jnp.tile(params['revin_b'].reshape(1, c_in), (bs, 1)).reshape(bn, 1)
    inv_rw = 1.0 / (rw + EPS_REVIN * EPS_REVIN)          # denorm divide precomputed
    x_pack = jnp.concatenate([z2d, rw, rb, inv_rw], axis=1)

    # buffer 4: shared tables  [W_P(data) | posadd | head weight | head bias]
    wp = params['W_P'][:PATCH_LEN, :]
    mask_vec = jnp.concatenate([jnp.zeros((masked,), f32), jnp.ones((unmasked,), f32)])
    # fold mask-channel contribution + b_P + positional encoding into one table
    w_pos_eff = params['W_pos'] + params['b_P'] + mask_vec[:, None] * params['W_P'][PATCH_LEN, :]
    posadd = jnp.repeat(w_pos_eff, bn, axis=0)           # row order: p*bn + b
    # reorder head weight rows (d*Q+p -> p*D+d) so per-patch slab matmuls work
    hw = params['head_w'].reshape(D_MODEL, PATCH_NUM, TARGET_WINDOW)
    hw = jnp.transpose(hw, (1, 0, 2)).reshape(PATCH_NUM * D_MODEL, TARGET_WINDOW)

    pos_off = PATCH_LEN
    hw_off = pos_off + bn * PATCH_NUM
    hb_off = hw_off + PATCH_NUM * D_MODEL
    sh_rows = ((hb_off + 1 + 7) // 8) * 8
    shared = jnp.zeros((sh_rows, D_MODEL), f32)
    shared = shared.at[0:PATCH_LEN, :].set(wp)
    shared = shared.at[pos_off:pos_off + bn * PATCH_NUM, :].set(posadd)
    shared = shared.at[hw_off:hw_off + PATCH_NUM * D_MODEL, 0:TARGET_WINDOW].set(hw)
    shared = shared.at[hb_off:hb_off + 1, 0:TARGET_WINDOW].set(params['head_b'])

    # buffers 2 & 3: per-layer matrices / vectors with W_v @ W_o folded per head
    scale = (D_MODEL // N_HEADS) ** -0.5
    wm_rows = 2 * D_MODEL + D_FF
    wm_cols = 2 * D_MODEL + N_HEADS * D_MODEL
    wmats, wvecs = [], []
    for l in params['layers']:
        wvo = [l['wv'][:, h * D_V:(h + 1) * D_V] @ l['wo'][h * D_V:(h + 1) * D_V, :]
               for h in range(N_HEADS)]
        bvo = [l['bv'][:, h * D_V:(h + 1) * D_V] @ l['wo'][h * D_V:(h + 1) * D_V, :]
               for h in range(N_HEADS)]
        wcomb = jnp.concatenate([l['wq'] * scale, l['wk']] + wvo, axis=1)   # [32, 192]
        bcomb = jnp.concatenate([l['bq'] * scale, l['bk']] + bvo, axis=1)   # [1, 192]
        wm = jnp.zeros((wm_rows, wm_cols), f32)
        wm = wm.at[0:D_MODEL, :].set(wcomb)
        wm = wm.at[D_MODEL:2 * D_MODEL, 0:D_FF].set(l['w1'])
        wm = wm.at[2 * D_MODEL:2 * D_MODEL + D_FF, 0:D_MODEL].set(l['w2'])
        wmats.append(wm)
        vv = jnp.zeros((8, wm_cols), f32)
        vv = vv.at[0:1, :].set(bcomb)
        vv = vv.at[1:2, 0:D_MODEL].set(l['bo'])
        vv = vv.at[2:3, 0:D_MODEL].set(l['g1'])
        vv = vv.at[3:4, 0:D_MODEL].set(l['be1'])
        vv = vv.at[4:5, 0:D_FF].set(l['b1'])
        vv = vv.at[5:6, 0:D_MODEL].set(l['b2'])
        vv = vv.at[6:7, 0:D_MODEL].set(l['g2'])
        vv = vv.at[7:8, 0:D_MODEL].set(l['be2'])
        wvecs.append(vv)
    wl = jnp.concatenate(wmats, axis=0)     # [N_LAYERS*128, 192]
    vl = jnp.concatenate(wvecs, axis=0)     # [N_LAYERS*8, 192]

    kernel = functools.partial(
        fused_forward_kernel,
        norm_len=int(norm_len), masked_patch_num=masked, patch_len=PATCH_LEN,
        q_len=PATCH_NUM, d_ff=D_FF, n_heads=N_HEADS, n_layers=N_LAYERS)

    # Single fused, grid-less kernel: total live data << 1 MiB (fits any
    # generation's VMEM); only 4 input DMAs + 1 output DMA.
    y = pl.pallas_call(
        kernel,
        out_shape=jax.ShapeDtypeStruct((bn, TARGET_WINDOW), jnp.float32),
        in_specs=[_VMEM] * 4,
        out_specs=_VMEM,
        scratch_shapes=[pltpu.VMEM((bn * PATCH_NUM, D_MODEL), jnp.float32)],
    )(x_pack, wl, vl, shared)

    return y.reshape(bs, c_in, TARGET_WINDOW)


# ------------------------------- parameters -------------------------------------
def init_params(key):
    keys = iter(jax.random.split(key, 64))

    def nrm(shape, scale):
        return jax.random.normal(next(keys), shape, jnp.float32) * scale

    params = {
        'revin_w': 1.0 + 0.1 * nrm((1, 1, C_IN), 1.0),
        'revin_b': 0.1 * nrm((1, 1, C_IN), 1.0),
        'W_P': nrm((PATCH_LEN + 1, D_MODEL), (PATCH_LEN + 1) ** -0.5),
        'b_P': nrm((1, D_MODEL), 0.02),
        'W_pos': nrm((PATCH_NUM, D_MODEL), 0.02),
        'head_w': nrm((HEAD_NF, TARGET_WINDOW), HEAD_NF ** -0.5),
        'head_b': nrm((1, TARGET_WINDOW), 0.02),
        'layers': [],
    }
    for _ in range(N_LAYERS):
        params['layers'].append({
            'wq': nrm((D_MODEL, D_MODEL), D_MODEL ** -0.5),
            'bq': nrm((1, D_MODEL), 0.02),
            'wk': nrm((D_MODEL, D_MODEL), D_MODEL ** -0.5),
            'bk': nrm((1, D_MODEL), 0.02),
            'wv': nrm((D_MODEL, D_MODEL), D_MODEL ** -0.5),
            'bv': nrm((1, D_MODEL), 0.02),
            'wo': nrm((N_HEADS * D_V, D_MODEL), D_MODEL ** -0.5),
            'bo': nrm((1, D_MODEL), 0.02),
            'g1': 1.0 + 0.1 * nrm((1, D_MODEL), 1.0),
            'be1': 0.1 * nrm((1, D_MODEL), 1.0),
            'w1': nrm((D_MODEL, D_FF), D_MODEL ** -0.5),
            'b1': nrm((1, D_FF), 0.02),
            'w2': nrm((D_FF, D_MODEL), D_FF ** -0.5),
            'b2': nrm((1, D_MODEL), 0.02),
            'g2': 1.0 + 0.1 * nrm((1, D_MODEL), 1.0),
            'be2': 0.1 * nrm((1, D_MODEL), 1.0),
        })
    return params


# ---------------------------------- main ----------------------------------------
if __name__ == "__main__":
    key = jax.random.PRNGKey(0)
    pkey, xkey = jax.random.split(key)
    params = init_params(pkey)
    z = jax.random.normal(xkey, (BS, C_IN, CONTEXT_WINDOW), jnp.float32)
    random_len = 2  # number of masked patches (static)

    out = patchtst_random_mask_forward(z, random_len, params)
    out = jax.block_until_ready(out)
    assert out.shape == (BS, C_IN, TARGET_WINDOW)
    assert bool(jnp.all(jnp.isfinite(out)))
    print("KERNEL_OK")
</pallas_src>

<mosaic_0001>
module attributes {stable_mosaic.version = 11 : i64} {
  func.func @fused_forward_kernel(%arg0: memref<8x51xf32, #tpu.memory_space<vmem>>, %arg1: memref<256x192xf32, #tpu.memory_space<vmem>>, %arg2: memref<16x192xf32, #tpu.memory_space<vmem>>, %arg3: memref<256x32xf32, #tpu.memory_space<vmem>>, %arg4: memref<8x24xf32, #tpu.memory_space<vmem>>, %arg5: memref<48x32xf32, #tpu.memory_space<vmem>>) attributes {dimension_semantics = [], scalar_prefetch = 0 : i64, scratch_operands = 1 : i64, tpu.core_type = #tpu.core_type<tc>} {
    %c0 = arith.constant 0 : index
    %c0_0 = arith.constant 0 : index
    %0 = vector.load %arg0[%c0, %c0_0] : memref<8x51xf32, #tpu.memory_space<vmem>>, vector<8x48xf32>
    %c0_1 = arith.constant 0 : index
    %c48 = arith.constant 48 : index
    %1 = vector.load %arg0[%c0_1, %c48] : memref<8x51xf32, #tpu.memory_space<vmem>>, vector<8x1xf32>
    %c0_2 = arith.constant 0 : index
    %c49 = arith.constant 49 : index
    %2 = vector.load %arg0[%c0_2, %c49] : memref<8x51xf32, #tpu.memory_space<vmem>>, vector<8x1xf32>
    %c0_3 = arith.constant 0 : index
    %c50 = arith.constant 50 : index
    %3 = vector.load %arg0[%c0_3, %c50] : memref<8x51xf32, #tpu.memory_space<vmem>>, vector<8x1xf32>
    %4 = vector.extract_strided_slice %0 {offsets = [0, 24], sizes = [8, 24], strides = [1, 1]} : vector<8x48xf32> to vector<8x24xf32>
    %cst = arith.constant dense<0.000000e+00> : vector<8xf32>
    %5 = vector.multi_reduction <add>, %4, %cst [1] : vector<8x24xf32> to vector<8xf32>
    %6 = vector.shape_cast %5 : vector<8xf32> to vector<8x1xf32>
    %cst_4 = arith.constant 2.400000e+01 : f32
    %7 = vector.broadcast %cst_4 : f32 to vector<8x1xf32>
    %8 = arith.divf %6, %7 : vector<8x1xf32>
    %9 = vector.broadcast %8 : vector<8x1xf32> to vector<8x24xf32>
    %10 = arith.subf %4, %9 : vector<8x24xf32>
    %11 = arith.mulf %10, %10 : vector<8x24xf32>
    %cst_5 = arith.constant dense<0.000000e+00> : vector<8xf32>
    %12 = vector.multi_reduction <add>, %11, %cst_5 [1] : vector<8x24xf32> to vector<8xf32>
    %13 = vector.shape_cast %12 : vector<8xf32> to vector<8x1xf32>
    %cst_6 = arith.constant 2.400000e+01 : f32
    %14 = vector.broadcast %cst_6 : f32 to vector<8x1xf32>
    %15 = arith.divf %13, %14 : vector<8x1xf32>
    %cst_7 = arith.constant 9.99999974E-6 : f32
    %16 = vector.broadcast %cst_7 : f32 to vector<8x1xf32>
    %17 = arith.addf %15, %16 : vector<8x1xf32>
    %18 = math.rsqrt %17 : vector<8x1xf32>
    %cst_8 = arith.constant 9.99999974E-6 : f32
    %19 = vector.broadcast %cst_8 : f32 to vector<8x1xf32>
    %20 = arith.addf %15, %19 : vector<8x1xf32>
    %21 = arith.mulf %20, %18 : vector<8x1xf32>
    %22 = vector.broadcast %8 : vector<8x1xf32> to vector<8x48xf32>
    %23 = arith.subf %0, %22 : vector<8x48xf32>
    %24 = vector.broadcast %18 : vector<8x1xf32> to vector<8x48xf32>
    %25 = arith.mulf %23, %24 : vector<8x48xf32>
    %26 = vector.broadcast %1 : vector<8x1xf32> to vector<8x48xf32>
    %27 = arith.mulf %25, %26 : vector<8x48xf32>
    %28 = vector.broadcast %2 : vector<8x1xf32> to vector<8x48xf32>
    %29 = arith.addf %27, %28 : vector<8x48xf32>
    %c0_9 = arith.constant 0 : index
    %c0_10 = arith.constant 0 : index
    %30 = vector.load %arg3[%c0_9, %c0_10] : memref<256x32xf32, #tpu.memory_space<vmem>>, vector<8x32xf32>
    %c8 = arith.constant 8 : index
    %c0_11 = arith.constant 0 : index
    %31 = vector.load %arg3[%c8, %c0_11] : memref<256x32xf32, #tpu.memory_space<vmem>>, vector<8x32xf32>
    %c0_12 = arith.constant 0 : index
    %c0_13 = arith.constant 0 : index
    %32 = vector.load %arg5[%c0_12, %c0_13] : memref<48x32xf32, #tpu.memory_space<vmem>>, vector<8x32xf32>
    tpu.vector_store %arg5[%c0_12, %c0_13], %31 {strides = array<i32>} : memref<48x32xf32, #tpu.memory_space<vmem>>, vector<8x32xf32>,
    %c16 = arith.constant 16 : index
    %c0_14 = arith.constant 0 : index
    %33 = vector.load %arg3[%c16, %c0_14] : memref<256x32xf32, #tpu.memory_space<vmem>>, vector<8x32xf32>
    %c8_15 = arith.constant 8 : index
    %c0_16 = arith.constant 0 : index
    %34 = vector.load %arg5[%c8_15, %c0_16] : memref<48x32xf32, #tpu.memory_space<vmem>>, vector<8x32xf32>
    tpu.vector_store %arg5[%c8_15, %c0_16], %33 {strides = array<i32>} : memref<48x32xf32, #tpu.memory_space<vmem>>, vector<8x32xf32>,
    %c24 = arith.constant 24 : index
    %c0_17 = arith.constant 0 : index
    %35 = vector.load %arg3[%c24, %c0_17] : memref<256x32xf32, #tpu.memory_space<vmem>>, vector<8x32xf32>
    %36 = vector.extract_strided_slice %29 {offsets = [0, 16], sizes = [8, 8], strides = [1, 1]} : vector<8x48xf32> to vector<8x8xf32>
    %cst_18 = arith.constant dense<0.000000e+00> : vector<8x32xf32>
    %37 = tpu.matmul %36, %30, %cst_18 {dimension_numbers = #tpu.dot_dimension_numbers<[1], [0], [0], [1], [0, 0, 1, 1], [], []>} : vector<8x8xf32>, vector<8x32xf32>, vector<8x32xf32> -> vector<8x32xf32>
    %38 = arith.addf %35, %37 : vector<8x32xf32>
    %c16_19 = arith.constant 16 : index
    %c0_20 = arith.constant 0 : index
    %39 = vector.load %arg5[%c16_19, %c0_20] : memref<48x32xf32, #tpu.memory_space<vmem>>, vector<8x32xf32>
    tpu.vector_store %arg5[%c16_19, %c0_20], %38 {strides = array<i32>} : memref<48x32xf32, #tpu.memory_space<vmem>>, vector<8x32xf32>,
    %c32 = arith.constant 32 : index
    %c0_21 = arith.constant 0 : index
    %40 = vector.load %arg3[%c32, %c0_21] : memref<256x32xf32, #tpu.memory_space<vmem>>, vector<8x32xf32>
    %41 = vector.extract_strided_slice %29 {offsets = [0, 24], sizes = [8, 8], strides = [1, 1]} : vector<8x48xf32> to vector<8x8xf32>
    %cst_22 = arith.constant dense<0.000000e+00> : vector<8x32xf32>
    %42 = tpu.matmul %41, %30, %cst_22 {dimension_numbers = #tpu.dot_dimension_numbers<[1], [0], [0], [1], [0, 0, 1, 1], [], []>} : vector<8x8xf32>, vector<8x32xf32>, vector<8x32xf32> -> vector<8x32xf32>
    %43 = arith.addf %40, %42 : vector<8x32xf32>
    %c24_23 = arith.constant 24 : index
    %c0_24 = arith.constant 0 : index
    %44 = vector.load %arg5[%c24_23, %c0_24] : memref<48x32xf32, #tpu.memory_space<vmem>>, vector<8x32xf32>
    tpu.vector_store %arg5[%c24_23, %c0_24], %43 {strides = array<i32>} : memref<48x32xf32, #tpu.memory_space<vmem>>, vector<8x32xf32>,
    %c40 = arith.constant 40 : index
    %c0_25 = arith.constant 0 : index
    %45 = vector.load %arg3[%c40, %c0_25] : memref<256x32xf32, #tpu.memory_space<vmem>>, vector<8x32xf32>
    %46 = vector.extract_strided_slice %29 {offsets = [0, 32], sizes = [8, 8], strides = [1, 1]} : vector<8x48xf32> to vector<8x8xf32>
    %cst_26 = arith.constant dense<0.000000e+00> : vector<8x32xf32>
    %47 = tpu.matmul %46, %30, %cst_26 {dimension_numbers = #tpu.dot_dimension_numbers<[1], [0], [0], [1], [0, 0, 1, 1], [], []>} : vector<8x8xf32>, vector<8x32xf32>, vector<8x32xf32> -> vector<8x32xf32>
    %48 = arith.addf %45, %47 : vector<8x32xf32>
    %c32_27 = arith.constant 32 : index
    %c0_28 = arith.constant 0 : index
    %49 = vector.load %arg5[%c32_27, %c0_28] : memref<48x32xf32, #tpu.memory_space<vmem>>, vector<8x32xf32>
    tpu.vector_store %arg5[%c32_27, %c0_28], %48 {strides = array<i32>} : memref<48x32xf32, #tpu.memory_space<vmem>>, vector<8x32xf32>,
    %c48_29 = arith.constant 48 : index
    %c0_30 = arith.constant 0 : index
    %50 = vector.load %arg3[%c48_29, %c0_30] : memref<256x32xf32, #tpu.memory_space<vmem>>, vector<8x32xf32>
    %51 = vector.extract_strided_slice %29 {offsets = [0, 40], sizes = [8, 8], strides = [1, 1]} : vector<8x48xf32> to vector<8x8xf32>
    %cst_31 = arith.constant dense<0.000000e+00> : vector<8x32xf32>
    %52 = tpu.matmul %51, %30, %cst_31 {dimension_numbers = #tpu.dot_dimension_numbers<[1], [0], [0], [1], [0, 0, 1, 1], [], []>} : vector<8x8xf32>, vector<8x32xf32>, vector<8x32xf32> -> vector<8x32xf32>
    %53 = arith.addf %50, %52 : vector<8x32xf32>
    %c40_32 = arith.constant 40 : index
    %c0_33 = arith.constant 0 : index
    %54 = vector.load %arg5[%c40_32, %c0_33] : memref<48x32xf32, #tpu.memory_space<vmem>>, vector<8x32xf32>
    tpu.vector_store %arg5[%c40_32, %c0_33], %53 {strides = array<i32>} : memref<48x32xf32, #tpu.memory_space<vmem>>, vector<8x32xf32>,
    %c0_34 = arith.constant 0 : index
    %c0_35 = arith.constant 0 : index
    %55 = vector.load %arg5[%c0_34, %c0_35] : memref<48x32xf32, #tpu.memory_space<vmem>>, vector<48x32xf32>
    %56 = tpu.iota {dimensions = array<i32: 0>} : vector<48x48xi32>
    %57 = tpu.iota {dimensions = array<i32: 1>} : vector<48x48xi32>
    %c7_i32 = arith.constant 7 : i32
    %58 = vector.broadcast %c7_i32 : i32 to vector<48x48xi32>
    %59 = arith.andi %56, %58 : vector<48x48xi32>
    %c7_i32_36 = arith.constant 7 : i32
    %60 = vector.broadcast %c7_i32_36 : i32 to vector<48x48xi32>
    %61 = arith.andi %57, %60 : vector<48x48xi32>
    %62 = arith.cmpi eq, %59, %61 : vector<48x48xi32>
    %c0_37 = arith.constant 0 : index
    %c0_38 = arith.constant 0 : index
    %63 = vector.load %arg1[%c0_37, %c0_38] : memref<256x192xf32, #tpu.memory_space<vmem>>, vector<32x192xf32>
    %c32_39 = arith.constant 32 : index
    %c0_40 = arith.constant 0 : index
    %64 = vector.load %arg1[%c32_39, %c0_40] : memref<256x192xf32, #tpu.memory_space<vmem>>, vector<32x64xf32>
    %c64 = arith.constant 64 : index
    %c0_41 = arith.constant 0 : index
    %65 = vector.load %arg1[%c64, %c0_41] : memref<256x192xf32, #tpu.memory_space<vmem>>, vector<64x32xf32>
    %c0_42 = arith.constant 0 : index
    %c0_43 = arith.constant 0 : index
    %66 = vector.load %arg2[%c0_42, %c0_43] : memref<16x192xf32, #tpu.memory_space<vmem>>, vector<8x192xf32>
    %67 = vector.extract_strided_slice %66 {offsets = [0, 0], sizes = [1, 192], strides = [1, 1]} : vector<8x192xf32> to vector<1x192xf32>
    %68 = vector.extract_strided_slice %66 {offsets = [1, 0], sizes = [1, 32], strides = [1, 1]} : vector<8x192xf32> to vector<1x32xf32>
    %69 = vector.extract_strided_slice %66 {offsets = [2, 0], sizes = [1, 32], strides = [1, 1]} : vector<8x192xf32> to vector<1x32xf32>
    %70 = vector.extract_strided_slice %66 {offsets = [3, 0], sizes = [1, 32], strides = [1, 1]} : vector<8x192xf32> to vector<1x32xf32>
    %71 = vector.extract_strided_slice %66 {offsets = [4, 0], sizes = [1, 64], strides = [1, 1]} : vector<8x192xf32> to vector<1x64xf32>
    %72 = vector.extract_strided_slice %66 {offsets = [5, 0], sizes = [1, 32], strides = [1, 1]} : vector<8x192xf32> to vector<1x32xf32>
    %73 = vector.extract_strided_slice %66 {offsets = [6, 0], sizes = [1, 32], strides = [1, 1]} : vector<8x192xf32> to vector<1x32xf32>
    %74 = vector.extract_strided_slice %66 {offsets = [7, 0], sizes = [1, 32], strides = [1, 1]} : vector<8x192xf32> to vector<1x32xf32>
    %cst_44 = arith.constant dense<0.000000e+00> : vector<48x192xf32>
    %75 = tpu.matmul %55, %63, %cst_44 {dimension_numbers = #tpu.dot_dimension_numbers<[1], [0], [0], [1], [0, 0, 1, 1], [], []>} : vector<48x32xf32>, vector<32x192xf32>, vector<48x192xf32> -> vector<48x192xf32>
    %76 = vector.broadcast %67 : vector<1x192xf32> to vector<48x192xf32>
    %77 = arith.addf %75, %76 : vector<48x192xf32>
    %78 = vector.extract_strided_slice %77 {offsets = [0, 0], sizes = [48, 8], strides = [1, 1]} : vector<48x192xf32> to vector<48x8xf32>
    %79 = vector.extract_strided_slice %77 {offsets = [0, 32], sizes = [48, 8], strides = [1, 1]} : vector<48x192xf32> to vector<48x8xf32>
    %80 = vector.extract_strided_slice %77 {offsets = [0, 64], sizes = [48, 32], strides = [1, 1]} : vector<48x192xf32> to vector<48x32xf32>
    %cst_45 = arith.constant dense<0.000000e+00> : vector<48x48xf32>
    %81 = tpu.matmul %78, %79, %cst_45 {dimension_numbers = #tpu.dot_dimension_numbers<[1], [1], [0], [0], [0, 0, 1, 0], [], []>} : vector<48x8xf32>, vector<48x8xf32>, vector<48x48xf32> -> vector<48x48xf32>
    %cst_46 = arith.constant -1.000000e+30 : f32
    %82 = vector.broadcast %cst_46 : f32 to vector<48x48xf32>
    %83 = arith.select %62, %81, %82 : vector<48x48xi1>, vector<48x48xf32>
    %cst_47 = arith.constant dense<0xFF800000> : vector<48xf32>
    %84 = vector.multi_reduction <maximumf>, %83, %cst_47 [1] : vector<48x48xf32> to vector<48xf32>
    %85 = vector.shape_cast %84 : vector<48xf32> to vector<48x1xf32>
    %86 = vector.broadcast %85 : vector<48x1xf32> to vector<48x48xf32>
    %87 = arith.subf %83, %86 : vector<48x48xf32>
    %88 = math.exp %87 : vector<48x48xf32>
    %cst_48 = arith.constant dense<0.000000e+00> : vector<48xf32>
    %89 = vector.multi_reduction <add>, %88, %cst_48 [1] : vector<48x48xf32> to vector<48xf32>
    %90 = vector.shape_cast %89 : vector<48xf32> to vector<48x1xf32>
    %91 = tpu.reciprocal %90 {approx = true} : vector<48x1xf32> -> vector<48x1xf32>
    %92 = vector.broadcast %91 : vector<48x1xf32> to vector<48x48xf32>
    %93 = arith.mulf %88, %92 : vector<48x48xf32>
    %cst_49 = arith.constant dense<0.000000e+00> : vector<48x32xf32>
    %94 = tpu.matmul %93, %80, %cst_49 {dimension_numbers = #tpu.dot_dimension_numbers<[1], [0], [0], [1], [0, 0, 1, 1], [], []>} : vector<48x48xf32>, vector<48x32xf32>, vector<48x32xf32> -> vector<48x32xf32>
    %95 = vector.extract_strided_slice %77 {offsets = [0, 8], sizes = [48, 8], strides = [1, 1]} : vector<48x192xf32> to vector<48x8xf32>
    %96 = vector.extract_strided_slice %77 {offsets = [0, 40], sizes = [48, 8], strides = [1, 1]} : vector<48x192xf32> to vector<48x8xf32>
    %97 = vector.extract_strided_slice %77 {offsets = [0, 96], sizes = [48, 32], strides = [1, 1]} : vector<48x192xf32> to vector<48x32xf32>
    %cst_50 = arith.constant dense<0.000000e+00> : vector<48x48xf32>
    %98 = tpu.matmul %95, %96, %cst_50 {dimension_numbers = #tpu.dot_dimension_numbers<[1], [1], [0], [0], [0, 0, 1, 0], [], []>} : vector<48x8xf32>, vector<48x8xf32>, vector<48x48xf32> -> vector<48x48xf32>
    %cst_51 = arith.constant -1.000000e+30 : f32
    %99 = vector.broadcast %cst_51 : f32 to vector<48x48xf32>
    %100 = arith.select %62, %98, %99 : vector<48x48xi1>, vector<48x48xf32>
    %cst_52 = arith.constant dense<0xFF800000> : vector<48xf32>
    %101 = vector.multi_reduction <maximumf>, %100, %cst_52 [1] : vector<48x48xf32> to vector<48xf32>
    %102 = vector.shape_cast %101 : vector<48xf32> to vector<48x1xf32>
    %103 = vector.broadcast %102 : vector<48x1xf32> to vector<48x48xf32>
    %104 = arith.subf %100, %103 : vector<48x48xf32>
    %105 = math.exp %104 : vector<48x48xf32>
    %cst_53 = arith.constant dense<0.000000e+00> : vector<48xf32>
    %106 = vector.multi_reduction <add>, %105, %cst_53 [1] : vector<48x48xf32> to vector<48xf32>
    %107 = vector.shape_cast %106 : vector<48xf32> to vector<48x1xf32>
    %108 = tpu.reciprocal %107 {approx = true} : vector<48x1xf32> -> vector<48x1xf32>
    %109 = vector.broadcast %108 : vector<48x1xf32> to vector<48x48xf32>
    %110 = arith.mulf %105, %109 : vector<48x48xf32>
    %cst_54 = arith.constant dense<0.000000e+00> : vector<48x32xf32>
    %111 = tpu.matmul %110, %97, %cst_54 {dimension_numbers = #tpu.dot_dimension_numbers<[1], [0], [0], [1], [0, 0, 1, 1], [], []>} : vector<48x48xf32>, vector<48x32xf32>, vector<48x32xf32> -> vector<48x32xf32>
    %112 = arith.addf %94, %111 : vector<48x32xf32>
    %113 = vector.extract_strided_slice %77 {offsets = [0, 16], sizes = [48, 8], strides = [1, 1]} : vector<48x192xf32> to vector<48x8xf32>
    %114 = vector.extract_strided_slice %77 {offsets = [0, 48], sizes = [48, 8], strides = [1, 1]} : vector<48x192xf32> to vector<48x8xf32>
    %115 = vector.extract_strided_slice %77 {offsets = [0, 128], sizes = [48, 32], strides = [1, 1]} : vector<48x192xf32> to vector<48x32xf32>
    %cst_55 = arith.constant dense<0.000000e+00> : vector<48x48xf32>
    %116 = tpu.matmul %113, %114, %cst_55 {dimension_numbers = #tpu.dot_dimension_numbers<[1], [1], [0], [0], [0, 0, 1, 0], [], []>} : vector<48x8xf32>, vector<48x8xf32>, vector<48x48xf32> -> vector<48x48xf32>
    %cst_56 = arith.constant -1.000000e+30 : f32
    %117 = vector.broadcast %cst_56 : f32 to vector<48x48xf32>
    %118 = arith.select %62, %116, %117 : vector<48x48xi1>, vector<48x48xf32>
    %cst_57 = arith.constant dense<0xFF800000> : vector<48xf32>
    %119 = vector.multi_reduction <maximumf>, %118, %cst_57 [1] : vector<48x48xf32> to vector<48xf32>
    %120 = vector.shape_cast %119 : vector<48xf32> to vector<48x1xf32>
    %121 = vector.broadcast %120 : vector<48x1xf32> to vector<48x48xf32>
    %122 = arith.subf %118, %121 : vector<48x48xf32>
    %123 = math.exp %122 : vector<48x48xf32>
    %cst_58 = arith.constant dense<0.000000e+00> : vector<48xf32>
    %124 = vector.multi_reduction <add>, %123, %cst_58 [1] : vector<48x48xf32> to vector<48xf32>
    %125 = vector.shape_cast %124 : vector<48xf32> to vector<48x1xf32>
    %126 = tpu.reciprocal %125 {approx = true} : vector<48x1xf32> -> vector<48x1xf32>
    %127 = vector.broadcast %126 : vector<48x1xf32> to vector<48x48xf32>
    %128 = arith.mulf %123, %127 : vector<48x48xf32>
    %cst_59 = arith.constant dense<0.000000e+00> : vector<48x32xf32>
    %129 = tpu.matmul %128, %115, %cst_59 {dimension_numbers = #tpu.dot_dimension_numbers<[1], [0], [0], [1], [0, 0, 1, 1], [], []>} : vector<48x48xf32>, vector<48x32xf32>, vector<48x32xf32> -> vector<48x32xf32>
    %130 = arith.addf %112, %129 : vector<48x32xf32>
    %131 = vector.extract_strided_slice %77 {offsets = [0, 24], sizes = [48, 8], strides = [1, 1]} : vector<48x192xf32> to vector<48x8xf32>
    %132 = vector.extract_strided_slice %77 {offsets = [0, 56], sizes = [48, 8], strides = [1, 1]} : vector<48x192xf32> to vector<48x8xf32>
    %133 = vector.extract_strided_slice %77 {offsets = [0, 160], sizes = [48, 32], strides = [1, 1]} : vector<48x192xf32> to vector<48x32xf32>
    %cst_60 = arith.constant dense<0.000000e+00> : vector<48x48xf32>
    %134 = tpu.matmul %131, %132, %cst_60 {dimension_numbers = #tpu.dot_dimension_numbers<[1], [1], [0], [0], [0, 0, 1, 0], [], []>} : vector<48x8xf32>, vector<48x8xf32>, vector<48x48xf32> -> vector<48x48xf32>
    %cst_61 = arith.constant -1.000000e+30 : f32
    %135 = vector.broadcast %cst_61 : f32 to vector<48x48xf32>
    %136 = arith.select %62, %134, %135 : vector<48x48xi1>, vector<48x48xf32>
    %cst_62 = arith.constant dense<0xFF800000> : vector<48xf32>
    %137 = vector.multi_reduction <maximumf>, %136, %cst_62 [1] : vector<48x48xf32> to vector<48xf32>
    %138 = vector.shape_cast %137 : vector<48xf32> to vector<48x1xf32>
    %139 = vector.broadcast %138 : vector<48x1xf32> to vector<48x48xf32>
    %140 = arith.subf %136, %139 : vector<48x48xf32>
    %141 = math.exp %140 : vector<48x48xf32>
    %cst_63 = arith.constant dense<0.000000e+00> : vector<48xf32>
    %142 = vector.multi_reduction <add>, %141, %cst_63 [1] : vector<48x48xf32> to vector<48xf32>
    %143 = vector.shape_cast %142 : vector<48xf32> to vector<48x1xf32>
    %144 = tpu.reciprocal %143 {approx = true} : vector<48x1xf32> -> vector<48x1xf32>
    %145 = vector.broadcast %144 : vector<48x1xf32> to vector<48x48xf32>
    %146 = arith.mulf %141, %145 : vector<48x48xf32>
    %cst_64 = arith.constant dense<0.000000e+00> : vector<48x32xf32>
    %147 = tpu.matmul %146, %133, %cst_64 {dimension_numbers = #tpu.dot_dimension_numbers<[1], [0], [0], [1], [0, 0, 1, 1], [], []>} : vector<48x48xf32>, vector<48x32xf32>, vector<48x32xf32> -> vector<48x32xf32>
    %148 = arith.addf %130, %147 : vector<48x32xf32>
    %149 = vector.broadcast %68 : vector<1x32xf32> to vector<48x32xf32>
    %150 = arith.addf %148, %149 : vector<48x32xf32>
    %151 = arith.addf %55, %150 : vector<48x32xf32>
    %cst_65 = arith.constant dense<0.000000e+00> : vector<32xf32>
    %152 = vector.multi_reduction <add>, %151, %cst_65 [0] : vector<48x32xf32> to vector<32xf32>
    %153 = vector.shape_cast %152 : vector<32xf32> to vector<1x32xf32>
    %cst_66 = arith.constant 4.800000e+01 : f32
    %154 = vector.broadcast %cst_66 : f32 to vector<1x32xf32>
    %155 = arith.divf %153, %154 : vector<1x32xf32>
    %156 = vector.broadcast %155 : vector<1x32xf32> to vector<48x32xf32>
    %157 = arith.subf %151, %156 : vector<48x32xf32>
    %158 = arith.mulf %157, %157 : vector<48x32xf32>
    %cst_67 = arith.constant dense<0.000000e+00> : vector<32xf32>
    %159 = vector.multi_reduction <add>, %158, %cst_67 [0] : vector<48x32xf32> to vector<32xf32>
    %160 = vector.shape_cast %159 : vector<32xf32> to vector<1x32xf32>
    %cst_68 = arith.constant 4.800000e+01 : f32
    %161 = vector.broadcast %cst_68 : f32 to vector<1x32xf32>
    %162 = arith.divf %160, %161 : vector<1x32xf32>
    %163 = vector.broadcast %155 : vector<1x32xf32> to vector<48x32xf32>
    %164 = arith.subf %151, %163 : vector<48x32xf32>
    %cst_69 = arith.constant 9.99999974E-6 : f32
    %165 = vector.broadcast %cst_69 : f32 to vector<1x32xf32>
    %166 = arith.addf %162, %165 : vector<1x32xf32>
    %167 = math.rsqrt %166 : vector<1x32xf32>
    %168 = vector.broadcast %167 : vector<1x32xf32> to vector<48x32xf32>
    %169 = arith.mulf %164, %168 : vector<48x32xf32>
    %170 = vector.broadcast %69 : vector<1x32xf32> to vector<48x32xf32>
    %171 = arith.mulf %169, %170 : vector<48x32xf32>
    %172 = vector.broadcast %70 : vector<1x32xf32> to vector<48x32xf32>
    %173 = arith.addf %171, %172 : vector<48x32xf32>
    %cst_70 = arith.constant dense<0.000000e+00> : vector<48x64xf32>
    %174 = tpu.matmul %173, %64, %cst_70 {dimension_numbers = #tpu.dot_dimension_numbers<[1], [0], [0], [1], [0, 0, 1, 1], [], []>} : vector<48x32xf32>, vector<32x64xf32>, vector<48x64xf32> -> vector<48x64xf32>
    %175 = vector.broadcast %71 : vector<1x64xf32> to vector<48x64xf32>
    %176 = arith.addf %174, %175 : vector<48x64xf32>
    %cst_71 = arith.constant 5.000000e-01 : f32
    %177 = vector.broadcast %cst_71 : f32 to vector<48x64xf32>
    %178 = arith.mulf %177, %176 : vector<48x64xf32>
    %cst_72 = arith.constant 0.707106769 : f32
    %179 = vector.broadcast %cst_72 : f32 to vector<48x64xf32>
    %180 = arith.mulf %176, %179 : vector<48x64xf32>
    %cst_73 = arith.constant 0.000000e+00 : f32
    %181 = vector.broadcast %cst_73 : f32 to vector<48x64xf32>
    %182 = arith.cmpf oge, %180, %181 : vector<48x64xf32>
    %cst_74 = arith.constant 1.000000e+00 : f32
    %cst_75 = arith.constant -1.000000e+00 : f32
    %183 = vector.broadcast %cst_74 : f32 to vector<48x64xf32>
    %184 = vector.broadcast %cst_75 : f32 to vector<48x64xf32>
    %185 = arith.select %182, %183, %184 : vector<48x64xi1>, vector<48x64xf32>
    %186 = math.absf %180 : vector<48x64xf32>
    %cst_76 = arith.constant 0.327591091 : f32
    %187 = vector.broadcast %cst_76 : f32 to vector<48x64xf32>
    %188 = arith.mulf %187, %186 : vector<48x64xf32>
    %cst_77 = arith.constant 1.000000e+00 : f32
    %189 = vector.broadcast %cst_77 : f32 to vector<48x64xf32>
    %190 = arith.addf %189, %188 : vector<48x64xf32>
    %191 = tpu.reciprocal %190 {approx = true} : vector<48x64xf32> -> vector<48x64xf32>
    %cst_78 = arith.constant 1.06140542 : f32
    %192 = vector.broadcast %cst_78 : f32 to vector<48x64xf32>
    %193 = arith.mulf %192, %191 : vector<48x64xf32>
    %cst_79 = arith.constant -1.45315206 : f32
    %194 = vector.broadcast %cst_79 : f32 to vector<48x64xf32>
    %195 = arith.addf %193, %194 : vector<48x64xf32>
    %196 = arith.mulf %195, %191 : vector<48x64xf32>
    %cst_80 = arith.constant 1.42141378 : f32
    %197 = vector.broadcast %cst_80 : f32 to vector<48x64xf32>
    %198 = arith.addf %196, %197 : vector<48x64xf32>
    %199 = arith.mulf %198, %191 : vector<48x64xf32>
    %cst_81 = arith.constant -0.284496725 : f32
    %200 = vector.broadcast %cst_81 : f32 to vector<48x64xf32>
    %201 = arith.addf %199, %200 : vector<48x64xf32>
    %202 = arith.mulf %201, %191 : vector<48x64xf32>
    %cst_82 = arith.constant 0.254829586 : f32
    %203 = vector.broadcast %cst_82 : f32 to vector<48x64xf32>
    %204 = arith.addf %202, %203 : vector<48x64xf32>
    %205 = arith.mulf %204, %191 : vector<48x64xf32>
    %cst_83 = arith.constant 0.000000e+00 : f32
    %206 = vector.broadcast %cst_83 : f32 to vector<48x64xf32>
    %207 = arith.subf %206, %186 : vector<48x64xf32>
    %208 = arith.mulf %207, %186 : vector<48x64xf32>
    %209 = math.exp %208 : vector<48x64xf32>
    %210 = arith.mulf %205, %209 : vector<48x64xf32>
    %cst_84 = arith.constant 1.000000e+00 : f32
    %211 = vector.broadcast %cst_84 : f32 to vector<48x64xf32>
    %212 = arith.subf %211, %210 : vector<48x64xf32>
    %213 = arith.mulf %185, %212 : vector<48x64xf32>
    %cst_85 = arith.constant 1.000000e+00 : f32
    %214 = vector.broadcast %cst_85 : f32 to vector<48x64xf32>
    %215 = arith.addf %214, %213 : vector<48x64xf32>
    %216 = arith.mulf %178, %215 : vector<48x64xf32>
    %cst_86 = arith.constant dense<0.000000e+00> : vector<48x32xf32>
    %217 = tpu.matmul %216, %65, %cst_86 {dimension_numbers = #tpu.dot_dimension_numbers<[1], [0], [0], [1], [0, 0, 1, 1], [], []>} : vector<48x64xf32>, vector<64x32xf32>, vector<48x32xf32> -> vector<48x32xf32>
    %218 = arith.addf %173, %217 : vector<48x32xf32>
    %219 = vector.broadcast %72 : vector<1x32xf32> to vector<48x32xf32>
    %220 = arith.addf %218, %219 : vector<48x32xf32>
    %cst_87 = arith.constant dense<0.000000e+00> : vector<32xf32>
    %221 = vector.multi_reduction <add>, %220, %cst_87 [0] : vector<48x32xf32> to vector<32xf32>
    %222 = vector.shape_cast %221 : vector<32xf32> to vector<1x32xf32>
    %cst_88 = arith.constant 4.800000e+01 : f32
    %223 = vector.broadcast %cst_88 : f32 to vector<1x32xf32>
    %224 = arith.divf %222, %223 : vector<1x32xf32>
    %225 = vector.broadcast %224 : vector<1x32xf32> to vector<48x32xf32>
    %226 = arith.subf %220, %225 : vector<48x32xf32>
    %227 = arith.mulf %226, %226 : vector<48x32xf32>
    %cst_89 = arith.constant dense<0.000000e+00> : vector<32xf32>
    %228 = vector.multi_reduction <add>, %227, %cst_89 [0] : vector<48x32xf32> to vector<32xf32>
    %229 = vector.shape_cast %228 : vector<32xf32> to vector<1x32xf32>
    %cst_90 = arith.constant 4.800000e+01 : f32
    %230 = vector.broadcast %cst_90 : f32 to vector<1x32xf32>
    %231 = arith.divf %229, %230 : vector<1x32xf32>
    %232 = vector.broadcast %224 : vector<1x32xf32> to vector<48x32xf32>
    %233 = arith.subf %220, %232 : vector<48x32xf32>
    %cst_91 = arith.constant 9.99999974E-6 : f32
    %234 = vector.broadcast %cst_91 : f32 to vector<1x32xf32>
    %235 = arith.addf %231, %234 : vector<1x32xf32>
    %236 = math.rsqrt %235 : vector<1x32xf32>
    %237 = vector.broadcast %236 : vector<1x32xf32> to vector<48x32xf32>
    %238 = arith.mulf %233, %237 : vector<48x32xf32>
    %239 = vector.broadcast %73 : vector<1x32xf32> to vector<48x32xf32>
    %240 = arith.mulf %238, %239 : vector<48x32xf32>
    %241 = vector.broadcast %74 : vector<1x32xf32> to vector<48x32xf32>
    %242 = arith.addf %240, %241 : vector<48x32xf32>
    %c128 = arith.constant 128 : index
    %c0_92 = arith.constant 0 : index
    %243 = vector.load %arg1[%c128, %c0_92] : memref<256x192xf32, #tpu.memory_space<vmem>>, vector<32x192xf32>
    %c160 = arith.constant 160 : index
    %c0_93 = arith.constant 0 : index
    %244 = vector.load %arg1[%c160, %c0_93] : memref<256x192xf32, #tpu.memory_space<vmem>>, vector<32x64xf32>
    %c192 = arith.constant 192 : index
    %c0_94 = arith.constant 0 : index
    %245 = vector.load %arg1[%c192, %c0_94] : memref<256x192xf32, #tpu.memory_space<vmem>>, vector<64x32xf32>
    %c8_95 = arith.constant 8 : index
    %c0_96 = arith.constant 0 : index
    %246 = vector.load %arg2[%c8_95, %c0_96] : memref<16x192xf32, #tpu.memory_space<vmem>>, vector<8x192xf32>
    %247 = vector.extract_strided_slice %246 {offsets = [0, 0], sizes = [1, 192], strides = [1, 1]} : vector<8x192xf32> to vector<1x192xf32>
    %248 = vector.extract_strided_slice %246 {offsets = [1, 0], sizes = [1, 32], strides = [1, 1]} : vector<8x192xf32> to vector<1x32xf32>
    %249 = vector.extract_strided_slice %246 {offsets = [2, 0], sizes = [1, 32], strides = [1, 1]} : vector<8x192xf32> to vector<1x32xf32>
    %250 = vector.extract_strided_slice %246 {offsets = [3, 0], sizes = [1, 32], strides = [1, 1]} : vector<8x192xf32> to vector<1x32xf32>
    %251 = vector.extract_strided_slice %246 {offsets = [4, 0], sizes = [1, 64], strides = [1, 1]} : vector<8x192xf32> to vector<1x64xf32>
    %252 = vector.extract_strided_slice %246 {offsets = [5, 0], sizes = [1, 32], strides = [1, 1]} : vector<8x192xf32> to vector<1x32xf32>
    %253 = vector.extract_strided_slice %246 {offsets = [6, 0], sizes = [1, 32], strides = [1, 1]} : vector<8x192xf32> to vector<1x32xf32>
    %254 = vector.extract_strided_slice %246 {offsets = [7, 0], sizes = [1, 32], strides = [1, 1]} : vector<8x192xf32> to vector<1x32xf32>
    %cst_97 = arith.constant dense<0.000000e+00> : vector<48x192xf32>
    %255 = tpu.matmul %242, %243, %cst_97 {dimension_numbers = #tpu.dot_dimension_numbers<[1], [0], [0], [1], [0, 0, 1, 1], [], []>} : vector<48x32xf32>, vector<32x192xf32>, vector<48x192xf32> -> vector<48x192xf32>
    %256 = vector.broadcast %247 : vector<1x192xf32> to vector<48x192xf32>
    %257 = arith.addf %255, %256 : vector<48x192xf32>
    %258 = vector.extract_strided_slice %257 {offsets = [0, 0], sizes = [48, 8], strides = [1, 1]} : vector<48x192xf32> to vector<48x8xf32>
    %259 = vector.extract_strided_slice %257 {offsets = [0, 32], sizes = [48, 8], strides = [1, 1]} : vector<48x192xf32> to vector<48x8xf32>
    %260 = vector.extract_strided_slice %257 {offsets = [0, 64], sizes = [48, 32], strides = [1, 1]} : vector<48x192xf32> to vector<48x32xf32>
    %cst_98 = arith.constant dense<0.000000e+00> : vector<48x48xf32>
    %261 = tpu.matmul %258, %259, %cst_98 {dimension_numbers = #tpu.dot_dimension_numbers<[1], [1], [0], [0], [0, 0, 1, 0], [], []>} : vector<48x8xf32>, vector<48x8xf32>, vector<48x48xf32> -> vector<48x48xf32>
    %262 = arith.addf %261, %81 : vector<48x48xf32>
    %cst_99 = arith.constant -1.000000e+30 : f32
    %263 = vector.broadcast %cst_99 : f32 to vector<48x48xf32>
    %264 = arith.select %62, %262, %263 : vector<48x48xi1>, vector<48x48xf32>
    %cst_100 = arith.constant dense<0xFF800000> : vector<48xf32>
    %265 = vector.multi_reduction <maximumf>, %264, %cst_100 [1] : vector<48x48xf32> to vector<48xf32>
    %266 = vector.shape_cast %265 : vector<48xf32> to vector<48x1xf32>
    %267 = vector.broadcast %266 : vector<48x1xf32> to vector<48x48xf32>
    %268 = arith.subf %264, %267 : vector<48x48xf32>
    %269 = math.exp %268 : vector<48x48xf32>
    %cst_101 = arith.constant dense<0.000000e+00> : vector<48xf32>
    %270 = vector.multi_reduction <add>, %269, %cst_101 [1] : vector<48x48xf32> to vector<48xf32>
    %271 = vector.shape_cast %270 : vector<48xf32> to vector<48x1xf32>
    %272 = tpu.reciprocal %271 {approx = true} : vector<48x1xf32> -> vector<48x1xf32>
    %273 = vector.broadcast %272 : vector<48x1xf32> to vector<48x48xf32>
    %274 = arith.mulf %269, %273 : vector<48x48xf32>
    %cst_102 = arith.constant dense<0.000000e+00> : vector<48x32xf32>
    %275 = tpu.matmul %274, %260, %cst_102 {dimension_numbers = #tpu.dot_dimension_numbers<[1], [0], [0], [1], [0, 0, 1, 1], [], []>} : vector<48x48xf32>, vector<48x32xf32>, vector<48x32xf32> -> vector<48x32xf32>
    %276 = vector.extract_strided_slice %257 {offsets = [0, 8], sizes = [48, 8], strides = [1, 1]} : vector<48x192xf32> to vector<48x8xf32>
    %277 = vector.extract_strided_slice %257 {offsets = [0, 40], sizes = [48, 8], strides = [1, 1]} : vector<48x192xf32> to vector<48x8xf32>
    %278 = vector.extract_strided_slice %257 {offsets = [0, 96], sizes = [48, 32], strides = [1, 1]} : vector<48x192xf32> to vector<48x32xf32>
    %cst_103 = arith.constant dense<0.000000e+00> : vector<48x48xf32>
    %279 = tpu.matmul %276, %277, %cst_103 {dimension_numbers = #tpu.dot_dimension_numbers<[1], [1], [0], [0], [0, 0, 1, 0], [], []>} : vector<48x8xf32>, vector<48x8xf32>, vector<48x48xf32> -> vector<48x48xf32>
    %280 = arith.addf %279, %98 : vector<48x48xf32>
    %cst_104 = arith.constant -1.000000e+30 : f32
    %281 = vector.broadcast %cst_104 : f32 to vector<48x48xf32>
    %282 = arith.select %62, %280, %281 : vector<48x48xi1>, vector<48x48xf32>
    %cst_105 = arith.constant dense<0xFF800000> : vector<48xf32>
    %283 = vector.multi_reduction <maximumf>, %282, %cst_105 [1] : vector<48x48xf32> to vector<48xf32>
    %284 = vector.shape_cast %283 : vector<48xf32> to vector<48x1xf32>
    %285 = vector.broadcast %284 : vector<48x1xf32> to vector<48x48xf32>
    %286 = arith.subf %282, %285 : vector<48x48xf32>
    %287 = math.exp %286 : vector<48x48xf32>
    %cst_106 = arith.constant dense<0.000000e+00> : vector<48xf32>
    %288 = vector.multi_reduction <add>, %287, %cst_106 [1] : vector<48x48xf32> to vector<48xf32>
    %289 = vector.shape_cast %288 : vector<48xf32> to vector<48x1xf32>
    %290 = tpu.reciprocal %289 {approx = true} : vector<48x1xf32> -> vector<48x1xf32>
    %291 = vector.broadcast %290 : vector<48x1xf32> to vector<48x48xf32>
    %292 = arith.mulf %287, %291 : vector<48x48xf32>
    %cst_107 = arith.constant dense<0.000000e+00> : vector<48x32xf32>
    %293 = tpu.matmul %292, %278, %cst_107 {dimension_numbers = #tpu.dot_dimension_numbers<[1], [0], [0], [1], [0, 0, 1, 1], [], []>} : vector<48x48xf32>, vector<48x32xf32>, vector<48x32xf32> -> vector<48x32xf32>
    %294 = arith.addf %275, %293 : vector<48x32xf32>
    %295 = vector.extract_strided_slice %257 {offsets = [0, 16], sizes = [48, 8], strides = [1, 1]} : vector<48x192xf32> to vector<48x8xf32>
    %296 = vector.extract_strided_slice %257 {offsets = [0, 48], sizes = [48, 8], strides = [1, 1]} : vector<48x192xf32> to vector<48x8xf32>
    %297 = vector.extract_strided_slice %257 {offsets = [0, 128], sizes = [48, 32], strides = [1, 1]} : vector<48x192xf32> to vector<48x32xf32>
    %cst_108 = arith.constant dense<0.000000e+00> : vector<48x48xf32>
    %298 = tpu.matmul %295, %296, %cst_108 {dimension_numbers = #tpu.dot_dimension_numbers<[1], [1], [0], [0], [0, 0, 1, 0], [], []>} : vector<48x8xf32>, vector<48x8xf32>, vector<48x48xf32> -> vector<48x48xf32>
    %299 = arith.addf %298, %116 : vector<48x48xf32>
    %cst_109 = arith.constant -1.000000e+30 : f32
    %300 = vector.broadcast %cst_109 : f32 to vector<48x48xf32>
    %301 = arith.select %62, %299, %300 : vector<48x48xi1>, vector<48x48xf32>
    %cst_110 = arith.constant dense<0xFF800000> : vector<48xf32>
    %302 = vector.multi_reduction <maximumf>, %301, %cst_110 [1] : vector<48x48xf32> to vector<48xf32>
    %303 = vector.shape_cast %302 : vector<48xf32> to vector<48x1xf32>
    %304 = vector.broadcast %303 : vector<48x1xf32> to vector<48x48xf32>
    %305 = arith.subf %301, %304 : vector<48x48xf32>
    %306 = math.exp %305 : vector<48x48xf32>
    %cst_111 = arith.constant dense<0.000000e+00> : vector<48xf32>
    %307 = vector.multi_reduction <add>, %306, %cst_111 [1] : vector<48x48xf32> to vector<48xf32>
    %308 = vector.shape_cast %307 : vector<48xf32> to vector<48x1xf32>
    %309 = tpu.reciprocal %308 {approx = true} : vector<48x1xf32> -> vector<48x1xf32>
    %310 = vector.broadcast %309 : vector<48x1xf32> to vector<48x48xf32>
    %311 = arith.mulf %306, %310 : vector<48x48xf32>
    %cst_112 = arith.constant dense<0.000000e+00> : vector<48x32xf32>
    %312 = tpu.matmul %311, %297, %cst_112 {dimension_numbers = #tpu.dot_dimension_numbers<[1], [0], [0], [1], [0, 0, 1, 1], [], []>} : vector<48x48xf32>, vector<48x32xf32>, vector<48x32xf32> -> vector<48x32xf32>
    %313 = arith.addf %294, %312 : vector<48x32xf32>
    %314 = vector.extract_strided_slice %257 {offsets = [0, 24], sizes = [48, 8], strides = [1, 1]} : vector<48x192xf32> to vector<48x8xf32>
    %315 = vector.extract_strided_slice %257 {offsets = [0, 56], sizes = [48, 8], strides = [1, 1]} : vector<48x192xf32> to vector<48x8xf32>
    %316 = vector.extract_strided_slice %257 {offsets = [0, 160], sizes = [48, 32], strides = [1, 1]} : vector<48x192xf32> to vector<48x32xf32>
    %cst_113 = arith.constant dense<0.000000e+00> : vector<48x48xf32>
    %317 = tpu.matmul %314, %315, %cst_113 {dimension_numbers = #tpu.dot_dimension_numbers<[1], [1], [0], [0], [0, 0, 1, 0], [], []>} : vector<48x8xf32>, vector<48x8xf32>, vector<48x48xf32> -> vector<48x48xf32>
    %318 = arith.addf %317, %134 : vector<48x48xf32>
    %cst_114 = arith.constant -1.000000e+30 : f32
    %319 = vector.broadcast %cst_114 : f32 to vector<48x48xf32>
    %320 = arith.select %62, %318, %319 : vector<48x48xi1>, vector<48x48xf32>
    %cst_115 = arith.constant dense<0xFF800000> : vector<48xf32>
    %321 = vector.multi_reduction <maximumf>, %320, %cst_115 [1] : vector<48x48xf32> to vector<48xf32>
    %322 = vector.shape_cast %321 : vector<48xf32> to vector<48x1xf32>
    %323 = vector.broadcast %322 : vector<48x1xf32> to vector<48x48xf32>
    %324 = arith.subf %320, %323 : vector<48x48xf32>
    %325 = math.exp %324 : vector<48x48xf32>
    %cst_116 = arith.constant dense<0.000000e+00> : vector<48xf32>
    %326 = vector.multi_reduction <add>, %325, %cst_116 [1] : vector<48x48xf32> to vector<48xf32>
    %327 = vector.shape_cast %326 : vector<48xf32> to vector<48x1xf32>
    %328 = tpu.reciprocal %327 {approx = true} : vector<48x1xf32> -> vector<48x1xf32>
    %329 = vector.broadcast %328 : vector<48x1xf32> to vector<48x48xf32>
    %330 = arith.mulf %325, %329 : vector<48x48xf32>
    %cst_117 = arith.constant dense<0.000000e+00> : vector<48x32xf32>
    %331 = tpu.matmul %330, %316, %cst_117 {dimension_numbers = #tpu.dot_dimension_numbers<[1], [0], [0], [1], [0, 0, 1, 1], [], []>} : vector<48x48xf32>, vector<48x32xf32>, vector<48x32xf32> -> vector<48x32xf32>
    %332 = arith.addf %313, %331 : vector<48x32xf32>
    %333 = vector.broadcast %248 : vector<1x32xf32> to vector<48x32xf32>
    %334 = arith.addf %332, %333 : vector<48x32xf32>
    %335 = arith.addf %242, %334 : vector<48x32xf32>
    %cst_118 = arith.constant dense<0.000000e+00> : vector<32xf32>
    %336 = vector.multi_reduction <add>, %335, %cst_118 [0] : vector<48x32xf32> to vector<32xf32>
    %337 = vector.shape_cast %336 : vector<32xf32> to vector<1x32xf32>
    %cst_119 = arith.constant 4.800000e+01 : f32
    %338 = vector.broadcast %cst_119 : f32 to vector<1x32xf32>
    %339 = arith.divf %337, %338 : vector<1x32xf32>
    %340 = vector.broadcast %339 : vector<1x32xf32> to vector<48x32xf32>
    %341 = arith.subf %335, %340 : vector<48x32xf32>
    %342 = arith.mulf %341, %341 : vector<48x32xf32>
    %cst_120 = arith.constant dense<0.000000e+00> : vector<32xf32>
    %343 = vector.multi_reduction <add>, %342, %cst_120 [0] : vector<48x32xf32> to vector<32xf32>
    %344 = vector.shape_cast %343 : vector<32xf32> to vector<1x32xf32>
    %cst_121 = arith.constant 4.800000e+01 : f32
    %345 = vector.broadcast %cst_121 : f32 to vector<1x32xf32>
    %346 = arith.divf %344, %345 : vector<1x32xf32>
    %347 = vector.broadcast %339 : vector<1x32xf32> to vector<48x32xf32>
    %348 = arith.subf %335, %347 : vector<48x32xf32>
    %cst_122 = arith.constant 9.99999974E-6 : f32
    %349 = vector.broadcast %cst_122 : f32 to vector<1x32xf32>
    %350 = arith.addf %346, %349 : vector<1x32xf32>
    %351 = math.rsqrt %350 : vector<1x32xf32>
    %352 = vector.broadcast %351 : vector<1x32xf32> to vector<48x32xf32>
    %353 = arith.mulf %348, %352 : vector<48x32xf32>
    %354 = vector.broadcast %249 : vector<1x32xf32> to vector<48x32xf32>
    %355 = arith.mulf %353, %354 : vector<48x32xf32>
    %356 = vector.broadcast %250 : vector<1x32xf32> to vector<48x32xf32>
    %357 = arith.addf %355, %356 : vector<48x32xf32>
    %cst_123 = arith.constant dense<0.000000e+00> : vector<48x64xf32>
    %358 = tpu.matmul %357, %244, %cst_123 {dimension_numbers = #tpu.dot_dimension_numbers<[1], [0], [0], [1], [0, 0, 1, 1], [], []>} : vector<48x32xf32>, vector<32x64xf32>, vector<48x64xf32> -> vector<48x64xf32>
    %359 = vector.broadcast %251 : vector<1x64xf32> to vector<48x64xf32>
    %360 = arith.addf %358, %359 : vector<48x64xf32>
    %cst_124 = arith.constant 5.000000e-01 : f32
    %361 = vector.broadcast %cst_124 : f32 to vector<48x64xf32>
    %362 = arith.mulf %361, %360 : vector<48x64xf32>
    %cst_125 = arith.constant 0.707106769 : f32
    %363 = vector.broadcast %cst_125 : f32 to vector<48x64xf32>
    %364 = arith.mulf %360, %363 : vector<48x64xf32>
    %cst_126 = arith.constant 0.000000e+00 : f32
    %365 = vector.broadcast %cst_126 : f32 to vector<48x64xf32>
    %366 = arith.cmpf oge, %364, %365 : vector<48x64xf32>
    %cst_127 = arith.constant 1.000000e+00 : f32
    %cst_128 = arith.constant -1.000000e+00 : f32
    %367 = vector.broadcast %cst_127 : f32 to vector<48x64xf32>
    %368 = vector.broadcast %cst_128 : f32 to vector<48x64xf32>
    %369 = arith.select %366, %367, %368 : vector<48x64xi1>, vector<48x64xf32>
    %370 = math.absf %364 : vector<48x64xf32>
    %cst_129 = arith.constant 0.327591091 : f32
    %371 = vector.broadcast %cst_129 : f32 to vector<48x64xf32>
    %372 = arith.mulf %371, %370 : vector<48x64xf32>
    %cst_130 = arith.constant 1.000000e+00 : f32
    %373 = vector.broadcast %cst_130 : f32 to vector<48x64xf32>
    %374 = arith.addf %373, %372 : vector<48x64xf32>
    %375 = tpu.reciprocal %374 {approx = true} : vector<48x64xf32> -> vector<48x64xf32>
    %cst_131 = arith.constant 1.06140542 : f32
    %376 = vector.broadcast %cst_131 : f32 to vector<48x64xf32>
    %377 = arith.mulf %376, %375 : vector<48x64xf32>
    %cst_132 = arith.constant -1.45315206 : f32
    %378 = vector.broadcast %cst_132 : f32 to vector<48x64xf32>
    %379 = arith.addf %377, %378 : vector<48x64xf32>
    %380 = arith.mulf %379, %375 : vector<48x64xf32>
    %cst_133 = arith.constant 1.42141378 : f32
    %381 = vector.broadcast %cst_133 : f32 to vector<48x64xf32>
    %382 = arith.addf %380, %381 : vector<48x64xf32>
    %383 = arith.mulf %382, %375 : vector<48x64xf32>
    %cst_134 = arith.constant -0.284496725 : f32
    %384 = vector.broadcast %cst_134 : f32 to vector<48x64xf32>
    %385 = arith.addf %383, %384 : vector<48x64xf32>
    %386 = arith.mulf %385, %375 : vector<48x64xf32>
    %cst_135 = arith.constant 0.254829586 : f32
    %387 = vector.broadcast %cst_135 : f32 to vector<48x64xf32>
    %388 = arith.addf %386, %387 : vector<48x64xf32>
    %389 = arith.mulf %388, %375 : vector<48x64xf32>
    %cst_136 = arith.constant 0.000000e+00 : f32
    %390 = vector.broadcast %cst_136 : f32 to vector<48x64xf32>
    %391 = arith.subf %390, %370 : vector<48x64xf32>
    %392 = arith.mulf %391, %370 : vector<48x64xf32>
    %393 = math.exp %392 : vector<48x64xf32>
    %394 = arith.mulf %389, %393 : vector<48x64xf32>
    %cst_137 = arith.constant 1.000000e+00 : f32
    %395 = vector.broadcast %cst_137 : f32 to vector<48x64xf32>
    %396 = arith.subf %395, %394 : vector<48x64xf32>
    %397 = arith.mulf %369, %396 : vector<48x64xf32>
    %cst_138 = arith.constant 1.000000e+00 : f32
    %398 = vector.broadcast %cst_138 : f32 to vector<48x64xf32>
    %399 = arith.addf %398, %397 : vector<48x64xf32>
    %400 = arith.mulf %362, %399 : vector<48x64xf32>
    %cst_139 = arith.constant dense<0.000000e+00> : vector<48x32xf32>
    %401 = tpu.matmul %400, %245, %cst_139 {dimension_numbers = #tpu.dot_dimension_numbers<[1], [0], [0], [1], [0, 0, 1, 1], [], []>} : vector<48x64xf32>, vector<64x32xf32>, vector<48x32xf32> -> vector<48x32xf32>
    %402 = arith.addf %357, %401 : vector<48x32xf32>
    %403 = vector.broadcast %252 : vector<1x32xf32> to vector<48x32xf32>
    %404 = arith.addf %402, %403 : vector<48x32xf32>
    %cst_140 = arith.constant dense<0.000000e+00> : vector<32xf32>
    %405 = vector.multi_reduction <add>, %404, %cst_140 [0] : vector<48x32xf32> to vector<32xf32>
    %406 = vector.shape_cast %405 : vector<32xf32> to vector<1x32xf32>
    %cst_141 = arith.constant 4.800000e+01 : f32
    %407 = vector.broadcast %cst_141 : f32 to vector<1x32xf32>
    %408 = arith.divf %406, %407 : vector<1x32xf32>
    %409 = vector.broadcast %408 : vector<1x32xf32> to vector<48x32xf32>
    %410 = arith.subf %404, %409 : vector<48x32xf32>
    %411 = arith.mulf %410, %410 : vector<48x32xf32>
    %cst_142 = arith.constant dense<0.000000e+00> : vector<32xf32>
    %412 = vector.multi_reduction <add>, %411, %cst_142 [0] : vector<48x32xf32> to vector<32xf32>
    %413 = vector.shape_cast %412 : vector<32xf32> to vector<1x32xf32>
    %cst_143 = arith.constant 4.800000e+01 : f32
    %414 = vector.broadcast %cst_143 : f32 to vector<1x32xf32>
    %415 = arith.divf %413, %414 : vector<1x32xf32>
    %416 = vector.broadcast %408 : vector<1x32xf32> to vector<48x32xf32>
    %417 = arith.subf %404, %416 : vector<48x32xf32>
    %cst_144 = arith.constant 9.99999974E-6 : f32
    %418 = vector.broadcast %cst_144 : f32 to vector<1x32xf32>
    %419 = arith.addf %415, %418 : vector<1x32xf32>
    %420 = math.rsqrt %419 : vector<1x32xf32>
    %421 = vector.broadcast %420 : vector<1x32xf32> to vector<48x32xf32>
    %422 = arith.mulf %417, %421 : vector<48x32xf32>
    %423 = vector.broadcast %253 : vector<1x32xf32> to vector<48x32xf32>
    %424 = arith.mulf %422, %423 : vector<48x32xf32>
    %425 = vector.broadcast %254 : vector<1x32xf32> to vector<48x32xf32>
    %426 = arith.addf %424, %425 : vector<48x32xf32>
    %427 = vector.extract_strided_slice %426 {offsets = [0, 0], sizes = [8, 32], strides = [1, 1]} : vector<48x32xf32> to vector<8x32xf32>
    %c56 = arith.constant 56 : index
    %c0_145 = arith.constant 0 : index
    %428 = vector.load %arg3[%c56, %c0_145] : memref<256x32xf32, #tpu.memory_space<vmem>>, vector<32x24xf32>
    %cst_146 = arith.constant dense<0.000000e+00> : vector<8x24xf32>
    %429 = tpu.matmul %427, %428, %cst_146 {dimension_numbers = #tpu.dot_dimension_numbers<[1], [0], [0], [1], [0, 0, 1, 1], [], []>} : vector<8x32xf32>, vector<32x24xf32>, vector<8x24xf32> -> vector<8x24xf32>
    %430 = vector.extract_strided_slice %426 {offsets = [8, 0], sizes = [8, 32], strides = [1, 1]} : vector<48x32xf32> to vector<8x32xf32>
    %c88 = arith.constant 88 : index
    %c0_147 = arith.constant 0 : index
    %431 = vector.load %arg3[%c88, %c0_147] : memref<256x32xf32, #tpu.memory_space<vmem>>, vector<32x24xf32>
    %cst_148 = arith.constant dense<0.000000e+00> : vector<8x24xf32>
    %432 = tpu.matmul %430, %431, %cst_148 {dimension_numbers = #tpu.dot_dimension_numbers<[1], [0], [0], [1], [0, 0, 1, 1], [], []>} : vector<8x32xf32>, vector<32x24xf32>, vector<8x24xf32> -> vector<8x24xf32>
    %433 = arith.addf %429, %432 : vector<8x24xf32>
    %434 = vector.extract_strided_slice %426 {offsets = [16, 0], sizes = [8, 32], strides = [1, 1]} : vector<48x32xf32> to vector<8x32xf32>
    %c120 = arith.constant 120 : index
    %c0_149 = arith.constant 0 : index
    %435 = vector.load %arg3[%c120, %c0_149] : memref<256x32xf32, #tpu.memory_space<vmem>>, vector<32x24xf32>
    %cst_150 = arith.constant dense<0.000000e+00> : vector<8x24xf32>
    %436 = tpu.matmul %434, %435, %cst_150 {dimension_numbers = #tpu.dot_dimension_numbers<[1], [0], [0], [1], [0, 0, 1, 1], [], []>} : vector<8x32xf32>, vector<32x24xf32>, vector<8x24xf32> -> vector<8x24xf32>
    %437 = arith.addf %433, %436 : vector<8x24xf32>
    %438 = vector.extract_strided_slice %426 {offsets = [24, 0], sizes = [8, 32], strides = [1, 1]} : vector<48x32xf32> to vector<8x32xf32>
    %c152 = arith.constant 152 : index
    %c0_151 = arith.constant 0 : index
    %439 = vector.load %arg3[%c152, %c0_151] : memref<256x32xf32, #tpu.memory_space<vmem>>, vector<32x24xf32>
    %cst_152 = arith.constant dense<0.000000e+00> : vector<8x24xf32>
    %440 = tpu.matmul %438, %439, %cst_152 {dimension_numbers = #tpu.dot_dimension_numbers<[1], [0], [0], [1], [0, 0, 1, 1], [], []>} : vector<8x32xf32>, vector<32x24xf32>, vector<8x24xf32> -> vector<8x24xf32>
    %441 = arith.addf %437, %440 : vector<8x24xf32>
    %442 = vector.extract_strided_slice %426 {offsets = [32, 0], sizes = [8, 32], strides = [1, 1]} : vector<48x32xf32> to vector<8x32xf32>
    %c184 = arith.constant 184 : index
    %c0_153 = arith.constant 0 : index
    %443 = vector.load %arg3[%c184, %c0_153] : memref<256x32xf32, #tpu.memory_space<vmem>>, vector<32x24xf32>
    %cst_154 = arith.constant dense<0.000000e+00> : vector<8x24xf32>
    %444 = tpu.matmul %442, %443, %cst_154 {dimension_numbers = #tpu.dot_dimension_numbers<[1], [0], [0], [1], [0, 0, 1, 1], [], []>} : vector<8x32xf32>, vector<32x24xf32>, vector<8x24xf32> -> vector<8x24xf32>
    %445 = arith.addf %441, %444 : vector<8x24xf32>
    %446 = vector.extract_strided_slice %426 {offsets = [40, 0], sizes = [8, 32], strides = [1, 1]} : vector<48x32xf32> to vector<8x32xf32>
    %c216 = arith.constant 216 : index
    %c0_155 = arith.constant 0 : index
    %447 = vector.load %arg3[%c216, %c0_155] : memref<256x32xf32, #tpu.memory_space<vmem>>, vector<32x24xf32>
    %cst_156 = arith.constant dense<0.000000e+00> : vector<8x24xf32>
    %448 = tpu.matmul %446, %447, %cst_156 {dimension_numbers = #tpu.dot_dimension_numbers<[1], [0], [0], [1], [0, 0, 1, 1], [], []>} : vector<8x32xf32>, vector<32x24xf32>, vector<8x24xf32> -> vector<8x24xf32>
    %449 = arith.addf %445, %448 : vector<8x24xf32>
    %c248 = arith.constant 248 : index
    %c0_157 = arith.constant 0 : index
    %450 = vector.load %arg3[%c248, %c0_157] : memref<256x32xf32, #tpu.memory_space<vmem>>, vector<1x24xf32>
    %451 = vector.broadcast %450 : vector<1x24xf32> to vector<8x24xf32>
    %452 = arith.addf %449, %451 : vector<8x24xf32>
    %453 = vector.broadcast %2 : vector<8x1xf32> to vector<8x24xf32>
    %454 = arith.subf %452, %453 : vector<8x24xf32>
    %455 = vector.broadcast %3 : vector<8x1xf32> to vector<8x24xf32>
    %456 = arith.mulf %454, %455 : vector<8x24xf32>
    %457 = vector.broadcast %21 : vector<8x1xf32> to vector<8x24xf32>
    %458 = arith.mulf %456, %457 : vector<8x24xf32>
    %459 = vector.broadcast %8 : vector<8x1xf32> to vector<8x24xf32>
    %460 = arith.addf %458, %459 : vector<8x24xf32>
    %c0_158 = arith.constant 0 : index
    %c0_159 = arith.constant 0 : index
    %461 = vector.load %arg4[%c0_158, %c0_159] : memref<8x24xf32, #tpu.memory_space<vmem>>, vector<8x24xf32>
    tpu.vector_store %arg4[%c0_158, %c0_159], %460 {strides = array<i32>} : memref<8x24xf32, #tpu.memory_space<vmem>>, vector<8x24xf32>,
    return
  }
}

</mosaic_0001>

<bundles_post_ra>
// kernel: tile.10
= control target key start
LH: loop header
LB: loop body
LE: loop exit
PB: predicated region body
PF: predicated region fallthrough
CT: control target
= control target key end

     0   :  { %s22_s0 = inlined_call_operand.vmem [shape: f32[4], index: 0, kind: input, shape index: {}]   ;;  %s23_s1 = inlined_call_operand.vmem [shape: f32[2,1,1,4], index: 1, kind: output, shape index: {}]  }
   0x1   :  { %v4_v0 = vld [vmem:[%s22_s0] ss:$0 sm:$0xff] }
   0x2   :  { %5 = vst [vmem:[%s23_s1] sm:$0x3] %v4_v0 }

// kernel: tile.1
= control target key start
LH: loop header
LB: loop body
LE: loop exit
PB: predicated region body
PF: predicated region fallthrough
CT: control target
= control target key end

     0   :  { %s34_s8 = smov 125   ;;  %vm7_vm0 = vcmask 7168   ;;  %s35_s11 = smov 126   ;;  %s61_s0 = inlined_call_operand.vmem [shape: f32[2,1,1,4], index: 0, kind: input, shape index: {}]   ;;  %s62_s1 = inlined_call_operand.vmem [shape: f32[8,1], index: 1, kind: output, shape index: {}]  }
   0x1   :  { %v4_v0 = vld [vmem:[%s61_s0] sm:$0x3]  ;;  %s33_s0 = smov 127  }
   0x2   :  { %5 = vst [vmem:[#allocation0] sm:$0x3] %v4_v0 }
   0x9   :  { %v9_v1 = vld [vmem:[#allocation0] sm:$0x3]  }
   0xa   :  { %v21_v2 = vld [vmem:[#allocation0] sm:$0x3]   ;;  %10 = vrot.lane.b32.xlu0 %v9_v1, %s33_s0 }
   0xb   :  { %22 = vrot.lane.b32.xlu1 %v21_v2, %s34_s8  ;;  %v6_v3 = vld [vmem:[#allocation0] sm:$0x3]  }
   0xc   :  { %v15_v4 = vld [vmem:[#allocation0] sm:$0x3]   ;;  %8 = vst.msk [vmem:[%s62_s1] ss:$4 sm:$0x3] %vm7_vm0, %v6_v3  }
   0xe   :  { %16 = vrot.lane.b32.xlu0 %v15_v4, %s35_s11 }
  0x7c   :  { %v11_v5 = vpop.permute.xlu0 %10  }
  0x7d   :  { %v23_v6 = vpop.permute.xlu1 %22   ;;  %27 = vst.msk [vmem:[%s62_s1 + $0x1] ss:$4 sm:$0x3] %vm7_vm0, %v11_v5  }
  0x7e   :  { %29 = vst.msk [vmem:[%s62_s1 + $0x3] ss:$4 sm:$0x3] %vm7_vm0, %v23_v6  }
  0x80   :  { %v17_v7 = vpop.permute.xlu0 %16  }
  0x81   :  { %28 = vst.msk [vmem:[%s62_s1 + $0x2] ss:$4 sm:$0x3] %vm7_vm0, %v17_v7  }

// kernel: patchtst_random_mask_forward.1
= control target key start
LH: loop header
LB: loop body
LE: loop exit
PB: predicated region body
PF: predicated region fallthrough
CT: control target
= control target key end

     0   :  { %s8924_s0 = inlined_call_operand.vmem [shape: f32[8,51], index: 0, kind: input, shape index: {}]   ;;  %s8925_s1 = inlined_call_operand.vmem [shape: f32[256,192], index: 1, kind: input, shape index: {}]   ;;  %s8926_s2 = inlined_call_operand.vmem [shape: f32[16,192], index: 2, kind: input, shape index: {}]   ;;  %s8927_s3 = inlined_call_operand.vmem [shape: f32[256,32], index: 3, kind: input, shape index: {}]   ;;  %s8928_s4 = inlined_call_operand.hbm [shape: f32[8,24], index: 4, kind: output, shape index: {}]  }
   0x1   :  { %v18_v0 = vld [vmem:[%s8924_s0] sm:$0xff] }
   0x2   :  { %9 = vsyncpa [#allocation4], 0  ;;  %s6953_s17 = smov 104   ;;  %vm23_vm0 = vcmask 195584   ;;  %v6954_v3 = vmov 48   ;;  %v6955_v4 = vmov 49   ;;  %v375_v47 = vlaneseq }
   0x3   :  { %20 = vrot.lane.b32.xlu0 %v18_v0, %s6953_s17  ;;  %6458 = vset.pattern.permute.xlu1 %v6955_v4  ;;  %v53_v11 = vld [vmem:[%s8927_s3] sm:$0xff]  ;;  %v8929_v12 = vmov 0.0   ;;  %vm6957_vm1 = vmmov 0   ;;  %s6958_s20 = smov 112   ;;  %vm55_vm2 = vcmask 261120   ;;  %v54_v23 = vld [vmem:[%s8927_s3 + $0x8] sm:$0xff] }
   0x4   :  { %6457 = vset.pattern.permute.xlu0 %v6954_v3  ;;  %5558 = vmatprep.subr.mxu0 %v8929_v12  ;;  %56 = vst.msk [vmem:[#allocation2] sm:$0xff] %vm55_vm2, %v54_v23  ;;  %s6959_s23 = smov 96   ;;  %s6960_s24 = smov 88   ;;  %v398_v24 = vld [vmem:[%s8925_s1 + $0x8] sm:$0xff]  ;;  %v400_v25 = vld [vmem:[%s8925_s1 + $0x18] sm:$0xff]  ;;  %vm63_vm3 = vcmask 64512  }
   0x5   :  { %5560 = vmatprep.mubr.msk.f32.mxu0 %vm6957_vm1, %v8929_v12  ;;  %5559 = vmatpush3.msra.mxu0 %v53_v11  ;;  %v6064_v26 = vpack.c.bf16 %v400_v25, %v398_v24  ;;  %v397_v28 = vld [vmem:[%s8925_s1] sm:$0xff]  ;;  %v399_v29 = vld [vmem:[%s8925_s1 + $0x10] sm:$0xff]  ;;  %v402_v31 = vld [vmem:[%s8925_s1 + $0x28] sm:$0xff]  ;;  %v7078_v52 = vshrl.u32 %v375_v47, 7  ;;  %s6961_s7 = smov 120   ;;  %s6962_s8 = smov 80  }
   0x6   :  { %5563 = vmatprep.subr.mxu1 %v8929_v12  ;;  %5565 = vmatprep.mubr.msk.f32.mxu1 %vm6957_vm1, %v8929_v12  ;;  %v404_v32 = vld [vmem:[%s8925_s1 + $0x38] sm:$0xff]  ;;  %v6066_v33 = vpack.c.bf16 %v399_v29, %v397_v28  ;;  %v401_v35 = vld [vmem:[%s8925_s1 + $0x20] sm:$0xff]  ;;  %v403_v36 = vld [vmem:[%s8925_s1 + $0x30] sm:$0xff]  ;;  %s6963_s9 = smov 72   ;;  %s6964_s10 = smov 32   ;;  %vm689_vm6 = vcmask 392192  }
   0x7   :  { %5564 = vmatpush3.msra.mxu1 %v53_v11  ;;  %5568 = vmatprep.subr.mxu0 %v8929_v12  ;;  %v6068_v34 = vpack.c.bf16 %v404_v32, %v402_v31  ;;  %v6070_v38 = vpack.c.bf16 %v403_v36, %v401_v35  ;;  %v57_v41 = vld [vmem:[%s8927_s3 + $0x10] sm:$0xff]  ;;  %v59_v43 = vld [vmem:[%s8927_s3 + $0x18] sm:$0xff]  ;;  %v138_v48 = vld [vmem:[%s8927_s3 + $0x20] sm:$0xff]  ;;  %v7085_v57 = vsub.s32 0, %v7078_v52  ;;  %s6965_s11 = smov 64   ;;  %vm2291_vm14 = vcmask 523264  }
   0x8   :  { %5573 = vmatprep.subr.mxu1 %v8929_v12  ;;  %58 = vst.msk [vmem:[#allocation2 + $0x8] sm:$0xff] %vm55_vm2, %v57_v41  ;;  %v215_v53 = vld [vmem:[%s8927_s3 + $0x28] sm:$0xff]  ;;  %v292_v59 = vld [vmem:[%s8927_s3 + $0x30] sm:$0xff]  ;;  %v417_v60 = vld [vmem:[%s8926_s2] sm:$0xff]  ;;  %s6969_s18 = smov [#allocation3]  }
   0x9   :  { %vm7131_vm4 = vmpackc.low %vm63_vm3, %vm63_vm3  ;;  %s5081_s19 = sshll.u32 %s6969_s18, 4  ;;  %s5082_s19 = int_to_ptr.vmem [resolvable:$true] %s5081_s19 }
   0xa   :  { %s6929_s21 = scalar_lea.vmem %s5082_s19, 128  ;;  %p6934_p1 = scmp.lt.s32.totalorder %s5082_s19, %s5082_s19 }
   0xb   :  { %v369_v40 = vld [vmem:[#allocation2] sm:$0xff]  ;;  %p6930_p0 = scmp.ne.s32.totalorder %s5082_s19, %s6929_s21  ;;  %p6935_p2 = scmp.lt.s32.totalorder %s6929_s21, %s6929_s21 }
   0xd   :  { %p6936_p3 = por %p6935_p2, %p6934_p1 }
   0xf   :  { %v370_v42 = vld [vmem:[#allocation2 + $0x8] sm:$0xff]  ;;  %p6937_p4 = pnand %p6936_p3, %p6930_p0 }
  0x75   :  { %v21_v1 = vpop.permute.xlu0 %20 }
  0x76   :  { %v24_v2 = vsel %vm23_vm0, %v21_v1, 0.0 }
  0x77   :  { %25 = vadd.xlane.f32.xlu0 %v24_v2 }
  0x8d   :  { %44 = vperm.xlu0 %6457, %v18_v0  }
 0x104   :  { %v26_v5 = vpop.xlane.xlu0 %25 }
 0x105   :  { %v7000_v6 = vmul.f32 0.041666668, %v26_v5 }
 0x107   :  { %8961 = vst [vmem:[#allocation6_spill] sm:$0xff] %v7000_v6  ;;  %v29_v7 = vsub.f32 %v18_v0, %v7000_v6 }
 0x109   :  { %v30_v8 = vmul.f32 %v29_v7, %v29_v7 }
 0x10b   :  { %32 = vrot.lane.b32.xlu1 %v30_v8, %s6953_s17  ;;  %v418_v8 = vld [vmem:[%s8926_s2 + $0x8] sm:$0xff] }
 0x10c   :  { %v45_v17 = vpop.permute.xlu0 %44 }
 0x17d   :  { %v33_v9 = vpop.permute.xlu1 %32 }
 0x17e   :  { %v35_v10 = vsel %vm23_vm0, %v33_v9, 0.0  ;;  %v426_v9 = vrot.slane %v418_v8, %v7085_v57 }
 0x17f   :  { %36 = vadd.xlane.f32.xlu1 %v35_v10 }
 0x190   :  { %49 = vperm.xlu1 %6458, %v18_v0   ;;  %v422_v0 = vrot.slane %v417_v60, %v7085_v57 }
 0x20c   :  { %v37_v13 = vpop.xlane.xlu1 %36 }
 0x20d   :  { %v38_v14 = vmul.f32 0.041666668, %v37_v13 }
 0x20f   :  { %v39_v15 = vadd.f32 1e-05, %v38_v14 }
 0x210   :  { %v7018_v20 = vpop.permute.xlu1 %49 }
 0x211   :  { %6670 = vrsqrt.f32 %v39_v15  ;;  %8963 = vst [vmem:[#allocation8_spill] sm:$0xff] %v7018_v20 }
 0x21b   :  { %v6671_v16 = vpop.eup %6670 }
 0x21c   :  { %v7016_v18 = vmul.f32 %v6671_v16, %v39_v15  ;;  %v42_v19 = vmul.f32 %v6671_v16, %v29_v7 }
 0x21e   :  { %8962 = vst [vmem:[#allocation7_spill] sm:$0xff] %v7016_v18  ;;  %v47_v21 = vmul.f32 %v45_v17, %v42_v19 }
 0x220   :  { %v52_v22 = vadd.f32 %v7018_v20, %v47_v21 }
 0x222   :  { %61 = vrot.lane.b32.xlu1 %v52_v22, %s6958_s20 }
 0x226   :  { %139 = vrot.lane.b32.xlu1 %v52_v22, %s6953_s17 }
 0x22a   :  { %216 = vrot.lane.b32.xlu1 %v52_v22, %s6959_s23 }
 0x22e   :  { %293 = vrot.lane.b32.xlu1 %v52_v22, %s6960_s24 }
 0x294   :  { %v62_v27 = vpop.permute.xlu1 %61 }
 0x295   :  { %5561 = vmatmul.mubr.msk.f32.vlgmr.msra.gmra.mrb[0].mxu0 %vm63_vm3, %v62_v27 }
 0x296   :  { %5569 = vmatpush3.msra.mxu0 %v53_v11  ;;  %5570 = vmatprep.mubr.msk.f32.mxu0 %vm6957_vm1, %v8929_v12 }
 0x297   :  { %6065 = vmatprep.subr.bf16.mxu0 %v6064_v26 }
 0x298   :  { %v140_v30 = vpop.permute.xlu1 %139 }
 0x299   :  { %5566 = vmatmul.mubr.msk.f32.vlgmr.msra.gmra.mrb[0].mxu1 %vm63_vm3, %v140_v30 }
 0x29a   :  { %5574 = vmatpush3.msra.mxu1 %v53_v11  ;;  %5575 = vmatprep.mubr.msk.f32.mxu1 %vm6957_vm1, %v8929_v12 }
 0x29c   :  { %v217_v37 = vpop.permute.xlu1 %216 }
 0x29d   :  { %5571 = vmatmul.mubr.msk.f32.vlgmr.msra.gmra.mrb[2].mxu0 %vm63_vm3, %v217_v37 }
 0x29e   :  { %6067 = vmatpush1.bf16.msra.mxu0 %v6066_v33  ;;  %509 = vmatprep.mubr.f32.mxu0 %v8929_v12 }
 0x29f   :  { %6069 = vmatprep.subr.bf16.mxu0 %v6068_v34 }
 0x2a0   :  { %v294_v39 = vpop.permute.xlu1 %293 }
 0x2a1   :  { %5576 = vmatmul.mubr.msk.f32.vlgmr.msra.gmra.mrb[2].mxu1 %vm63_vm3, %v294_v39 }
 0x2a2   :  { %6071 = vmatpush1.bf16.msra.mxu0 %v6070_v38 }
 0x2a5   :  { %5093 = vmatmul.mubr.msk.f32.vlgmr.msra.gmra.mrb[4].mxu0 %vm55_vm2, %v369_v40 }
 0x2a6   :  { %515 = vmatprep.mubr.f32.mxu0 %v8929_v12 }
 0x2a9   :  { %5094 = vmatmul.mubr.msk.f32.gmra.mrb[6].mxu0 %vm55_vm2, %v370_v42 }
 0x2aa   :  { %521 = vmatprep.mubr.f32.mxu0 %v8929_v12 }
 0x368   :  { %v132_v44 = vpop.f32.mrb[0].mxu0 }
 0x369   :  { %v136_v45 = vadd.f32 %v132_v44, %v59_v43  ;;  %v5562_v46 = vpop.f32.mrb[1].mxu0 }
 0x36b   :  { %137 = vst.msk [vmem:[#allocation2 + $0x10] sm:$0xff] %vm55_vm2, %v136_v45 }
 0x36c   :  { %v209_v49 = vpop.f32.mrb[0].mxu1 }
 0x36d   :  { %v213_v50 = vadd.f32 %v209_v49, %v138_v48  ;;  %v5567_v51 = vpop.f32.mrb[1].mxu1 }
 0x36f   :  { %214 = vst.msk [vmem:[#allocation2 + $0x18] sm:$0xff] %vm55_vm2, %v213_v50 }
 0x370   :  { %v286_v54 = vpop.f32.mrb[2].mxu0 }
 0x371   :  { %v290_v55 = vadd.f32 %v286_v54, %v215_v53  ;;  %v5572_v56 = vpop.f32.mrb[3].mxu0 }
 0x372   :  { %v371_v58 = vld [vmem:[#allocation2 + $0x10] sm:$0xff] }
 0x373   :  { %291 = vst.msk [vmem:[#allocation2 + $0x20] sm:$0xff] %vm55_vm2, %v290_v55  ;;  %5095 = vmatmul.mubr.msk.f32.gmra.mrb[8].mxu0 %vm55_vm2, %v371_v58 }
 0x374   :  { %v363_v61 = vpop.f32.mrb[2].mxu1  ;;  %527 = vmatprep.mubr.f32.mxu0 %v8929_v12 }
 0x375   :  { %v367_v62 = vadd.f32 %v363_v61, %v292_v59  ;;  %v5577_v63 = vpop.f32.mrb[3].mxu1 }
 0x376   :  { %v372_v1 = vld [vmem:[#allocation2 + $0x18] sm:$0xff] }
 0x377   :  { %368 = vst.msk [vmem:[#allocation2 + $0x28] sm:$0xff] %vm55_vm2, %v367_v62  ;;  %5096 = vmatmul.mubr.msk.f32.gmra.mrb[10].mxu0 %vm55_vm2, %v372_v1 }
 0x378   :  { %533 = vmatprep.mubr.f32.mxu0 %v8929_v12  ;;  %v511_v2 = vpop.f32.mrb[4].mxu0 }
 0x379   :  { %v7100_v3 = vadd.f32 %v511_v2, %v422_v0  ;;  %v513_v4 = vpop.f32.mrb[5].mxu0 }
 0x37a   :  { %v373_v5 = vld [vmem:[#allocation2 + $0x20] sm:$0xff]  ;;  %v7111_v10 = vadd.f32 %v513_v4, %v426_v9 }
 0x37b   :  { %5097 = vmatmul.mubr.msk.f32.gmra.mrb[12].mxu0 %vm55_vm2, %v373_v5  ;;  %5590 = vmatprep.mubr.msk.f32.mxu1 %vm63_vm3, %v7100_v3 }
 0x37c   :  { %539 = vmatprep.mubr.f32.mxu0 %v8929_v12  ;;  %v517_v11 = vpop.f32.mrb[6].mxu0 }
 0x37d   :  { %v7113_v13 = vadd.f32 %v517_v11, %v422_v0  ;;  %v519_v14 = vpop.f32.mrb[7].mxu0 }
 0x37e   :  { %v374_v7 = vld [vmem:[#allocation2 + $0x28] sm:$0xff]  ;;  %v7115_v15 = vadd.f32 %v519_v14, %v426_v9 }
 0x37f   :  { %5098 = vmatmul.mubr.msk.f32.gmra.mrb[14].mxu0 %vm55_vm2, %v374_v7  ;;  %v7119_v16 = vpack.i.bf16 %v7113_v13, %v7100_v3 }
 0x380   :  { %v7125_v19 = vpack.c.bf16 %v7115_v15, %v7111_v10 }
 0x381   :  { %6460 = vrot.lane.b32.xlu1 %v7119_v16, %s6960_s24 }
 0x3f3   :  { %v6461_v21 = vpop.permute.xlu1 %6460 }
 0x3f4   :  { %v6463_v22 = vunpack.i.h.bf16 %v6461_v21  ;;  %v6462_v23 = vunpack.i.l.bf16 %v6461_v21 }
 0x3f6   :  { %v6090_v25 = vpack.c.bf16 %v6463_v22, %v6462_v23 }
 0x3f8   :  { %6092 = vmatprep.subr.msk.bf16.mxu0 %vm7131_vm4, %v6090_v25 }
 0x3f9   :  { %6095 = vmatpush3.bf16.xpose.msk.msra.mxu0 %vm7131_vm4, %v6090_v25 }
 0x446   :  { %v523_v26 = vpop.f32.mrb[8].mxu0 }
 0x447   :  { %v525_v27 = vpop.f32.mrb[9].mxu0  ;;  %v7139_v29 = vadd.f32 %v523_v26, %v422_v0 }
 0x448   :  { %v7143_v32 = vadd.f32 %v525_v27, %v426_v9 }
 0x44a   :  { %v529_v28 = vpop.f32.mrb[10].mxu0 }
 0x44b   :  { %v7141_v30 = vadd.f32 %v529_v28, %v422_v0  ;;  %v531_v31 = vpop.f32.mrb[11].mxu0 }
 0x44c   :  { %v7145_v33 = vadd.f32 %v531_v31, %v426_v9 }
 0x44d   :  { %v6464_v34 = vpack.i.bf16 %v7141_v30, %v7139_v29 }
 0x44e   :  { %v7153_v36 = vpack.c.bf16 %v7145_v33, %v7143_v32  ;;  %v535_v37 = vpop.f32.mrb[12].mxu0 }
 0x44f   :  { %v537_v38 = vpop.f32.mrb[13].mxu0  ;;  %6465 = vrot.lane.b32.xlu1 %v6464_v34, %s6960_s24  ;;  %v7156_v40 = vadd.f32 %v535_v37, %v422_v0 }
 0x450   :  { %v7162_v43 = vadd.f32 %v537_v38, %v426_v9 }
 0x452   :  { %v541_v39 = vpop.f32.mrb[14].mxu0 }
 0x453   :  { %v7158_v41 = vadd.f32 %v541_v39, %v422_v0  ;;  %6475 = vrot.lane.b32.xlu1 %v7119_v16, %s6959_s23  ;;  %v543_v42 = vpop.f32.mrb[15].mxu0 }
 0x454   :  { %v7164_v44 = vadd.f32 %v543_v42, %v426_v9 }
 0x455   :  { %v7168_v45 = vpack.i.bf16 %v7158_v41, %v7156_v40 }
 0x456   :  { %v7174_v48 = vpack.c.bf16 %v7164_v44, %v7162_v43 }
 0x457   :  { %756 = vrot.lane.b32.xlu1 %v7100_v3, %s6961_s7  ;;  %6470 = vrot.lane.b32.xlu0 %v7168_v45, %s6960_s24 }
 0x45b   :  { %6485 = vrot.lane.b32.xlu1 %v6464_v34, %s6959_s23  ;;  %6480 = vrot.lane.b32.xlu0 %v7119_v16, %s6962_s8 }
 0x45f   :  { %760 = vrot.lane.b32.xlu1 %v7139_v29, %s6961_s7  ;;  %758 = vrot.lane.b32.xlu0 %v7113_v13, %s6961_s7 }
 0x463   :  { %6495 = vrot.lane.b32.xlu1 %v7168_v45, %s6959_s23  ;;  %6490 = vrot.lane.b32.xlu0 %v6464_v34, %s6962_s8 }
 0x467   :  { %764 = vrot.lane.b32.xlu1 %v7156_v40, %s6961_s7  ;;  %6500 = vrot.lane.b32.xlu0 %v7168_v45, %s6962_s8 }
 0x46b   :  { %6505 = vrot.lane.b32.xlu1 %v7119_v16, %s6963_s9  ;;  %762 = vrot.lane.b32.xlu0 %v7141_v30, %s6961_s7 }
 0x46f   :  { %1235 = vrot.lane.b32.xlu1 %v7113_v13, %s6958_s20  ;;  %766 = vrot.lane.b32.xlu0 %v7158_v41, %s6961_s7 }
 0x473   :  { %6515 = vrot.lane.b32.xlu1 %v7168_v45, %s6963_s9  ;;  %1233 = vrot.lane.b32.xlu0 %v7100_v3, %s6958_s20 }
 0x477   :  { %1239 = vrot.lane.b32.xlu1 %v7141_v30, %s6958_s20  ;;  %6510 = vrot.lane.b32.xlu0 %v6464_v34, %s6963_s9 }
 0x47b   :  { %1243 = vrot.lane.b32.xlu1 %v7158_v41, %s6958_s20  ;;  %1237 = vrot.lane.b32.xlu0 %v7139_v29, %s6958_s20 }
 0x47f   :  { %1569 = vrot.lane.b32.xlu1 %v7113_v13, %s6953_s17  ;;  %1241 = vrot.lane.b32.xlu0 %v7156_v40, %s6958_s20 }
 0x483   :  { %1573 = vrot.lane.b32.xlu1 %v7141_v30, %s6953_s17  ;;  %1567 = vrot.lane.b32.xlu0 %v7100_v3, %s6953_s17 }
 0x487   :  { %1577 = vrot.lane.b32.xlu1 %v7158_v41, %s6953_s17  ;;  %1571 = vrot.lane.b32.xlu0 %v7139_v29, %s6953_s17 }
 0x48b   :  { %6520 = vrot.lane.b32.xlu1 %v7119_v16, %s6964_s10  ;;  %1575 = vrot.lane.b32.xlu0 %v7156_v40, %s6953_s17 }
 0x48f   :  { %6535 = vrot.lane.b32.xlu1 %v6464_v34, %s6965_s11  ;;  %6525 = vrot.lane.b32.xlu0 %v6464_v34, %s6964_s10 }
 0x493   :  { %6540 = vrot.lane.b32.xlu1 %v7168_v45, %s6964_s10  ;;  %6530 = vrot.lane.b32.xlu0 %v7119_v16, %s6965_s11 }
 0x4c1   :  { %v6466_v49 = vpop.permute.xlu1 %6465 }
 0x4c2   :  { %v6468_v50 = vunpack.i.h.bf16 %v6466_v49  ;;  %v6467_v51 = vunpack.i.l.bf16 %v6466_v49 }
 0x4c4   :  { %v6096_v53 = vpack.c.bf16 %v6468_v50, %v6467_v51 }
 0x4c5   :  { %v6476_v54 = vpop.permute.xlu1 %6475 }
 0x4c6   :  { %v6478_v55 = vunpack.i.h.bf16 %v6476_v54  ;;  %v6477_v56 = vunpack.i.l.bf16 %v6476_v54  ;;  %6098 = vmatprep.subr.msk.bf16.mxu0 %vm7131_vm4, %v6096_v53 }
 0x4c7   :  { %6101 = vmatpush3.bf16.xpose.msk.msra.mxu0 %vm7131_vm4, %v6096_v53 }
 0x4c8   :  { %v6072_v58 = vpack.c.bf16 %v6478_v55, %v6477_v56 }
 0x4c9   :  { %v6471_v59 = vpop.permute.xlu0 %6470  ;;  %v757_v60 = vpop.permute.xlu1 %756 }
 0x4ca   :  { %v6473_v61 = vunpack.i.h.bf16 %v6471_v59  ;;  %v6472_v62 = vunpack.i.l.bf16 %v6471_v59  ;;  %6074 = vmatprep.subr.msk.bf16.mxu1 %vm7131_vm4, %v6072_v58  ;;  %5611 = vmatprep.mubr.msk.f32.mxu0 %vm63_vm3, %v757_v60 }
 0x4cb   :  { %6077 = vmatpush3.bf16.xpose.msk.msra.mxu1 %vm7131_vm4, %v6072_v58 }
 0x4cc   :  { %v6102_v63 = vpack.c.bf16 %v6473_v61, %v6472_v62 }
 0x4cd   :  { %v6481_v0 = vpop.permute.xlu0 %6480  ;;  %v6486_v1 = vpop.permute.xlu1 %6485 }
 0x4ce   :  { %v6483_v2 = vunpack.i.h.bf16 %v6481_v0  ;;  %v6482_v3 = vunpack.i.l.bf16 %v6481_v0  ;;  %v6488_v4 = vunpack.i.h.bf16 %v6486_v1  ;;  %v6487_v5 = vunpack.i.l.bf16 %v6486_v1  ;;  %6104 = vmatprep.subr.msk.bf16.mxu0 %vm7131_vm4, %v6102_v63 }
 0x4cf   :  { %6107 = vmatpush3.bf16.xpose.msk.msra.mxu0 %vm7131_vm4, %v6102_v63 }
 0x4d0   :  { %v6132_v7 = vpack.c.bf16 %v6483_v2, %v6482_v3  ;;  %v6078_v8 = vpack.c.bf16 %v6488_v4, %v6487_v5 }
 0x4d1   :  { %v759_v9 = vpop.permute.xlu0 %758  ;;  %v761_v11 = vpop.permute.xlu1 %760 }
 0x4d2   :  { %6080 = vmatprep.subr.msk.bf16.mxu1 %vm7131_vm4, %v6078_v8  ;;  %6134 = vmatprep.subr.msk.bf16.mxu0 %vm7131_vm4, %v6132_v7 }
 0x4d3   :  { %6083 = vmatpush3.bf16.xpose.msk.msra.mxu1 %vm7131_vm4, %v6078_v8 }
 0x4d5   :  { %v6491_v14 = vpop.permute.xlu0 %6490  ;;  %v6496_v16 = vpop.permute.xlu1 %6495 }
 0x4d6   :  { %v6493_v21 = vunpack.i.h.bf16 %v6491_v14  ;;  %v6492_v22 = vunpack.i.l.bf16 %v6491_v14  ;;  %v6498_v23 = vunpack.i.h.bf16 %v6496_v16  ;;  %v6497_v25 = vunpack.i.l.bf16 %v6496_v16  ;;  %5612 = vmatmul.mubr.msk.f32.vlgmr.msra.gmra.mrb[16].mxu0 %vm63_vm3, %v759_v9 }
 0x4d7   :  { %5614 = vmatprep.mubr.msk.f32.mxu0 %vm63_vm3, %v761_v11  ;;  %6137 = vmatpush3.bf16.xpose.msk.msra.mxu0 %vm7131_vm4, %v6132_v7 }
 0x4d8   :  { %v6138_v26 = vpack.c.bf16 %v6493_v21, %v6492_v22  ;;  %v6084_v27 = vpack.c.bf16 %v6498_v23, %v6497_v25 }
 0x4d9   :  { %v6501_v28 = vpop.permute.xlu0 %6500  ;;  %v765_v31 = vpop.permute.xlu1 %764 }
 0x4da   :  { %v6503_v34 = vunpack.i.h.bf16 %v6501_v28  ;;  %v6502_v37 = vunpack.i.l.bf16 %v6501_v28  ;;  %6086 = vmatprep.subr.msk.bf16.mxu1 %vm7131_vm4, %v6084_v27  ;;  %6140 = vmatprep.subr.msk.bf16.mxu0 %vm7131_vm4, %v6138_v26 }
 0x4db   :  { %6089 = vmatpush3.bf16.xpose.msk.msra.mxu1 %vm7131_vm4, %v6084_v27 }
 0x4dc   :  { %v6144_v42 = vpack.c.bf16 %v6503_v34, %v6502_v37 }
 0x4dd   :  { %v763_v38 = vpop.permute.xlu0 %762  ;;  %v6506_v39 = vpop.permute.xlu1 %6505 }
 0x4de   :  { %5615 = vmatmul.mubr.msk.f32.gmra.mrb[18].mxu0 %vm63_vm3, %v763_v38  ;;  %v6508_v51 = vunpack.i.h.bf16 %v6506_v39  ;;  %v6507_v53 = vunpack.i.l.bf16 %v6506_v39  ;;  %v377_v39 = vadd.s32 8, %v7078_v52 }
 0x4df   :  { %5617 = vmatprep.mubr.msk.f32.mxu0 %vm63_vm3, %v765_v31  ;;  %6143 = vmatpush3.bf16.xpose.msk.msra.mxu0 %vm7131_vm4, %v6138_v26 }
 0x4e0   :  { %6146 = vmatprep.subr.msk.bf16.mxu0 %vm7131_vm4, %v6144_v42  ;;  %v6162_v56 = vpack.c.bf16 %v6508_v51, %v6507_v53 }
 0x4e1   :  { %v767_v49 = vpop.permute.xlu0 %766  ;;  %v1236_v50 = vpop.permute.xlu1 %1235 }
 0x4e2   :  { %5591 = vmatmul.mubr.msk.f32.vlgmr.msra.gmra.mrb[4].mxu1 %vm63_vm3, %v7113_v13  ;;  %5618 = vmatmul.mubr.msk.f32.gmra.mrb[20].mxu0 %vm63_vm3, %v767_v49  ;;  %v385_v49 = vand.u32 7, %v377_v39 }
 0x4e3   :  { %5593 = vmatprep.mubr.msk.f32.mxu1 %vm63_vm3, %v7139_v29 }
 0x4e5   :  { %v1234_v54 = vpop.permute.xlu0 %1233  ;;  %v6516_v55 = vpop.permute.xlu1 %6515 }
 0x4e6   :  { %5594 = vmatmul.mubr.msk.f32.gmra.mrb[6].mxu1 %vm63_vm3, %v7141_v30  ;;  %5674 = vmatprep.mubr.msk.f32.mxu0 %vm63_vm3, %v1234_v54  ;;  %v6518_v63 = vunpack.i.h.bf16 %v6516_v55  ;;  %v6517_v0 = vunpack.i.l.bf16 %v6516_v55 }
 0x4e7   :  { %5596 = vmatprep.mubr.msk.f32.mxu1 %vm63_vm3, %v7156_v40  ;;  %6149 = vmatpush3.bf16.xpose.msk.msra.mxu0 %vm7131_vm4, %v6144_v42  ;;  %v383_v42 = vand.u32 127, %v375_v47 }
 0x4e8   :  { %6164 = vmatprep.subr.msk.bf16.mxu0 %vm7131_vm4, %v6162_v56  ;;  %v6174_v2 = vpack.c.bf16 %v6518_v63, %v6517_v0 }
 0x4e9   :  { %v6511_v13 = vpop.permute.xlu0 %6510  ;;  %v1240_v58 = vpop.permute.xlu1 %1239 }
 0x4ea   :  { %v6513_v29 = vunpack.i.h.bf16 %v6511_v13  ;;  %v6512_v59 = vunpack.i.l.bf16 %v6511_v13  ;;  %5597 = vmatmul.mubr.msk.f32.gmra.mrb[8].mxu1 %vm63_vm3, %v7158_v41  ;;  %v384_v13 = vand.u32 7, %v7078_v52 }
 0x4ec   :  { %v6168_v61 = vpack.c.bf16 %v6513_v29, %v6512_v59  ;;  %v378_v59 = vadd.s32 16, %v7078_v52 }
 0x4ed   :  { %v1238_v60 = vpop.permute.xlu0 %1237  ;;  %v1244_v30 = vpop.permute.xlu1 %1243 }
 0x4ee   :  { %5675 = vmatmul.mubr.msk.f32.vlgmr.msra.gmra.mrb[22].mxu0 %vm63_vm3, %v1236_v50  ;;  %v390_v50 = vand.u32 7, %v383_v42 }
 0x4ef   :  { %5677 = vmatprep.mubr.msk.f32.mxu0 %vm63_vm3, %v1238_v60  ;;  %6167 = vmatpush3.bf16.xpose.msk.msra.mxu0 %vm7131_vm4, %v6162_v56  ;;  %v380_v60 = vadd.s32 32, %v7078_v52 }
 0x4f0   :  { %6170 = vmatprep.subr.msk.bf16.mxu0 %vm7131_vm4, %v6168_v61  ;;  %vm7314_vm5 = vcmp.eq.s32.totalorder %v385_v49, %v390_v50  ;;  %vm7341_vm7 = vcmp.eq.s32.totalorder %v384_v13, %v390_v50 }
 0x4f1   :  { %v1242_v40 = vpop.permute.xlu0 %1241  ;;  %v1570_v62 = vpop.permute.xlu1 %1569 }
 0x4f2   :  { %5678 = vmatmul.mubr.msk.f32.gmra.mrb[24].mxu0 %vm63_vm3, %v1240_v58  ;;  %v379_v58 = vadd.s32 24, %v7078_v52 }
 0x4f3   :  { %5680 = vmatprep.mubr.msk.f32.mxu0 %vm63_vm3, %v1242_v40 }
 0x4f5   :  { %v1568_v41 = vpop.permute.xlu0 %1567  ;;  %v1574_v1 = vpop.permute.xlu1 %1573 }
 0x4f6   :  { %5681 = vmatmul.mubr.msk.f32.gmra.mrb[26].mxu0 %vm63_vm3, %v1244_v30 }
 0x4f7   :  { %6173 = vmatpush3.bf16.xpose.msk.msra.mxu0 %vm7131_vm4, %v6168_v61  ;;  %5716 = vmatprep.mubr.msk.f32.mxu0 %vm63_vm3, %v1568_v41 }
 0x4f8   :  { %6176 = vmatprep.subr.msk.bf16.mxu0 %vm7131_vm4, %v6174_v2 }
 0x4f9   :  { %v1572_v3 = vpop.permute.xlu0 %1571  ;;  %v1578_v4 = vpop.permute.xlu1 %1577 }
 0x4fd   :  { %v1576_v5 = vpop.permute.xlu0 %1575  ;;  %v6521_v7 = vpop.permute.xlu1 %6520 }
 0x4fe   :  { %v6523_v8 = vunpack.i.h.bf16 %v6521_v7  ;;  %v6522_v9 = vunpack.i.l.bf16 %v6521_v7 }
 0x4ff   :  { %6179 = vmatpush3.bf16.xpose.msk.msra.mxu0 %vm7131_vm4, %v6174_v2  ;;  %v388_v2 = vand.u32 7, %v380_v60 }
 0x500   :  { %v6108_v11 = vpack.c.bf16 %v6523_v8, %v6522_v9  ;;  %v8970_v9 = vmov 0 }
 0x501   :  { %v6526_v14 = vpop.permute.xlu0 %6525  ;;  %v7302_v16 = vpop.permute.xlu1 %6535  ;;  %vm7380_vm10 = vcmp.eq.s32.totalorder %v388_v2, %v390_v50 }
 0x502   :  { %v6528_v21 = vunpack.i.h.bf16 %v6526_v14  ;;  %v6527_v22 = vunpack.i.l.bf16 %v6526_v14  ;;  %6109 = vmatprep.subr.bf16.mxu1 %v6108_v11  ;;  %v8974_v14 = vmov 0 }
 0x503   :  { %6111 = vmatpush3.bf16.msra.mxu1 %v6108_v11 }
 0x504   :  { %v6112_v23 = vpack.c.bf16 %v6528_v21, %v6527_v22  ;;  %v8977_v21 = vmov 0 }
 0x505   :  { %v6531_v25 = vpop.permute.xlu0 %6530  ;;  %v6541_v26 = vpop.permute.xlu1 %6540  ;;  %v8978_v21 = vsel %vm7380_vm10, 4294967295, %v8977_v21 }
 0x506   :  { %v6533_v27 = vunpack.i.h.bf16 %v6531_v25  ;;  %v6532_v28 = vunpack.i.l.bf16 %v6531_v25  ;;  %v6543_v31 = vunpack.i.h.bf16 %v6541_v26  ;;  %v6542_v34 = vunpack.i.l.bf16 %v6541_v26  ;;  %6113 = vmatprep.subr.bf16.mxu1 %v6112_v23  ;;  %5717 = vmatmul.mubr.msk.f32.vlgmr.msra.gmra.mrb[28].mxu0 %vm63_vm3, %v1570_v62  ;;  %8979 = vst [vmem:[#allocation12_spill] sm:$0xff] %v8978_v21 }
 0x507   :  { %6115 = vmatpush3.bf16.msra.mxu1 %v6112_v23  ;;  %5719 = vmatprep.mubr.msk.f32.mxu0 %vm63_vm3, %v1572_v3  ;;  %v387_v62 = vand.u32 7, %v379_v58 }
 0x508   :  { %v6116_v37 = vpack.c.bf16 %v6543_v31, %v6542_v34  ;;  %v7307_v38 = vpack.c.bf16 %v6533_v27, %v6532_v28  ;;  %v381_v31 = vadd.s32 40, %v7078_v52 }
 0x509   :  { %vm7370_vm8 = vcmp.eq.s32.totalorder %v387_v62, %v390_v50 }
 0x50a   :  { %6117 = vmatprep.subr.bf16.mxu1 %v6116_v37  ;;  %5720 = vmatmul.mubr.msk.f32.gmra.mrb[30].mxu0 %vm63_vm3, %v1574_v1  ;;  %v386_v1 = vand.u32 7, %v378_v59  ;;  %v8971_v9 = vsel %vm7370_vm8, 4294967295, %v8970_v9  ;;  %v389_v13 = vand.u32 7, %v381_v31 }
 0x50b   :  { %6119 = vmatpush3.bf16.msra.mxu1 %v6116_v37  ;;  %5722 = vmatprep.mubr.msk.f32.mxu0 %vm63_vm3, %v1576_v5  ;;  %8972 = vst [vmem:[#allocation9_spill] sm:$0xff] %v8971_v9 }
 0x50c   :  { %6121 = vmatprep.subr.bf16.mxu1 %v7307_v38  ;;  %vm7376_vm9 = vcmp.eq.s32.totalorder %v386_v1, %v390_v50  ;;  %vm7442_vm11 = vcmp.eq.s32.totalorder %v389_v13, %v390_v50 }
 0x50d   :  { %v8975_v14 = vsel %vm7376_vm9, 4294967295, %v8974_v14 }
 0x50e   :  { %5723 = vmatmul.mubr.msk.f32.gmra.mrb[32].mxu0 %vm63_vm3, %v1578_v4  ;;  %8976 = vst [vmem:[#allocation11_spill] sm:$0xff] %v8975_v14 }
 0x5a9   :  { %v7318_v53 = vpop.f32.mrb[16].mxu0 }
 0x5aa   :  { %v7320_v54 = vpop.f32.mrb[17].mxu0  ;;  %v7325_v55 = vsel %vm7314_vm5, %v7318_v53, -1e+30 }
 0x5ab   :  { %v908_v56 = vsel %vm689_vm6, %v7325_v55, -inf  ;;  %v7366_v7 = vsel %vm7341_vm7, %v7320_v54, -1e+30 }
 0x5ac   :  { %909 = vmax.xlane.f32.xlu1 %v908_v56  ;;  %v905_v22 = vsel %vm689_vm6, %v7366_v7, -inf }
 0x5b1   :  { %v7329_v47 = vpop.f32.mrb[18].mxu0 }
 0x5b2   :  { %v7333_v29 = vpop.f32.mrb[19].mxu0  ;;  %v7396_v26 = vsel %vm7370_vm8, %v7329_v47, -1e+30 }
 0x5b3   :  { %v914_v37 = vsel %vm689_vm6, %v7396_v26, -inf  ;;  %v7433_v62 = vsel %vm7376_vm9, %v7333_v29, -1e+30 }
 0x5b5   :  { %v7337_v30 = vpop.f32.mrb[4].mxu1  ;;  %v7339_v61 = vpop.f32.mrb[20].mxu0 }
 0x5b6   :  { %v7345_v63 = vpop.f32.mrb[5].mxu1  ;;  %v7347_v0 = vpop.f32.mrb[21].mxu0  ;;  %v7352_v41 = vsel %vm7314_vm5, %v7337_v30, -1e+30  ;;  %v7455_v31 = vsel %vm7442_vm11, %v7339_v61, -1e+30 }
 0x5b7   :  { %v693_v3 = vsel %vm689_vm6, %v7352_v41, -inf  ;;  %v7359_v4 = vsel %vm7341_vm7, %v7345_v63, -1e+30  ;;  %v7403_v28 = vsel %vm7380_vm10, %v7347_v0, -1e+30  ;;  %v920_v13 = vsel %vm689_vm6, %v7455_v31, -inf }
 0x5b8   :  { %694 = vmax.xlane.f32.xlu0 %v693_v3  ;;  %v690_v5 = vsel %vm689_vm6, %v7359_v4, -inf  ;;  %v917_v39 = vsel %vm689_vm6, %v7403_v28, -inf  ;;  %v8985_v3 = vmov 0 }
 0x5b9   :  { %v7368_v8 = vpop.f32.mrb[6].mxu1  ;;  %691 = vmax.xlane.f32.xlu1 %v690_v5  ;;  %v8986_v3 = vsel %vm7442_vm11, 4294967295, %v8985_v3 }
 0x5ba   :  { %v7374_v11 = vpop.f32.mrb[7].mxu1  ;;  %v7415_v42 = vsel %vm7370_vm8, %v7368_v8, -1e+30  ;;  %8987 = vst [vmem:[#allocation18_spill] sm:$0xff] %v8986_v3 }
 0x5bb   :  { %8973 = vst [vmem:[#allocation10_spill] sm:$0xff] %v7374_v11  ;;  %v7389_v23 = vsel %vm7376_vm9, %v7374_v11, -1e+30  ;;  %v699_v59 = vsel %vm689_vm6, %v7415_v42, -inf }
 0x5bc   :  { %906 = vmax.xlane.f32.xlu0 %v905_v22  ;;  %v696_v25 = vsel %vm689_vm6, %v7389_v23, -inf  ;;  %v911_v22 = vsel %vm689_vm6, %v7433_v62, -inf }
 0x5bd   :  { %v7398_v27 = vpop.f32.mrb[8].mxu1  ;;  %697 = vmax.xlane.f32.xlu1 %v696_v25 }
 0x5be   :  { %8980 = vst [vmem:[#allocation13_spill] sm:$0xff] %v7398_v27  ;;  %v7406_v34 = vpop.f32.mrb[9].mxu1 }
 0x5bf   :  { %8981 = vst [vmem:[#allocation14_spill] sm:$0xff] %v7406_v34  ;;  %v7422_v56 = vsel %vm7380_vm10, %v7406_v34, -1e+30 }
 0x5c0   :  { %915 = vmax.xlane.f32.xlu0 %v914_v37  ;;  %v702_v60 = vsel %vm689_vm6, %v7422_v56, -inf }
 0x5c1   :  { %v7417_v49 = vpop.f32.mrb[22].mxu0  ;;  %918 = vmax.xlane.f32.xlu1 %v917_v39 }
 0x5c2   :  { %8982 = vst [vmem:[#allocation15_spill] sm:$0xff] %v7417_v49  ;;  %v7424_v58 = vpop.f32.mrb[23].mxu0  ;;  %v7487_v12 = vsel %vm7314_vm5, %v7417_v49, -1e+30 }
 0x5c3   :  { %8983 = vst [vmem:[#allocation16_spill] sm:$0xff] %v7424_v58  ;;  %v7440_v2 = vsel %vm7341_vm7, %v7424_v58, -1e+30  ;;  %v8997_v58 = vpack.i.bf16 %v7115_v15, %v7111_v10 }
 0x5c4   :  { %700 = vmax.xlane.f32.xlu0 %v699_v59  ;;  %v1382_v25 = vsel %vm689_vm6, %v7440_v2, -inf }
 0x5c5   :  { %v7435_v1 = vpop.f32.mrb[24].mxu0  ;;  %703 = vmax.xlane.f32.xlu1 %v702_v60  ;;  %v7473_v60 = vsel %vm7442_vm11, %v7398_v27, -1e+30 }
 0x5c6   :  { %8984 = vst [vmem:[#allocation17_spill] sm:$0xff] %v7435_v1  ;;  %v7446_v5 = vpop.f32.mrb[25].mxu0  ;;  %v7494_v46 = vsel %vm7370_vm8, %v7435_v1, -1e+30 }
 0x5c7   :  { %8988 = vst [vmem:[#allocation19_spill] sm:$0xff] %v7446_v5  ;;  %v7462_v50 = vsel %vm7376_vm9, %v7446_v5, -1e+30 }
 0x5c8   :  { %912 = vmax.xlane.f32.xlu0 %v911_v22  ;;  %v1388_v59 = vsel %vm689_vm6, %v7462_v50, -inf }
 0x5c9   :  { %v7457_v37 = vpop.f32.mrb[26].mxu0  ;;  %1383 = vmax.xlane.f32.xlu1 %v1382_v25  ;;  %v705_v25 = vsel %vm689_vm6, %v7473_v60, -inf }
 0x5ca   :  { %8989 = vst [vmem:[#allocation20_spill] sm:$0xff] %v7457_v37  ;;  %v7464_v39 = vpop.f32.mrb[27].mxu0  ;;  %v7501_v35 = vsel %vm7442_vm11, %v7457_v37, -1e+30 }
 0x5cb   :  { %8990 = vst [vmem:[#allocation21_spill] sm:$0xff] %v7464_v39  ;;  %v7478_v22 = vsel %vm7380_vm10, %v7464_v39, -1e+30 }
 0x5cc   :  { %921 = vmax.xlane.f32.xlu0 %v920_v13  ;;  %v1394_v13 = vsel %vm689_vm6, %v7478_v22, -inf }
 0x5cd   :  { %1389 = vmax.xlane.f32.xlu1 %v1388_v59  ;;  %v1385_v59 = vsel %vm689_vm6, %v7487_v12, -inf }
 0x5d0   :  { %706 = vmax.xlane.f32.xlu0 %v705_v25  ;;  %v1391_v25 = vsel %vm689_vm6, %v7494_v46, -inf }
 0x5d1   :  { %1395 = vmax.xlane.f32.xlu1 %v1394_v13 }
 0x5d4   :  { %1386 = vmax.xlane.f32.xlu0 %v1385_v59  ;;  %v1397_v59 = vsel %vm689_vm6, %v7501_v35, -inf }
 0x5d8   :  { %1392 = vmax.xlane.f32.xlu0 %v1391_v25 }
 0x5d9   :  { %v7503_v17 = vpop.f32.mrb[28].mxu0 }
 0x5da   :  { %8991 = vst [vmem:[#allocation22_spill] sm:$0xff] %v7503_v17  ;;  %v7505_v13 = vpop.f32.mrb[29].mxu0  ;;  %v7519_v18 = vsel %vm7314_vm5, %v7503_v17, -1e+30 }
 0x5db   :  { %8992 = vst [vmem:[#allocation23_spill] sm:$0xff] %v7505_v13  ;;  %v7512_v6 = vsel %vm7341_vm7, %v7505_v13, -1e+30  ;;  %v1719_v37 = vsel %vm689_vm6, %v7519_v18, -inf }
 0x5dc   :  { %1398 = vmax.xlane.f32.xlu0 %v1397_v59  ;;  %v1716_v25 = vsel %vm689_vm6, %v7512_v6, -inf }
 0x5dd   :  { %v7521_v20 = vpop.f32.mrb[30].mxu0  ;;  %1717 = vmax.xlane.f32.xlu1 %v1716_v25 }
 0x5de   :  { %8993 = vst [vmem:[#allocation24_spill] sm:$0xff] %v7521_v20  ;;  %v7523_v39 = vpop.f32.mrb[31].mxu0  ;;  %v7537_v17 = vsel %vm7370_vm8, %v7521_v20, -1e+30 }
 0x5df   :  { %8994 = vst [vmem:[#allocation25_spill] sm:$0xff] %v7523_v39  ;;  %v7530_v59 = vsel %vm7376_vm9, %v7523_v39, -1e+30  ;;  %v1725_v1 = vsel %vm689_vm6, %v7537_v17, -inf }
 0x5e0   :  { %1720 = vmax.xlane.f32.xlu0 %v1719_v37  ;;  %v1722_v13 = vsel %vm689_vm6, %v7530_v59, -inf }
 0x5e1   :  { %v7539_v25 = vpop.f32.mrb[32].mxu0  ;;  %1723 = vmax.xlane.f32.xlu1 %v1722_v13 }
 0x5e2   :  { %8995 = vst [vmem:[#allocation26_spill] sm:$0xff] %v7539_v25  ;;  %v7541_v5 = vpop.f32.mrb[33].mxu0  ;;  %v7555_v20 = vsel %vm7442_vm11, %v7539_v25, -1e+30 }
 0x5e3   :  { %8996 = vst [vmem:[#allocation27_spill] sm:$0xff] %v7541_v5  ;;  %v7548_v37 = vsel %vm7380_vm10, %v7541_v5, -1e+30  ;;  %v1731_v13 = vsel %vm689_vm6, %v7555_v20, -inf }
 0x5e4   :  { %1726 = vmax.xlane.f32.xlu0 %v1725_v1  ;;  %v1728_v39 = vsel %vm689_vm6, %v7548_v37, -inf }
 0x5e5   :  { %1729 = vmax.xlane.f32.xlu1 %v1728_v39 }
 0x5e8   :  { %1732 = vmax.xlane.f32.xlu0 %v1731_v13 }
 0x5f6   :  { %6550 = vrot.lane.b32.xlu1 %v8997_v58, %s6959_s23 }
 0x5fe   :  { %6545 = vrot.lane.b32.xlu0 %v7168_v45, %s6965_s11 }
 0x639   :  { %v910_v1 = vpop.xlane.xlu1 %909 }
 0x63a   :  { %v924_v5 = vsub.f32 %v7325_v55, %v910_v1 }
 0x63c   :  { %v931_v21 = vmul.f32 1.442695, %v924_v5 }
 0x63e   :  { %6672 = vpow2.f32 %v931_v21 }
 0x645   :  { %v695_v25 = vpop.xlane.xlu0 %694 }
 0x646   :  { %v709_v39 = vsub.f32 %v7352_v41, %v695_v25  ;;  %v692_v3 = vpop.xlane.xlu1 %691 }
 0x647   :  { %v708_v34 = vsub.f32 %v7359_v4, %v692_v3 }
 0x648   :  { %v7567_v49 = vpop.eup %6672  ;;  %v716_v13 = vmul.f32 1.442695, %v709_v39 }
 0x649   :  { %v907_v27 = vpop.xlane.xlu0 %906  ;;  %v944_v10 = vsel %vm689_vm6, %v7567_v49, 0.0  ;;  %v714_v55 = vmul.f32 1.442695, %v708_v34 }
 0x64a   :  { %6674 = vpow2.f32 %v716_v13  ;;  %v923_v15 = vsub.f32 %v7366_v7, %v907_v27  ;;  %v698_v45 = vpop.xlane.xlu1 %697  ;;  %945 = vadd.xlane.f32.xlu0 %v944_v10 }
 0x64b   :  { %v710_v25 = vsub.f32 %v7389_v23, %v698_v45 }
 0x64c   :  { %v929_v21 = vmul.f32 1.442695, %v923_v15 }
 0x64d   :  { %v916_v58 = vpop.xlane.xlu0 %915  ;;  %v718_v7 = vmul.f32 1.442695, %v710_v25 }
 0x64e   :  { %6676 = vpow2.f32 %v929_v21  ;;  %v926_v41 = vsub.f32 %v7396_v26, %v916_v58  ;;  %v919_v5 = vpop.xlane.xlu1 %918 }
 0x64f   :  { %6678 = vpow2.f32 %v714_v55  ;;  %v927_v27 = vsub.f32 %v7403_v28, %v919_v5 }
 0x650   :  { %v935_v4 = vmul.f32 1.442695, %v926_v41 }
 0x651   :  { %v701_v3 = vpop.xlane.xlu0 %700 }
 0x652   :  { %6680 = vpow2.f32 %v935_v4  ;;  %v711_v1 = vsub.f32 %v7415_v42, %v701_v3  ;;  %v704_v39 = vpop.xlane.xlu1 %703  ;;  %v937_v42 = vmul.f32 1.442695, %v927_v27 }
 0x653   :  { %v712_v55 = vsub.f32 %v7422_v56, %v704_v39 }
 0x654   :  { %v7576_v13 = vpop.eup %6674  ;;  %v720_v34 = vmul.f32 1.442695, %v711_v1 }
 0x655   :  { %v913_v10 = vpop.xlane.xlu0 %912  ;;  %v729_v26 = vsel %vm689_vm6, %v7576_v13, 0.0  ;;  %v722_v4 = vmul.f32 1.442695, %v712_v55 }
 0x656   :  { %6682 = vpow2.f32 %v720_v34  ;;  %v925_v15 = vsub.f32 %v7433_v62, %v913_v10  ;;  %730 = vadd.xlane.f32.xlu0 %v729_v26  ;;  %v1384_v23 = vpop.xlane.xlu1 %1383 }
 0x657   :  { %6684 = vpow2.f32 %v718_v7  ;;  %v1400_v34 = vsub.f32 %v7440_v2, %v1384_v23 }
 0x658   :  { %v7582_v45 = vpop.eup %6676  ;;  %v933_v21 = vmul.f32 1.442695, %v925_v15 }
 0x659   :  { %v922_v58 = vpop.xlane.xlu0 %921  ;;  %v941_v28 = vsel %vm689_vm6, %v7582_v45, 0.0  ;;  %v7587_v41 = vpop.eup %6678 }
 0x65a   :  { %6686 = vpow2.f32 %v933_v21  ;;  %v928_v5 = vsub.f32 %v7455_v31, %v922_v58  ;;  %942 = vadd.xlane.f32.xlu1 %v941_v28  ;;  %v1390_v62 = vpop.xlane.xlu1 %1389  ;;  %v726_v7 = vsel %vm689_vm6, %v7587_v41, 0.0  ;;  %v1406_v21 = vmul.f32 1.442695, %v1400_v34 }
 0x65b   :  { %6688 = vpow2.f32 %v937_v42  ;;  %v1402_v1 = vsub.f32 %v7462_v50, %v1390_v62 }
 0x65c   :  { %v7590_v25 = vpop.eup %6680  ;;  %v939_v3 = vmul.f32 1.442695, %v928_v5 }
 0x65d   :  { %v707_v56 = vpop.xlane.xlu0 %706  ;;  %v950_v39 = vsel %vm689_vm6, %v7590_v25, 0.0  ;;  %v1410_v10 = vmul.f32 1.442695, %v1402_v1 }
 0x65e   :  { %6690 = vpow2.f32 %v939_v3  ;;  %v713_v27 = vsub.f32 %v7473_v60, %v707_v56  ;;  %951 = vadd.xlane.f32.xlu0 %v950_v39  ;;  %727 = vadd.xlane.f32.xlu1 %v726_v7  ;;  %v1396_v28 = vpop.xlane.xlu1 %1395 }
 0x65f   :  { %6692 = vpow2.f32 %v722_v4  ;;  %v1404_v3 = vsub.f32 %v7478_v22, %v1396_v28 }
 0x660   :  { %v7598_v31 = vpop.eup %6682  ;;  %v724_v26 = vmul.f32 1.442695, %v713_v27 }
 0x661   :  { %v1387_v50 = vpop.xlane.xlu0 %1386  ;;  %v735_v15 = vsel %vm689_vm6, %v7598_v31, 0.0  ;;  %v7603_v42 = vpop.eup %6684 }
 0x662   :  { %6694 = vpow2.f32 %v724_v26  ;;  %v1401_v55 = vsub.f32 %v7487_v12, %v1387_v50  ;;  %736 = vadd.xlane.f32.xlu0 %v735_v15  ;;  %v732_v2 = vsel %vm689_vm6, %v7603_v42, 0.0  ;;  %v1414_v26 = vmul.f32 1.442695, %v1404_v3 }
 0x663   :  { %6696 = vpow2.f32 %v1410_v10 }
 0x664   :  { %v7606_v60 = vpop.eup %6686  ;;  %v1408_v58 = vmul.f32 1.442695, %v1401_v55 }
 0x665   :  { %v1393_v5 = vpop.xlane.xlu0 %1392  ;;  %v947_v23 = vsel %vm689_vm6, %v7606_v60, 0.0  ;;  %v7612_v62 = vpop.eup %6688 }
 0x666   :  { %6698 = vpow2.f32 %v1408_v58  ;;  %v1403_v4 = vsub.f32 %v7494_v46, %v1393_v5  ;;  %733 = vadd.xlane.f32.xlu0 %v732_v2  ;;  %948 = vadd.xlane.f32.xlu1 %v947_v23  ;;  %v953_v7 = vsel %vm689_vm6, %v7612_v62, 0.0 }
 0x667   :  { %6700 = vpow2.f32 %v1406_v21 }
 0x668   :  { %v7615_v12 = vpop.eup %6690  ;;  %v1412_v1 = vmul.f32 1.442695, %v1403_v4 }
 0x669   :  { %v1399_v56 = vpop.xlane.xlu0 %1398  ;;  %v956_v39 = vsel %vm689_vm6, %v7615_v12, 0.0  ;;  %v7622_v27 = vpop.eup %6692 }
 0x66a   :  { %v1405_v34 = vsub.f32 %v7501_v35, %v1399_v56  ;;  %957 = vadd.xlane.f32.xlu0 %v956_v39  ;;  %954 = vadd.xlane.f32.xlu1 %v953_v7  ;;  %v1718_v46 = vpop.xlane.xlu1 %1717  ;;  %6702 = vpow2.f32 %v1412_v1  ;;  %v738_v21 = vsel %vm689_vm6, %v7622_v27, 0.0 }
 0x66b   :  { %v1734_v50 = vsub.f32 %v7512_v6, %v1718_v46 }
 0x66c   :  { %v7625_v10 = vpop.eup %6694  ;;  %v1416_v22 = vmul.f32 1.442695, %v1405_v34 }
 0x66d   :  { %v1721_v15 = vpop.xlane.xlu0 %1720  ;;  %v741_v55 = vsel %vm689_vm6, %v7625_v10, 0.0  ;;  %v7632_v58 = vpop.eup %6696  ;;  %v1740_v2 = vmul.f32 1.442695, %v1734_v50 }
 0x66e   :  { %6704 = vpow2.f32 %v1416_v22  ;;  %v1735_v35 = vsub.f32 %v7519_v18, %v1721_v15  ;;  %742 = vadd.xlane.f32.xlu0 %v741_v55  ;;  %739 = vadd.xlane.f32.xlu1 %v738_v21  ;;  %v1724_v28 = vpop.xlane.xlu1 %1723  ;;  %v1424_v1 = vsel %vm689_vm6, %v7632_v58, 0.0 }
 0x66f   :  { %6706 = vpow2.f32 %v1414_v26  ;;  %v1736_v23 = vsub.f32 %v7530_v59, %v1724_v28 }
 0x670   :  { %v7635_v5 = vpop.eup %6698  ;;  %v1742_v6 = vmul.f32 1.442695, %v1735_v35 }
 0x671   :  { %v1727_v4 = vpop.xlane.xlu0 %1726  ;;  %v1421_v3 = vsel %vm689_vm6, %v7635_v5, 0.0  ;;  %v7642_v56 = vpop.eup %6700  ;;  %v1744_v39 = vmul.f32 1.442695, %v1736_v23 }
 0x672   :  { %6708 = vpow2.f32 %v1742_v6  ;;  %v1737_v18 = vsub.f32 %v7537_v17, %v1727_v4  ;;  %1422 = vadd.xlane.f32.xlu0 %v1421_v3  ;;  %1425 = vadd.xlane.f32.xlu1 %v1424_v1  ;;  %v1730_v34 = vpop.xlane.xlu1 %1729  ;;  %v1418_v59 = vsel %vm689_vm6, %v7642_v56, 0.0 }
 0x673   :  { %6710 = vpow2.f32 %v1740_v2  ;;  %v1738_v17 = vsub.f32 %v7548_v37, %v1730_v34 }
 0x674   :  { %v1746_v7 = vmul.f32 1.442695, %v1737_v18  ;;  %v7647_v26 = vpop.eup %6702 }
 0x675   :  { %v1733_v46 = vpop.xlane.xlu0 %1732  ;;  %v1427_v55 = vsel %vm689_vm6, %v7647_v26, 0.0 }
 0x676   :  { %6712 = vpow2.f32 %v1746_v7  ;;  %v1739_v22 = vsub.f32 %v7555_v20, %v1733_v46  ;;  %1419 = vadd.xlane.f32.xlu0 %v1418_v59  ;;  %v1748_v20 = vmul.f32 1.442695, %v1738_v17  ;;  %v8998_v59 = vpack.i.bf16 %v7145_v33, %v7143_v32 }
 0x677   :  { %6714 = vpow2.f32 %v1744_v39  ;;  %v6538_v32 = vunpack.i.h.bf16 %v7302_v16  ;;  %v6537_v33 = vunpack.i.l.bf16 %v7302_v16 }
 0x678   :  { %v7650_v50 = vpop.eup %6704  ;;  %v1750_v15 = vmul.f32 1.442695, %v1739_v22  ;;  %v8999_v22 = vpack.i.bf16 %v7164_v44, %v7162_v43 }
 0x679   :  { %v1433_v21 = vsel %vm689_vm6, %v7650_v50, 0.0  ;;  %v7657_v35 = vpop.eup %6706  ;;  %v6546_v17 = vpop.permute.xlu0 %6545 }
 0x67a   :  { %1428 = vadd.xlane.f32.xlu0 %v1427_v55  ;;  %1434 = vadd.xlane.f32.xlu1 %v1433_v21  ;;  %6716 = vpow2.f32 %v1750_v15  ;;  %v1430_v37 = vsel %vm689_vm6, %v7657_v35, 0.0  ;;  %v7693_v15 = vpop.permute.xlu1 %6550 }
 0x67b   :  { %6718 = vpow2.f32 %v1748_v20 }
 0x67c   :  { %v7659_v28 = vpop.eup %6708 }
 0x67d   :  { %v1755_v2 = vsel %vm689_vm6, %v7659_v28, 0.0  ;;  %v7665_v6 = vpop.eup %6710 }
 0x67e   :  { %1756 = vadd.xlane.f32.xlu1 %v1755_v2  ;;  %1431 = vadd.xlane.f32.xlu0 %v1430_v37  ;;  %v1752_v3 = vsel %vm689_vm6, %v7665_v6, 0.0 }
 0x680   :  { %v7667_v23 = vpop.eup %6712 }
 0x681   :  { %v1761_v4 = vsel %vm689_vm6, %v7667_v23, 0.0  ;;  %v7673_v1 = vpop.eup %6714 }
 0x682   :  { %1762 = vadd.xlane.f32.xlu1 %v1761_v4  ;;  %1753 = vadd.xlane.f32.xlu0 %v1752_v3  ;;  %v1758_v18 = vsel %vm689_vm6, %v7673_v1, 0.0 }
 0x684   :  { %v7677_v39 = vpop.eup %6716 }
 0x685   :  { %v1767_v7 = vsel %vm689_vm6, %v7677_v39, 0.0  ;;  %v7681_v34 = vpop.eup %6718 }
 0x686   :  { %1759 = vadd.xlane.f32.xlu1 %v1758_v18  ;;  %v1764_v46 = vsel %vm689_vm6, %v7681_v34, 0.0 }
 0x68a   :  { %1768 = vadd.xlane.f32.xlu1 %v1767_v7 }
 0x68e   :  { %1765 = vadd.xlane.f32.xlu1 %v1764_v46 }
 0x698   :  { %6555 = vrot.lane.b32.xlu0 %v8998_v59, %s6959_s23  ;;  %v6548_v59 = vunpack.i.h.bf16 %v6546_v17 }
 0x69f   :  { %6560 = vrot.lane.b32.xlu1 %v8999_v22, %s6959_s23  ;;  %v6547_v22 = vunpack.i.l.bf16 %v6546_v17 }
 0x6d7   :  { %v946_v55 = vpop.xlane.xlu0 %945 }
 0x6d8   :  { %6720 = vrcp.f32 %v946_v55  ;;  %v6124_v55 = vpack.c.bf16 %v6538_v32, %v6537_v33 }
 0x6e2   :  { %v6721_v3 = vpop.eup %6720 }
 0x6e3   :  { %v731_v21 = vpop.xlane.xlu0 %730  ;;  %v966_v46 = vmul.f32 %v6721_v3, %v7567_v49 }
 0x6e7   :  { %v943_v20 = vpop.xlane.xlu1 %942 }
 0x6e8   :  { %6722 = vrcp.f32 %v943_v20 }
 0x6eb   :  { %v952_v2 = vpop.xlane.xlu0 %951  ;;  %v728_v37 = vpop.xlane.xlu1 %727 }
 0x6ec   :  { %6724 = vrcp.f32 %v952_v2 }
 0x6ef   :  { %v737_v4 = vpop.xlane.xlu0 %736 }
 0x6f2   :  { %v6723_v18 = vpop.eup %6722 }
 0x6f3   :  { %v734_v7 = vpop.xlane.xlu0 %733  ;;  %v949_v43 = vpop.xlane.xlu1 %948  ;;  %v965_v44 = vmul.f32 %v6723_v18, %v7582_v45  ;;  %v6128_v45 = vpack.c.bf16 %v6548_v59, %v6547_v22 }
 0x6f4   :  { %6726 = vrcp.f32 %v949_v43 }
 0x6f5   :  { %5632 = vmatprep.mubr.msk.f32.mxu1 %vm689_vm6, %v965_v44  ;;  %6728 = vrcp.f32 %v728_v37 }
 0x6f6   :  { %5633 = vmatmul.mubr.msk.f32.vlgmr.msra.gmra.mrb[10].mxu1 %vm689_vm6, %v966_v46  ;;  %v6725_v3 = vpop.eup %6724 }
 0x6f7   :  { %6123 = vmatpush3.bf16.msra.mxu1 %v7307_v38  ;;  %v958_v20 = vpop.xlane.xlu0 %957  ;;  %v955_v16 = vpop.xlane.xlu1 %954  ;;  %v968_v32 = vmul.f32 %v6725_v3, %v7590_v25  ;;  %v6552_v3 = vunpack.i.l.bf16 %v7693_v15 }
 0x6f8   :  { %6730 = vrcp.f32 %v958_v20  ;;  %6125 = vmatprep.subr.bf16.mxu1 %v6124_v55 }
 0x6f9   :  { %6732 = vrcp.f32 %v955_v16 }
 0x6fa   :  { %6734 = vrcp.f32 %v731_v21 }
 0x6fb   :  { %6127 = vmatpush3.bf16.msra.mxu1 %v6124_v55  ;;  %v743_v49 = vpop.xlane.xlu0 %742  ;;  %6736 = vrcp.f32 %v734_v7  ;;  %v740_v2 = vpop.xlane.xlu1 %739 }
 0x6fc   :  { %6129 = vmatprep.subr.bf16.mxu1 %v6128_v45  ;;  %6738 = vrcp.f32 %v737_v4 }
 0x6fd   :  { %6740 = vrcp.f32 %v740_v2 }
 0x6fe   :  { %v6727_v17 = vpop.eup %6726  ;;  %6742 = vrcp.f32 %v743_v49 }
 0x6ff   :  { %6131 = vmatpush3.bf16.msra.mxu1 %v6128_v45  ;;  %v1423_v18 = vpop.xlane.xlu0 %1422  ;;  %v967_v38 = vmul.f32 %v6727_v17, %v7606_v60  ;;  %v6729_v37 = vpop.eup %6728 }
 0x700   :  { %6151 = vmatprep.subr.bf16.mxu1 %v7125_v19  ;;  %v1426_v43 = vpop.xlane.xlu1 %1425  ;;  %v750_v60 = vmul.f32 %v6729_v37, %v7587_v41 }
 0x701   :  { %5635 = vmatprep.mubr.msk.f32.mxu1 %vm689_vm6, %v967_v38 }
 0x702   :  { %v6731_v33 = vpop.eup %6730  ;;  %5636 = vmatmul.mubr.msk.f32.gmra.mrb[12].mxu1 %vm689_vm6, %v968_v32 }
 0x703   :  { %v6733_v21 = vpop.eup %6732  ;;  %v1420_v7 = vpop.xlane.xlu0 %1419  ;;  %v970_v44 = vmul.f32 %v6731_v33, %v7615_v12 }
 0x704   :  { %v969_v4 = vmul.f32 %v6733_v21, %v7612_v62  ;;  %6744 = vrcp.f32 %v1420_v7  ;;  %v6735_v46 = vpop.eup %6734 }
 0x705   :  { %v6737_v25 = vpop.eup %6736  ;;  %6746 = vrcp.f32 %v1423_v18  ;;  %v751_v55 = vmul.f32 %v6735_v46, %v7576_v13 }
 0x706   :  { %5638 = vmatprep.mubr.msk.f32.mxu1 %vm689_vm6, %v969_v4  ;;  %6748 = vrcp.f32 %v1426_v43  ;;  %v6739_v12 = vpop.eup %6738  ;;  %v752_v62 = vmul.f32 %v6737_v25, %v7603_v42  ;;  %v6553_v42 = vunpack.i.h.bf16 %v7693_v15 }
 0x707   :  { %5639 = vmatmul.mubr.msk.f32.gmra.mrb[14].mxu1 %vm689_vm6, %v970_v44  ;;  %v1429_v59 = vpop.xlane.xlu0 %1428  ;;  %v1435_v22 = vpop.xlane.xlu1 %1434  ;;  %v753_v41 = vmul.f32 %v6739_v12, %v7598_v31 }
 0x708   :  { %5653 = vmatprep.mubr.msk.f32.mxu1 %vm689_vm6, %v750_v60  ;;  %v6741_v20 = vpop.eup %6740  ;;  %6750 = vrcp.f32 %v1429_v59  ;;  %v6180_v32 = vpack.c.bf16 %v6553_v42, %v6552_v3  ;;  %v7770_v42 = vld [vmem:[%s8926_s2] sm:$0xff] }
 0x709   :  { %v6743_v13 = vpop.eup %6742  ;;  %v754_v49 = vmul.f32 %v6741_v20, %v7622_v27 }
 0x70b   :  { %5654 = vmatmul.mubr.msk.f32.vlgmr.msra.gmra.mrb[10].mxu1 %vm689_vm6, %v751_v55  ;;  %v1432_v16 = vpop.xlane.xlu0 %1431  ;;  %v1757_v45 = vpop.xlane.xlu1 %1756 }
 0x70c   :  { %6153 = vmatpush3.bf16.msra.mxu1 %v7125_v19  ;;  %5656 = vmatprep.mubr.msk.f32.mxu1 %vm689_vm6, %v752_v62  ;;  %6752 = vrcp.f32 %v1432_v16  ;;  %v755_v19 = vmul.f32 %v6743_v13, %v7625_v10 }
 0x70d   :  { %6155 = vmatprep.subr.bf16.mxu1 %v7153_v36  ;;  %6754 = vrcp.f32 %v1435_v22 }
 0x70e   :  { %v6745_v2 = vpop.eup %6744 }
 0x70f   :  { %5657 = vmatmul.mubr.msk.f32.gmra.mrb[12].mxu1 %vm689_vm6, %v753_v41  ;;  %v1754_v17 = vpop.xlane.xlu0 %1753  ;;  %v1763_v18 = vpop.xlane.xlu1 %1762  ;;  %v1442_v27 = vmul.f32 %v6745_v2, %v7642_v56  ;;  %v8954_v2 = vsub.s32 1, %v7078_v52 }
 0x710   :  { %6157 = vmatpush3.bf16.msra.mxu1 %v7153_v36  ;;  %5659 = vmatprep.mubr.msk.f32.mxu1 %vm689_vm6, %v754_v49  ;;  %6756 = vrcp.f32 %v1754_v17  ;;  %v6747_v31 = vpop.eup %6746 }
 0x711   :  { %6159 = vmatprep.subr.bf16.mxu1 %v7174_v48  ;;  %v6749_v38 = vpop.eup %6748  ;;  %v1443_v21 = vmul.f32 %v6747_v31, %v7635_v5  ;;  %6758 = vrcp.f32 %v1757_v45  ;;  %v1928_v3 = vrot.slane %v7770_v42, %v8954_v2 }
 0x712   :  { %v6751_v43 = vpop.eup %6750  ;;  %v1444_v7 = vmul.f32 %v6749_v38, %v7632_v58 }
 0x713   :  { %5660 = vmatmul.mubr.msk.f32.gmra.mrb[14].mxu1 %vm689_vm6, %v755_v19  ;;  %v6556_v15 = vpop.permute.xlu0 %6555  ;;  %v1760_v37 = vpop.xlane.xlu1 %1759 }
 0x714   :  { %6161 = vmatpush3.bf16.msra.mxu1 %v7174_v48  ;;  %v6558_v33 = vunpack.i.h.bf16 %v6556_v15  ;;  %v6557_v36 = vunpack.i.l.bf16 %v6556_v15  ;;  %5695 = vmatprep.mubr.msk.f32.mxu1 %vm689_vm6, %v1442_v27  ;;  %v1445_v48 = vmul.f32 %v6751_v43, %v7647_v26  ;;  %6760 = vrcp.f32 %v1760_v37  ;;  %v6921_v27 = vld [vmem:[#allocation2 + $0x8] sm:$0xff]  ;;  %v6922_v15 = vld [vmem:[#allocation2] sm:$0xff] }
 0x715   :  { %6181 = vmatprep.subr.bf16.mxu1 %v6180_v32  ;;  %6762 = vrcp.f32 %v1763_v18 }
 0x716   :  { %v6184_v10 = vpack.c.bf16 %v6558_v33, %v6557_v36  ;;  %v6753_v56 = vpop.eup %6752 }
 0x717   :  { %5696 = vmatmul.mubr.msk.f32.vlgmr.msra.gmra.mrb[10].mxu1 %vm689_vm6, %v1443_v21  ;;  %v1769_v44 = vpop.xlane.xlu1 %1768  ;;  %v6755_v4 = vpop.eup %6754  ;;  %v1446_v5 = vmul.f32 %v6753_v56, %v7657_v35  ;;  %v6923_v56 = vld [vmem:[#allocation2 + $0x18] sm:$0xff] }
 0x718   :  { %6183 = vmatpush3.bf16.msra.mxu1 %v6180_v32  ;;  %5698 = vmatprep.mubr.msk.f32.mxu1 %vm689_vm6, %v1444_v7  ;;  %v1447_v58 = vmul.f32 %v6755_v4, %v7650_v50 }
 0x719   :  { %6185 = vmatprep.subr.bf16.mxu1 %v6184_v10 }
 0x71a   :  { %v6757_v46 = vpop.eup %6756 }
 0x71b   :  { %5699 = vmatmul.mubr.msk.f32.gmra.mrb[12].mxu1 %vm689_vm6, %v1445_v48  ;;  %v1766_v60 = vpop.xlane.xlu1 %1765  ;;  %v1776_v25 = vmul.f32 %v6757_v46, %v7665_v6  ;;  %v6759_v55 = vpop.eup %6758  ;;  %v6924_v48 = vld [vmem:[#allocation2 + $0x10] sm:$0xff] }
 0x71c   :  { %6187 = vmatpush3.bf16.msra.mxu1 %v6184_v10  ;;  %5701 = vmatprep.mubr.msk.f32.mxu1 %vm689_vm6, %v1446_v5  ;;  %6764 = vrcp.f32 %v1766_v60  ;;  %v1777_v62 = vmul.f32 %v6759_v55, %v7659_v28  ;;  %v405_v28 = vld [vmem:[%s8925_s1 + $0x40] sm:$0xff] }
 0x71d   :  { %6766 = vrcp.f32 %v1769_v44  ;;  %v6926_v55 = vld [vmem:[#allocation2 + $0x20] sm:$0xff] }
 0x71e   :  { %v6761_v12 = vpop.eup %6760 }
 0x71f   :  { %5702 = vmatmul.mubr.msk.f32.gmra.mrb[14].mxu1 %vm689_vm6, %v1447_v58  ;;  %v6561_v26 = vpop.permute.xlu1 %6560  ;;  %v6763_v20 = vpop.eup %6762  ;;  %v1778_v50 = vmul.f32 %v6761_v12, %v7673_v1  ;;  %v406_v1 = vld [vmem:[%s8925_s1 + $0x50] sm:$0xff] }
 0x720   :  { %5737 = vmatprep.mubr.msk.f32.mxu1 %vm689_vm6, %v1776_v25  ;;  %v6563_v59 = vunpack.i.h.bf16 %v6561_v26  ;;  %v6562_v35 = vunpack.i.l.bf16 %v6561_v26  ;;  %v1779_v6 = vmul.f32 %v6763_v20, %v7667_v23  ;;  %v6192_v23 = vpack.c.bf16 %v406_v1, %v405_v28 }
 0x722   :  { %v6188_v22 = vpack.c.bf16 %v6563_v59, %v6562_v35  ;;  %v6925_v35 = vld [vmem:[#allocation2 + $0x28] sm:$0xff] }
 0x724   :  { %6189 = vmatprep.subr.bf16.mxu1 %v6188_v22 }
 0x725   :  { %6191 = vmatpush3.bf16.msra.mxu1 %v6188_v22 }
 0x726   :  { %v6765_v16 = vpop.eup %6764  ;;  %6193 = vmatprep.subr.bf16.mxu1 %v6192_v23 }
 0x727   :  { %v6767_v45 = vpop.eup %6766  ;;  %v1780_v41 = vmul.f32 %v6765_v16, %v7681_v34  ;;  %v407_v34 = vld [vmem:[%s8925_s1 + $0x60] sm:$0xff] }
 0x728   :  { %5738 = vmatmul.mubr.msk.f32.vlgmr.msra.gmra.mrb[10].mxu1 %vm689_vm6, %v1777_v62  ;;  %v1781_v13 = vmul.f32 %v6767_v45, %v7677_v39  ;;  %v408_v39 = vld [vmem:[%s8925_s1 + $0x70] sm:$0xff] }
 0x729   :  { %5740 = vmatprep.mubr.msk.f32.mxu1 %vm689_vm6, %v1778_v50  ;;  %6195 = vmatpush3.bf16.msra.mxu1 %v6192_v23  ;;  %v6196_v49 = vpack.c.bf16 %v408_v39, %v407_v34 }
 0x72b   :  { %6197 = vmatprep.subr.bf16.mxu1 %v6196_v49 }
 0x72c   :  { %5741 = vmatmul.mubr.msk.f32.gmra.mrb[12].mxu1 %vm689_vm6, %v1779_v6 }
 0x72d   :  { %5743 = vmatprep.mubr.msk.f32.mxu1 %vm689_vm6, %v1780_v41  ;;  %6199 = vmatpush3.bf16.msra.mxu1 %v6196_v49 }
 0x730   :  { %5744 = vmatmul.mubr.msk.f32.gmra.mrb[14].mxu1 %vm689_vm6, %v1781_v13 }
 0x7fb   :  { %v5739_v17 = vpop.f32.mrb[10].mxu1 }
 0x7fc   :  { %v1930_v18 = vadd.f32 %v5739_v17, %v1928_v3  ;;  %v1890_v19 = vpop.f32.mrb[11].mxu1 }
 0x7fd   :  { %v1929_v31 = vadd.f32 %v1928_v3, %v1890_v19 }
 0x7fe   :  { %v1936_v38 = vadd.f32 %v6921_v27, %v1930_v18 }
 0x7ff   :  { %v1935_v37 = vadd.f32 %v6922_v15, %v1929_v31  ;;  %v5742_v32 = vpop.f32.mrb[12].mxu1 }
 0x800   :  { %v1942_v33 = vsel %vm55_vm2, %v1936_v38, 0.0  ;;  %v1932_v36 = vadd.f32 %v5742_v32, %v1928_v3  ;;  %v1900_v21 = vpop.f32.mrb[13].mxu1 }
 0x801   :  { %v1941_v43 = vsel %vm55_vm2, %v1935_v37, 0.0  ;;  %v1931_v10 = vadd.f32 %v1928_v3, %v1900_v21 }
 0x802   :  { %v1943_v7 = vadd.f32 %v1942_v33, %v1941_v43  ;;  %v1938_v44 = vadd.f32 %v6923_v56, %v1932_v36 }
 0x803   :  { %v1937_v4 = vadd.f32 %v6924_v48, %v1931_v10  ;;  %v5745_v5 = vpop.f32.mrb[14].mxu1 }
 0x804   :  { %v1934_v46 = vadd.f32 %v5745_v5, %v1928_v3  ;;  %v1910_v60 = vpop.f32.mrb[15].mxu1  ;;  %v1946_v59 = vsel %vm55_vm2, %v1938_v44, 0.0 }
 0x805   :  { %v1944_v58 = vsel %vm55_vm2, %v1937_v4, 0.0  ;;  %v1933_v25 = vadd.f32 %v1928_v3, %v1910_v60 }
 0x806   :  { %v1945_v26 = vadd.f32 %v1944_v58, %v1943_v7  ;;  %v1940_v22 = vadd.f32 %v6925_v35, %v1934_v46 }
 0x807   :  { %v1939_v12 = vadd.f32 %v6926_v55, %v1933_v25  ;;  %v8953_v55 = vsub.s32 2, %v7078_v52 }
 0x808   :  { %v1947_v62 = vadd.f32 %v1946_v59, %v1945_v26  ;;  %v1950_v16 = vsel %vm55_vm2, %v1940_v22, 0.0 }
 0x809   :  { %v1948_v20 = vsel %vm55_vm2, %v1939_v12, 0.0 }
 0x80a   :  { %v1949_v50 = vadd.f32 %v1948_v20, %v1947_v62  ;;  %v2001_v62 = vrot.slane %v7770_v42, %v8953_v55 }
 0x80c   :  { %v1951_v6 = vadd.f32 %v1950_v16, %v1949_v50 }
 0x80e   :  { %v1952_v45 = vrot.slane %v1951_v6, 4 }
 0x810   :  { %v1953_v41 = vadd.f32 %v1952_v45, %v1951_v6 }
 0x812   :  { %v1954_v13 = vrot.slane %v1953_v41, 2 }
 0x814   :  { %v1955_v28 = vadd.f32 %v1954_v13, %v1953_v41 }
 0x816   :  { %v1956_v1 = vrot.slane %v1955_v28, 1 }
 0x818   :  { %v1957_v23 = vadd.f32 %v1956_v1, %v1955_v28 }
 0x81a   :  { %v1959_v34 = vmul.f32 0.020833334, %v1957_v23 }
 0x81c   :  { %v1960_v39 = vsub.f32 %v1935_v37, %v1959_v34  ;;  %v1961_v49 = vsub.f32 %v1936_v38, %v1959_v34  ;;  %v1962_v3 = vsub.f32 %v1937_v4, %v1959_v34  ;;  %v1963_v17 = vsub.f32 %v1938_v44, %v1959_v34 }
 0x81d   :  { %v1964_v18 = vsub.f32 %v1939_v12, %v1959_v34  ;;  %v1965_v19 = vsub.f32 %v1940_v22, %v1959_v34  ;;  %v8952_v12 = vsub.s32 3, %v7078_v52 }
 0x81e   :  { %v1966_v31 = vmul.f32 %v1960_v39, %v1960_v39  ;;  %v1967_v27 = vmul.f32 %v1961_v49, %v1961_v49  ;;  %v1968_v15 = vmul.f32 %v1962_v3, %v1962_v3  ;;  %v1969_v32 = vmul.f32 %v1963_v17, %v1963_v17 }
 0x81f   :  { %v1970_v43 = vmul.f32 %v1964_v18, %v1964_v18  ;;  %v1971_v56 = vmul.f32 %v1965_v19, %v1965_v19  ;;  %v2011_v50 = vrot.slane %v7770_v42, %v8952_v12 }
 0x820   :  { %v1972_v33 = vsel %vm55_vm2, %v1966_v31, 0.0  ;;  %v1973_v36 = vsel %vm55_vm2, %v1967_v27, 0.0  ;;  %v1975_v10 = vsel %vm55_vm2, %v1968_v15, 0.0  ;;  %v1977_v38 = vsel %vm55_vm2, %v1969_v32, 0.0 }
 0x821   :  { %v1974_v21 = vadd.f32 %v1973_v36, %v1972_v33  ;;  %v1979_v44 = vsel %vm55_vm2, %v1970_v43, 0.0  ;;  %v1981_v4 = vsel %vm55_vm2, %v1971_v56, 0.0  ;;  %v410_v36 = vld [vmem:[%s8925_s1 + $0x90] sm:$0xff]  ;;  %v411_v43 = vld [vmem:[%s8925_s1 + $0xa0] sm:$0xff] }
 0x822   :  { %v413_v56 = vld [vmem:[%s8925_s1 + $0xc0] sm:$0xff] }
 0x823   :  { %v1976_v7 = vadd.f32 %v1975_v10, %v1974_v21  ;;  %v412_v10 = vld [vmem:[%s8925_s1 + $0xb0] sm:$0xff] }
 0x825   :  { %v1978_v37 = vadd.f32 %v1977_v38, %v1976_v7  ;;  %v6204_v7 = vpack.c.bf16 %v412_v10, %v411_v43  ;;  %v414_v38 = vld [vmem:[%s8925_s1 + $0xd0] sm:$0xff] }
 0x827   :  { %v1980_v48 = vadd.f32 %v1979_v44, %v1978_v37  ;;  %v6208_v37 = vpack.c.bf16 %v414_v38, %v413_v56  ;;  %v415_v44 = vld [vmem:[%s8925_s1 + $0xe0] sm:$0xff] }
 0x829   :  { %v1982_v5 = vadd.f32 %v1981_v4, %v1980_v48  ;;  %v416_v48 = vld [vmem:[%s8925_s1 + $0xf0] sm:$0xff] }
 0x82a   :  { %v6212_v4 = vpack.c.bf16 %v416_v48, %v415_v44 }
 0x82b   :  { %v1983_v46 = vrot.slane %v1982_v5, 4 }
 0x82d   :  { %v1984_v60 = vadd.f32 %v1983_v46, %v1982_v5  ;;  %v8951_v5 = vsub.s32 4, %v7078_v52 }
 0x82f   :  { %v1985_v58 = vrot.slane %v1984_v60, 2  ;;  %v2021_v46 = vrot.slane %v7770_v42, %v8951_v5 }
 0x831   :  { %v1986_v25 = vadd.f32 %v1985_v58, %v1984_v60 }
 0x833   :  { %v1987_v26 = vrot.slane %v1986_v25, 1 }
 0x835   :  { %v1988_v59 = vadd.f32 %v1987_v26, %v1986_v25 }
 0x837   :  { %v1989_v35 = vmul.f32 0.020833334, %v1988_v59 }
 0x839   :  { %v1990_v22 = vadd.f32 1e-05, %v1989_v35 }
 0x83b   :  { %6768 = vrsqrt.f32 %v1990_v22 }
 0x845   :  { %v6769_v20 = vpop.eup %6768 }
 0x846   :  { %v1996_v16 = vmul.f32 %v6769_v20, %v1964_v18  ;;  %v1992_v6 = vmul.f32 %v6769_v20, %v1960_v39  ;;  %v1993_v45 = vmul.f32 %v6769_v20, %v1961_v49  ;;  %v1994_v41 = vmul.f32 %v6769_v20, %v1962_v3 }
 0x847   :  { %v1995_v13 = vmul.f32 %v6769_v20, %v1963_v17  ;;  %v1997_v28 = vmul.f32 %v6769_v20, %v1965_v19  ;;  %v9000_v18 = vmov 0.0   ;;  %v409_v19 = vld [vmem:[%s8925_s1 + $0x80] sm:$0xff] }
 0x848   :  { %v2002_v1 = vmul.f32 %v2001_v62, %v1992_v6  ;;  %v2003_v23 = vmul.f32 %v2001_v62, %v1993_v45  ;;  %v2004_v34 = vmul.f32 %v2001_v62, %v1994_v41  ;;  %v2006_v32 = vmul.f32 %v2001_v62, %v1996_v16 }
 0x849   :  { %v2005_v15 = vmul.f32 %v2001_v62, %v1995_v13  ;;  %v2007_v49 = vmul.f32 %v2001_v62, %v1997_v28  ;;  %v6200_v21 = vpack.c.bf16 %v410_v36, %v409_v19 }
 0x84a   :  { %v7795_v31 = vadd.f32 %v2011_v50, %v2002_v1  ;;  %v7797_v27 = vadd.f32 %v2011_v50, %v2003_v23  ;;  %v7801_v33 = vadd.f32 %v2011_v50, %v2004_v34  ;;  %v7809_v3 = vadd.f32 %v2011_v50, %v2006_v32 }
 0x84b   :  { %v7807_v39 = vadd.f32 %v2011_v50, %v2005_v15  ;;  %v7815_v17 = vadd.f32 %v2011_v50, %v2007_v49  ;;  %6201 = vmatprep.subr.bf16.mxu0 %v6200_v21 }
 0x84c   :  { %5754 = vmatprep.mubr.msk.f32.mxu1 %vm55_vm2, %v7795_v31  ;;  %6203 = vmatpush3.bf16.msra.mxu0 %v6200_v21 }
 0x84d   :  { %5755 = vmatmul.mubr.msk.f32.vlgmr.msra.gmra.mrb[16].mxu1 %vm55_vm2, %v7797_v27  ;;  %6205 = vmatprep.subr.bf16.mxu0 %v6204_v7 }
 0x84e   :  { %5757 = vmatprep.mubr.msk.f32.mxu1 %vm55_vm2, %v7801_v33 }
 0x850   :  { %6207 = vmatpush3.bf16.msra.mxu0 %v6204_v7 }
 0x851   :  { %5758 = vmatmul.mubr.msk.f32.gmra.mrb[18].mxu1 %vm55_vm2, %v7807_v39  ;;  %6209 = vmatprep.subr.bf16.mxu0 %v6208_v37 }
 0x852   :  { %5760 = vmatprep.mubr.msk.f32.mxu1 %vm55_vm2, %v7809_v3 }
 0x854   :  { %6211 = vmatpush3.bf16.msra.mxu0 %v6208_v37 }
 0x855   :  { %5761 = vmatmul.mubr.msk.f32.gmra.mrb[20].mxu1 %vm55_vm2, %v7815_v17  ;;  %6213 = vmatprep.subr.bf16.mxu0 %v6212_v4 }
 0x856   :  { %2609 = vmatprep.mubr.f32.mxu1 %v9000_v18 }
 0x858   :  { %6215 = vmatpush3.bf16.msra.mxu0 %v6212_v4 }
 0x920   :  { %v5756_v60 = vpop.f32.mrb[16].mxu1 }
 0x921   :  { %v7848_v58 = vadd.f32 %v5756_v60, %v2021_v46  ;;  %v2106_v25 = vpop.f32.mrb[17].mxu1 }
 0x922   :  { %v7850_v26 = vadd.f32 %v2106_v25, %v2021_v46 }
 0x923   :  { %v7853_v59 = vmul.f32 0.70710677, %v7848_v58 }
 0x924   :  { %v7856_v35 = vmul.f32 0.70710677, %v7850_v26  ;;  %v5759_v22 = vpop.f32.mrb[18].mxu1 }
 0x925   :  { %v2160_v62 = vand.u32 2147483647, %v7853_v59  ;;  %v7859_v20 = vadd.f32 %v5759_v22, %v2021_v46  ;;  %v2116_v50 = vpop.f32.mrb[19].mxu1  ;;  %vm2148_vm12 = vcmp.ge.f32.partialorder %v7853_v59, 0.0  ;;  %v2136_v59 = vmul.f32 0.5, %v7848_v58 }
 0x926   :  { %v2159_v16 = vand.u32 2147483647, %v7856_v35  ;;  %v7862_v6 = vadd.f32 %v2116_v50, %v2021_v46  ;;  %vm2147_vm13 = vcmp.ge.f32.partialorder %v7856_v35, 0.0 }
 0x927   :  { %v2166_v45 = vmul.f32 0.3275911, %v2160_v62  ;;  %v7865_v13 = vmul.f32 0.70710677, %v7859_v20  ;;  %v2238_v56 = vsub.f32 0.0, %v2160_v62 }
 0x928   :  { %v2165_v41 = vmul.f32 0.3275911, %v2159_v16  ;;  %v7868_v1 = vmul.f32 0.70710677, %v7862_v6  ;;  %v5762_v23 = vpop.f32.mrb[20].mxu1  ;;  %v2237_v48 = vsub.f32 0.0, %v2159_v16 }
 0x929   :  { %v2172_v28 = vadd.f32 1.0, %v2166_v45  ;;  %v2162_v15 = vand.u32 2147483647, %v7865_v13  ;;  %v2126_v32 = vpop.f32.mrb[21].mxu1  ;;  %v7872_v36 = vadd.f32 %v5762_v23, %v2021_v46  ;;  %v2244_v25 = vmul.f32 %v2238_v56, %v2160_v62 }
 0x92a   :  { %v2171_v34 = vadd.f32 1.0, %v2165_v41  ;;  %v2161_v19 = vand.u32 2147483647, %v7868_v1  ;;  %v7874_v43 = vadd.f32 %v2126_v32, %v2021_v46  ;;  %v2243_v23 = vmul.f32 %v2237_v48, %v2159_v16 }
 0x92b   :  { %6770 = vrcp.f32 %v2172_v28  ;;  %v2168_v49 = vmul.f32 0.3275911, %v2162_v15  ;;  %v7877_v7 = vmul.f32 0.70710677, %v7872_v36  ;;  %v2240_v50 = vsub.f32 0.0, %v2162_v15 }
 0x92c   :  { %6772 = vrcp.f32 %v2171_v34  ;;  %v2167_v10 = vmul.f32 0.3275911, %v2161_v19  ;;  %v7880_v38 = vmul.f32 0.70710677, %v7874_v43  ;;  %v2239_v12 = vsub.f32 0.0, %v2161_v19 }
 0x92d   :  { %v2174_v21 = vadd.f32 1.0, %v2168_v49  ;;  %v2164_v44 = vand.u32 2147483647, %v7877_v7  ;;  %v2246_v5 = vmul.f32 %v2240_v50, %v2162_v15  ;;  %v2249_v62 = vmul.f32 1.442695, %v2243_v23 }
 0x92e   :  { %v2173_v37 = vadd.f32 1.0, %v2167_v10  ;;  %v2163_v4 = vand.u32 2147483647, %v7880_v38  ;;  %vm2150_vm15 = vcmp.ge.f32.partialorder %v7865_v13, 0.0 }
 0x92f   :  { %6774 = vrcp.f32 %v2174_v21  ;;  %v2170_v60 = vmul.f32 0.3275911, %v2164_v44  ;;  %v2251_v21 = vmul.f32 1.442695, %v2244_v25  ;;  %v2245_v25 = vmul.f32 %v2239_v12, %v2161_v19 }
 0x930   :  { %6776 = vrcp.f32 %v2173_v37  ;;  %v2169_v46 = vmul.f32 0.3275911, %v2163_v4  ;;  %v2241_v50 = vsub.f32 0.0, %v2163_v4 }
 0x931   :  { %v2176_v45 = vadd.f32 1.0, %v2170_v60  ;;  %v2242_v60 = vsub.f32 0.0, %v2164_v44 }
 0x932   :  { %v2175_v34 = vadd.f32 1.0, %v2169_v46  ;;  %v2247_v19 = vmul.f32 %v2241_v50, %v2163_v4 }
 0x933   :  { %6778 = vrcp.f32 %v2176_v45  ;;  %v2255_v45 = vmul.f32 1.442695, %v2246_v5 }
 0x934   :  { %6780 = vrcp.f32 %v2175_v34  ;;  %v2257_v4 = vmul.f32 1.442695, %v2247_v19 }
 0x935   :  { %v6771_v22 = vpop.eup %6770  ;;  %6782 = vpow2.f32 %v2251_v21 }
 0x936   :  { %v6773_v41 = vpop.eup %6772  ;;  %v2184_v28 = vmul.f32 1.0614054, %v6771_v22  ;;  %6784 = vpow2.f32 %v2249_v62 }
 0x937   :  { %v2183_v32 = vmul.f32 1.0614054, %v6773_v41  ;;  %6786 = vpow2.f32 %v2255_v45 }
 0x938   :  { %v2190_v49 = vadd.f32 -1.4531521, %v2184_v28 }
 0x939   :  { %v2189_v10 = vadd.f32 -1.4531521, %v2183_v32  ;;  %v7884_v55 = vpop.eup %6774  ;;  %v2248_v32 = vmul.f32 %v2242_v60, %v2164_v44 }
 0x93a   :  { %v2196_v37 = vmul.f32 %v6771_v22, %v2190_v49  ;;  %v2186_v2 = vmul.f32 1.0614054, %v7884_v55  ;;  %v7887_v16 = vpop.eup %6776 }
 0x93b   :  { %v2195_v56 = vmul.f32 %v6773_v41, %v2189_v10  ;;  %v2185_v15 = vmul.f32 1.0614054, %v7887_v16  ;;  %v2259_v44 = vmul.f32 1.442695, %v2248_v32 }
 0x93c   :  { %v2202_v9 = vadd.f32 1.4214138, %v2196_v37  ;;  %v2192_v46 = vadd.f32 -1.4531521, %v2186_v2 }
 0x93d   :  { %v2201_v48 = vadd.f32 1.4214138, %v2195_v56  ;;  %v2191_v10 = vadd.f32 -1.4531521, %v2185_v15  ;;  %v7891_v11 = vpop.eup %6778  ;;  %v2253_v56 = vmul.f32 1.442695, %v2245_v25 }
 0x93e   :  { %v2208_v28 = vmul.f32 %v6771_v22, %v2202_v9  ;;  %v2198_v23 = vmul.f32 %v7884_v55, %v2192_v46  ;;  %v7893_v2 = vpop.eup %6780  ;;  %v2188_v5 = vmul.f32 1.0614054, %v7891_v11 }
 0x93f   :  { %v2207_v34 = vmul.f32 %v6773_v41, %v2201_v48  ;;  %v2197_v9 = vmul.f32 %v7887_v16, %v2191_v10  ;;  %v2187_v60 = vmul.f32 1.0614054, %v7893_v2  ;;  %6788 = vpow2.f32 %v2253_v56 }
 0x940   :  { %v2214_v49 = vadd.f32 -0.28449672, %v2208_v28  ;;  %v2204_v37 = vadd.f32 1.4214138, %v2198_v23  ;;  %v2194_v15 = vadd.f32 -1.4531521, %v2188_v5  ;;  %v6783_v23 = vpop.eup %6782  ;;  %6790 = vpow2.f32 %v2259_v44 }
 0x941   :  { %v2213_v21 = vadd.f32 -0.28449672, %v2207_v34  ;;  %v2203_v28 = vadd.f32 1.4214138, %v2197_v9  ;;  %v2193_v25 = vadd.f32 -1.4531521, %v2187_v60  ;;  %6792 = vpow2.f32 %v2257_v4 }
 0x942   :  { %v2220_v12 = vmul.f32 %v6771_v22, %v2214_v49  ;;  %v2210_v48 = vmul.f32 %v7884_v55, %v2204_v37  ;;  %v2200_v14 = vmul.f32 %v7891_v11, %v2194_v15  ;;  %v6785_v37 = vpop.eup %6784 }
 0x943   :  { %v2219_v62 = vmul.f32 %v6773_v41, %v2213_v21  ;;  %v2209_v10 = vmul.f32 %v7887_v16, %v2203_v28  ;;  %v2199_v21 = vmul.f32 %v7893_v2, %v2193_v25  ;;  %v6787_v60 = vpop.eup %6786 }
 0x944   :  { %v2226_v46 = vadd.f32 0.2548296, %v2220_v12  ;;  %v2216_v45 = vadd.f32 -0.28449672, %v2210_v48  ;;  %v2206_v9 = vadd.f32 1.4214138, %v2200_v14 }
 0x945   :  { %v2225_v34 = vadd.f32 0.2548296, %v2219_v62  ;;  %v2215_v56 = vadd.f32 -0.28449672, %v2209_v10  ;;  %v2205_v62 = vadd.f32 1.4214138, %v2199_v21 }
 0x946   :  { %v2232_v49 = vmul.f32 %v6771_v22, %v2226_v46  ;;  %v2222_v32 = vmul.f32 %v7884_v55, %v2216_v45  ;;  %v6966_v46 = vmov -1.0  }
 0x947   :  { %v2231_v50 = vmul.f32 %v6773_v41, %v2225_v34  ;;  %v2221_v19 = vmul.f32 %v7887_v16, %v2215_v56  ;;  %v2212_v41 = vmul.f32 %v7891_v11, %v2206_v9  ;;  %v2154_v28 = vsel %vm2148_vm12, 1.0, %v6966_v46 }
 0x948   :  { %v2262_v12 = vmul.f32 %v6783_v23, %v2232_v49  ;;  %v2228_v5 = vadd.f32 0.2548296, %v2222_v32  ;;  %v2211_v34 = vmul.f32 %v7893_v2, %v2205_v62  ;;  %v2153_v44 = vsel %vm2147_vm13, 1.0, %v6966_v46 }
 0x949   :  { %v2261_v22 = vmul.f32 %v6785_v37, %v2231_v50  ;;  %v2227_v25 = vadd.f32 0.2548296, %v2221_v19  ;;  %v2218_v23 = vadd.f32 -0.28449672, %v2212_v41  ;;  %v6789_v21 = vpop.eup %6788  ;;  %v2135_v37 = vmul.f32 0.5, %v7850_v26 }
 0x94a   :  { %v2268_v48 = vsub.f32 1.0, %v2262_v12  ;;  %v2234_v14 = vmul.f32 %v7884_v55, %v2228_v5  ;;  %v2217_v4 = vadd.f32 -0.28449672, %v2211_v34  ;;  %v2156_v9 = vsel %vm2150_vm15, 1.0, %v6966_v46  ;;  %v6791_v41 = vpop.eup %6790 }
 0x94b   :  { %v2267_v15 = vsub.f32 1.0, %v2261_v22  ;;  %v2233_v32 = vmul.f32 %v7887_v16, %v2227_v25  ;;  %v2224_v55 = vmul.f32 %v7891_v11, %v2218_v23  ;;  %vm2149_vm12 = vcmp.ge.f32.partialorder %v7868_v1, 0.0 }
 0x94c   :  { %v2274_v45 = vmul.f32 %v2268_v48, %v2154_v28  ;;  %v2264_v10 = vmul.f32 %v6787_v60, %v2234_v14  ;;  %v2223_v56 = vmul.f32 %v7893_v2, %v2217_v4  ;;  %v2155_v26 = vsel %vm2149_vm12, 1.0, %v6966_v46  ;;  %v6793_v28 = vpop.eup %6792 }
 0x94d   :  { %v2273_v49 = vmul.f32 %v2267_v15, %v2153_v44  ;;  %v2263_v13 = vmul.f32 %v6789_v21, %v2233_v32  ;;  %v2230_v22 = vadd.f32 0.2548296, %v2224_v55  ;;  %vm2152_vm13 = vcmp.ge.f32.partialorder %v7877_v7, 0.0  ;;  %v2498_v21 = vld [vmem:[%s8925_s1 + $0x108] sm:$0xff] }
 0x94e   :  { %v2280_v50 = vadd.f32 1.0, %v2274_v45  ;;  %v2270_v35 = vsub.f32 1.0, %v2264_v10  ;;  %v2229_v62 = vadd.f32 0.2548296, %v2223_v56  ;;  %vm2151_vm15 = vcmp.ge.f32.partialorder %v7880_v38, 0.0  ;;  %v2502_v56 = vld [vmem:[%s8925_s1 + $0x128] sm:$0xff] }
 0x94f   :  { %v2279_v12 = vadd.f32 1.0, %v2273_v49  ;;  %v2269_v16 = vsub.f32 1.0, %v2263_v13  ;;  %v2236_v19 = vmul.f32 %v7891_v11, %v2230_v22  ;;  %v2137_v11 = vmul.f32 0.5, %v7862_v6  ;;  %v2501_v22 = vld [vmem:[%s8925_s1 + $0x120] sm:$0xff] }
 0x950   :  { %v2276_v58 = vmul.f32 %v2270_v35, %v2156_v9  ;;  %v2286_v48 = vmul.f32 %v2280_v50, %v2136_v59  ;;  %v2235_v60 = vmul.f32 %v7893_v2, %v2229_v62  ;;  %v2138_v25 = vmul.f32 0.5, %v7859_v20  ;;  %v2504_v9 = vld [vmem:[%s8925_s1 + $0x138] sm:$0xff] }
 0x951   :  { %v2285_v5 = vmul.f32 %v2279_v12, %v2135_v37  ;;  %v2275_v15 = vmul.f32 %v2269_v16, %v2155_v26  ;;  %v2266_v1 = vmul.f32 %v6791_v41, %v2236_v19  ;;  %v2158_v2 = vsel %vm2152_vm13, 1.0, %v6966_v46  ;;  %v2500_v37 = vld [vmem:[%s8925_s1 + $0x118] sm:$0xff]  ;;  %v2497_v12 = vld [vmem:[%s8925_s1 + $0x100] sm:$0xff] }
 0x952   :  { %v2282_v14 = vadd.f32 1.0, %v2276_v58  ;;  %v2265_v34 = vmul.f32 %v6793_v28, %v2235_v60  ;;  %v2157_v7 = vsel %vm2151_vm15, 1.0, %v6966_v46  ;;  %v2139_v38 = vmul.f32 0.5, %v7874_v43 }
 0x953   :  { %5779 = vmatprep.mubr.msk.f32.mxu0 %vm2291_vm14, %v2285_v5  ;;  %v2281_v45 = vadd.f32 1.0, %v2275_v15  ;;  %v2272_v44 = vsub.f32 1.0, %v2266_v1  ;;  %v2140_v6 = vmul.f32 0.5, %v7872_v36  ;;  %v6216_v43 = vpack.c.bf16 %v2500_v37, %v2498_v21  ;;  %v2499_v36 = vld [vmem:[%s8925_s1 + $0x110] sm:$0xff] }
 0x954   :  { %5780 = vmatmul.mubr.msk.f32.vlgmr.msra.gmra.mrb[34].mxu0 %vm2291_vm14, %v2286_v48  ;;  %v2271_v23 = vsub.f32 1.0, %v2265_v34  ;;  %v2288_v4 = vmul.f32 %v2282_v14, %v2138_v25  ;;  %v6218_v35 = vpack.c.bf16 %v2499_v36, %v2497_v12  ;;  %v6220_v13 = vpack.c.bf16 %v2504_v9, %v2502_v56  ;;  %v2503_v5 = vld [vmem:[%s8925_s1 + $0x130] sm:$0xff] }
 0x955   :  { %v2287_v49 = vmul.f32 %v2281_v45, %v2137_v11  ;;  %v2278_v10 = vmul.f32 %v2272_v44, %v2158_v2  ;;  %6217 = vmatprep.subr.bf16.mxu1 %v6216_v43  ;;  %v6222_v58 = vpack.c.bf16 %v2503_v5, %v2501_v22  ;;  %v2413_v62 = vsub.s32 5, %v7078_v52 }
 0x956   :  { %v2277_v59 = vmul.f32 %v2271_v23, %v2157_v7  ;;  %6219 = vmatpush1.bf16.msra.mxu1 %v6218_v35 }
 0x957   :  { %v2284_v50 = vadd.f32 1.0, %v2278_v10  ;;  %5782 = vmatprep.mubr.msk.f32.mxu0 %vm2291_vm14, %v2287_v49  ;;  %6221 = vmatprep.subr.bf16.mxu1 %v6220_v13  ;;  %v2414_v48 = vrot.slane %v7770_v42, %v2413_v62 }
 0x958   :  { %v2283_v32 = vadd.f32 1.0, %v2277_v59  ;;  %5783 = vmatmul.mubr.msk.f32.gmra.mrb[36].mxu0 %vm2291_vm14, %v2288_v4 }
 0x959   :  { %v2290_v55 = vmul.f32 %v2284_v50, %v2140_v6 }
 0x95a   :  { %v2289_v20 = vmul.f32 %v2283_v32, %v2139_v38  ;;  %6223 = vmatpush1.bf16.msra.mxu1 %v6222_v58 }
 0x95c   :  { %5785 = vmatprep.mubr.msk.f32.mxu0 %vm2291_vm14, %v2289_v20 }
 0x95d   :  { %5786 = vmatmul.mubr.msk.f32.gmra.mrb[38].mxu0 %vm2291_vm14, %v2290_v55 }
 0xa27   :  { %v5781_v16 = vpop.f32.mrb[34].mxu0 }
 0xa28   :  { %v2406_v19 = vadd.f32 %v5781_v16, %v7797_v27  ;;  %v2376_v41 = vpop.f32.mrb[35].mxu0 }
 0xa29   :  { %v2405_v26 = vadd.f32 %v2376_v41, %v7795_v31 }
 0xa2a   :  { %v2416_v60 = vadd.f32 %v2414_v48, %v2406_v19 }
 0xa2b   :  { %v2415_v28 = vadd.f32 %v2414_v48, %v2405_v26  ;;  %v5784_v34 = vpop.f32.mrb[36].mxu0 }
 0xa2c   :  { %v2422_v15 = vsel %vm55_vm2, %v2416_v60, 0.0  ;;  %v2408_v11 = vadd.f32 %v5784_v34, %v7807_v39  ;;  %v2386_v45 = vpop.f32.mrb[37].mxu0 }
 0xa2d   :  { %v2421_v1 = vsel %vm55_vm2, %v2415_v28, 0.0  ;;  %v2407_v44 = vadd.f32 %v2386_v45, %v7801_v33 }
 0xa2e   :  { %v2423_v14 = vadd.f32 %v2422_v15, %v2421_v1  ;;  %v2418_v25 = vadd.f32 %v2414_v48, %v2408_v11 }
 0xa2f   :  { %v2417_v2 = vadd.f32 %v2414_v48, %v2407_v44 }
 0xa30   :  { %v5787_v23 = vpop.f32.mrb[38].mxu0  ;;  %v2426_v4 = vsel %vm55_vm2, %v2418_v25, 0.0 }
 0xa31   :  { %v2424_v27 = vsel %vm55_vm2, %v2417_v2, 0.0  ;;  %v2410_v31 = vadd.f32 %v5787_v23, %v7815_v17  ;;  %v2396_v49 = vpop.f32.mrb[39].mxu0 }
 0xa32   :  { %v2425_v10 = vadd.f32 %v2424_v27, %v2423_v14  ;;  %v2409_v7 = vadd.f32 %v2396_v49, %v7809_v3 }
 0xa33   :  { %v2420_v59 = vadd.f32 %v2414_v48, %v2410_v31 }
 0xa34   :  { %v2419_v50 = vadd.f32 %v2414_v48, %v2409_v7  ;;  %v2427_v38 = vadd.f32 %v2426_v4, %v2425_v10  ;;  %v2479_v4 = vsub.s32 6, %v7078_v52 }
 0xa35   :  { %v2430_v33 = vsel %vm55_vm2, %v2420_v59, 0.0 }
 0xa36   :  { %v2428_v39 = vsel %vm55_vm2, %v2419_v50, 0.0 }
 0xa37   :  { %v2429_v32 = vadd.f32 %v2428_v39, %v2427_v38 }
 0xa39   :  { %v2431_v6 = vadd.f32 %v2430_v33, %v2429_v32 }
 0xa3b   :  { %v2432_v20 = vrot.slane %v2431_v6, 4 }
 0xa3d   :  { %v2433_v55 = vadd.f32 %v2432_v20, %v2431_v6 }
 0xa3f   :  { %v2434_v21 = vrot.slane %v2433_v55, 2 }
 0xa41   :  { %v2435_v37 = vadd.f32 %v2434_v21, %v2433_v55 }
 0xa43   :  { %v2436_v17 = vrot.slane %v2435_v37, 1 }
 0xa45   :  { %v2437_v43 = vadd.f32 %v2436_v17, %v2435_v37 }
 0xa47   :  { %v2438_v12 = vmul.f32 0.020833334, %v2437_v43 }
 0xa49   :  { %v2439_v36 = vsub.f32 %v2415_v28, %v2438_v12  ;;  %v2440_v3 = vsub.f32 %v2416_v60, %v2438_v12  ;;  %v2441_v35 = vsub.f32 %v2417_v2, %v2438_v12  ;;  %v2442_v56 = vsub.f32 %v2418_v25, %v2438_v12 }
 0xa4a   :  { %v2443_v9 = vsub.f32 %v2419_v50, %v2438_v12  ;;  %v2444_v13 = vsub.f32 %v2420_v59, %v2438_v12  ;;  %v8960_v59 = vsub.s32 7, %v7078_v52  ;;  %v2480_v50 = vrot.slane %v7770_v42, %v2479_v4 }
 0xa4b   :  { %v2445_v22 = vmul.f32 %v2439_v36, %v2439_v36  ;;  %v2446_v5 = vmul.f32 %v2440_v3, %v2440_v3  ;;  %v2447_v58 = vmul.f32 %v2441_v35, %v2441_v35  ;;  %v2448_v48 = vmul.f32 %v2442_v56, %v2442_v56 }
 0xa4c   :  { %v2449_v26 = vmul.f32 %v2443_v9, %v2443_v9  ;;  %v2450_v14 = vmul.f32 %v2444_v13, %v2444_v13  ;;  %v2490_v39 = vrot.slane %v7770_v42, %v8960_v59 }
 0xa4d   :  { %v2451_v16 = vsel %vm55_vm2, %v2445_v22, 0.0  ;;  %v2452_v19 = vsel %vm55_vm2, %v2446_v5, 0.0  ;;  %v2454_v15 = vsel %vm55_vm2, %v2447_v58, 0.0  ;;  %v2456_v60 = vsel %vm55_vm2, %v2448_v48, 0.0  ;;  %v2517_v5 = vld [vmem:[%s8926_s2 + $0x10] sm:$0xff]  ;;  %v2518_v48 = vld [vmem:[%s8926_s2 + $0x18] sm:$0xff] }
 0xa4e   :  { %v2453_v41 = vadd.f32 %v2452_v19, %v2451_v16  ;;  %v2458_v34 = vsel %vm55_vm2, %v2449_v26, 0.0  ;;  %v2460_v45 = vsel %vm55_vm2, %v2450_v14, 0.0  ;;  %v2522_v58 = vrot.slane %v2517_v5, %v7085_v57 }
 0xa4f   :  { %v2526_v26 = vrot.slane %v2518_v48, %v7085_v57 }
 0xa50   :  { %v2455_v1 = vadd.f32 %v2454_v15, %v2453_v41 }
 0xa52   :  { %v2457_v28 = vadd.f32 %v2456_v60, %v2455_v1 }
 0xa54   :  { %v2459_v11 = vadd.f32 %v2458_v34, %v2457_v28 }
 0xa56   :  { %v2461_v44 = vadd.f32 %v2460_v45, %v2459_v11 }
 0xa58   :  { %v2462_v25 = vrot.slane %v2461_v44, 4 }
 0xa5a   :  { %v2463_v2 = vadd.f32 %v2462_v25, %v2461_v44 }
 0xa5c   :  { %v2464_v23 = vrot.slane %v2463_v2, 2 }
 0xa5e   :  { %v2465_v27 = vadd.f32 %v2464_v23, %v2463_v2 }
 0xa60   :  { %v2466_v31 = vrot.slane %v2465_v27, 1 }
 0xa62   :  { %v2467_v49 = vadd.f32 %v2466_v31, %v2465_v27 }
 0xa64   :  { %v2468_v10 = vmul.f32 0.020833334, %v2467_v49 }
 0xa66   :  { %v2469_v7 = vadd.f32 1e-05, %v2468_v10 }
 0xa68   :  { %6794 = vrsqrt.f32 %v2469_v7 }
 0xa72   :  { %v6795_v38 = vpop.eup %6794 }
 0xa73   :  { %v2475_v32 = vmul.f32 %v6795_v38, %v2443_v9  ;;  %v2471_v33 = vmul.f32 %v6795_v38, %v2439_v36  ;;  %v2472_v6 = vmul.f32 %v6795_v38, %v2440_v3  ;;  %v2473_v20 = vmul.f32 %v6795_v38, %v2441_v35 }
 0xa74   :  { %v2474_v55 = vmul.f32 %v6795_v38, %v2442_v56  ;;  %v2476_v21 = vmul.f32 %v6795_v38, %v2444_v13 }
 0xa75   :  { %v2481_v37 = vmul.f32 %v2480_v50, %v2471_v33  ;;  %v2482_v43 = vmul.f32 %v2480_v50, %v2472_v6  ;;  %v2483_v22 = vmul.f32 %v2480_v50, %v2473_v20  ;;  %v2485_v3 = vmul.f32 %v2480_v50, %v2475_v32 }
 0xa76   :  { %v2484_v36 = vmul.f32 %v2480_v50, %v2474_v55  ;;  %v2486_v9 = vmul.f32 %v2480_v50, %v2476_v21 }
 0xa77   :  { %v7994_v17 = vadd.f32 %v2490_v39, %v2481_v37  ;;  %v7999_v12 = vadd.f32 %v2490_v39, %v2482_v43  ;;  %v8004_v42 = vadd.f32 %v2490_v39, %v2483_v22  ;;  %v8014_v56 = vadd.f32 %v2490_v39, %v2485_v3 }
 0xa78   :  { %v8009_v35 = vadd.f32 %v2490_v39, %v2484_v36  ;;  %v8019_v13 = vadd.f32 %v2490_v39, %v2486_v9 }
 0xa79   :  { %5183 = vmatmul.mubr.msk.f32.vlgmr.msra.gmra.mrb[22].mxu1 %vm55_vm2, %v7994_v17 }
 0xa7a   :  { %2615 = vmatprep.mubr.f32.mxu1 %v9000_v18 }
 0xa7d   :  { %5184 = vmatmul.mubr.msk.f32.gmra.mrb[24].mxu1 %vm55_vm2, %v7999_v12 }
 0xa7e   :  { %2621 = vmatprep.mubr.f32.mxu1 %v9000_v18 }
 0xa81   :  { %5185 = vmatmul.mubr.msk.f32.gmra.mrb[26].mxu1 %vm55_vm2, %v8004_v42 }
 0xa82   :  { %2627 = vmatprep.mubr.f32.mxu1 %v9000_v18 }
 0xa85   :  { %5186 = vmatmul.mubr.msk.f32.gmra.mrb[28].mxu1 %vm55_vm2, %v8009_v35 }
 0xa86   :  { %2633 = vmatprep.mubr.f32.mxu1 %v9000_v18 }
 0xa89   :  { %5187 = vmatmul.mubr.msk.f32.gmra.mrb[30].mxu1 %vm55_vm2, %v8014_v56 }
 0xa8a   :  { %2639 = vmatprep.mubr.f32.mxu1 %v9000_v18 }
 0xa8d   :  { %5188 = vmatmul.mubr.msk.f32.gmra.mrb[32].mxu1 %vm55_vm2, %v8019_v13 }
 0xb4c   :  { %v2611_v16 = vpop.f32.mrb[22].mxu1 }
 0xb4d   :  { %v2612_v19 = vadd.f32 %v2611_v16, %v2522_v58  ;;  %v2613_v41 = vpop.f32.mrb[23].mxu1 }
 0xb4e   :  { %v8034_v60 = vadd.f32 %v2613_v41, %v2526_v26 }
 0xb4f   :  { %5800 = vmatprep.mubr.msk.f32.mxu0 %vm63_vm3, %v2612_v19 }
 0xb50   :  { %v2617_v15 = vpop.f32.mrb[24].mxu1 }
 0xb51   :  { %v8032_v1 = vadd.f32 %v2617_v15, %v2522_v58  ;;  %v2619_v14 = vpop.f32.mrb[25].mxu1 }
 0xb52   :  { %v8036_v28 = vadd.f32 %v2619_v14, %v2526_v26 }
 0xb53   :  { %v6564_v34 = vpack.i.bf16 %v8032_v1, %v2612_v19 }
 0xb54   :  { %v6654_v11 = vpack.i.bf16 %v8036_v28, %v8034_v60  ;;  %v8043_v45 = vpack.c.bf16 %v8036_v28, %v8034_v60  ;;  %v2623_v57 = vpop.f32.mrb[26].mxu1 }
 0xb55   :  { %v2625_v44 = vpop.f32.mrb[27].mxu1  ;;  %6565 = vrot.lane.b32.xlu1 %v6564_v34, %s6960_s24  ;;  %v8046_v2 = vadd.f32 %v2623_v57, %v2522_v58 }
 0xb56   :  { %v8050_v31 = vadd.f32 %v2625_v44, %v2526_v26 }
 0xb58   :  { %v2629_v25 = vpop.f32.mrb[28].mxu1 }
 0xb59   :  { %v8048_v23 = vadd.f32 %v2629_v25, %v2522_v58  ;;  %v2631_v27 = vpop.f32.mrb[29].mxu1 }
 0xb5a   :  { %v8052_v49 = vadd.f32 %v2631_v27, %v2526_v26 }
 0xb5b   :  { %v8056_v10 = vpack.i.bf16 %v8048_v23, %v8046_v2 }
 0xb5c   :  { %v6659_v7 = vpack.i.bf16 %v8052_v49, %v8050_v31  ;;  %v8062_v50 = vpack.c.bf16 %v8052_v49, %v8050_v31  ;;  %v2635_v38 = vpop.f32.mrb[30].mxu1 }
 0xb5d   :  { %v2637_v39 = vpop.f32.mrb[31].mxu1  ;;  %6570 = vrot.lane.b32.xlu0 %v8056_v10, %s6960_s24  ;;  %v8066_v33 = vadd.f32 %v2635_v38, %v2522_v58 }
 0xb5e   :  { %v8071_v55 = vadd.f32 %v2637_v39, %v2526_v26 }
 0xb60   :  { %v2641_v32 = vpop.f32.mrb[32].mxu1 }
 0xb61   :  { %v8068_v6 = vadd.f32 %v2641_v32, %v2522_v58  ;;  %v2643_v20 = vpop.f32.mrb[33].mxu1  ;;  %6580 = vrot.lane.b32.xlu0 %v6564_v34, %s6959_s23 }
 0xb62   :  { %v8073_v21 = vadd.f32 %v2643_v20, %v2526_v26 }
 0xb63   :  { %v8077_v37 = vpack.i.bf16 %v8068_v6, %v8066_v33 }
 0xb64   :  { %v6664_v43 = vpack.i.bf16 %v8073_v21, %v8071_v55  ;;  %v8083_v22 = vpack.c.bf16 %v8073_v21, %v8071_v55 }
 0xb65   :  { %2855 = vrot.lane.b32.xlu0 %v2612_v19, %s6961_s7  ;;  %6575 = vrot.lane.b32.xlu1 %v8077_v37, %s6960_s24 }
 0xb69   :  { %6590 = vrot.lane.b32.xlu0 %v8056_v10, %s6959_s23  ;;  %6585 = vrot.lane.b32.xlu1 %v6564_v34, %s6962_s8 }
 0xb6d   :  { %2859 = vrot.lane.b32.xlu0 %v8046_v2, %s6961_s7  ;;  %2857 = vrot.lane.b32.xlu1 %v8032_v1, %s6961_s7 }
 0xb71   :  { %6600 = vrot.lane.b32.xlu0 %v8077_v37, %s6959_s23  ;;  %6595 = vrot.lane.b32.xlu1 %v8056_v10, %s6962_s8 }
 0xb75   :  { %2863 = vrot.lane.b32.xlu0 %v8066_v33, %s6961_s7  ;;  %6605 = vrot.lane.b32.xlu1 %v8077_v37, %s6962_s8 }
 0xb79   :  { %6610 = vrot.lane.b32.xlu0 %v6564_v34, %s6963_s9  ;;  %2861 = vrot.lane.b32.xlu1 %v8048_v23, %s6961_s7 }
 0xb7d   :  { %3334 = vrot.lane.b32.xlu0 %v8032_v1, %s6958_s20  ;;  %2865 = vrot.lane.b32.xlu1 %v8068_v6, %s6961_s7 }
 0xb81   :  { %6620 = vrot.lane.b32.xlu0 %v8077_v37, %s6963_s9  ;;  %3332 = vrot.lane.b32.xlu1 %v2612_v19, %s6958_s20 }
 0xb85   :  { %3338 = vrot.lane.b32.xlu0 %v8048_v23, %s6958_s20  ;;  %6615 = vrot.lane.b32.xlu1 %v8056_v10, %s6963_s9 }
 0xb89   :  { %3342 = vrot.lane.b32.xlu0 %v8068_v6, %s6958_s20  ;;  %3336 = vrot.lane.b32.xlu1 %v8046_v2, %s6958_s20 }
 0xb8d   :  { %3668 = vrot.lane.b32.xlu0 %v8032_v1, %s6953_s17  ;;  %3340 = vrot.lane.b32.xlu1 %v8066_v33, %s6958_s20 }
 0xb91   :  { %3672 = vrot.lane.b32.xlu0 %v8048_v23, %s6953_s17  ;;  %3666 = vrot.lane.b32.xlu1 %v2612_v19, %s6953_s17 }
 0xb95   :  { %3676 = vrot.lane.b32.xlu0 %v8068_v6, %s6953_s17  ;;  %3670 = vrot.lane.b32.xlu1 %v8046_v2, %s6953_s17 }
 0xb99   :  { %6625 = vrot.lane.b32.xlu0 %v6564_v34, %s6964_s10  ;;  %3674 = vrot.lane.b32.xlu1 %v8066_v33, %s6953_s17 }
 0xb9d   :  { %6640 = vrot.lane.b32.xlu0 %v8077_v37, %s6964_s10  ;;  %6630 = vrot.lane.b32.xlu1 %v8056_v10, %s6964_s10 }
 0xba1   :  { %6635 = vrot.lane.b32.xlu1 %v6564_v34, %s6965_s11 }
 0xbc7   :  { %v6566_v36 = vpop.permute.xlu1 %6565 }
 0xbc8   :  { %v6568_v3 = vunpack.i.h.bf16 %v6566_v36  ;;  %v6567_v9 = vunpack.i.l.bf16 %v6566_v36 }
 0xbca   :  { %v6242_v5 = vpack.c.bf16 %v6568_v3, %v6567_v9 }
 0xbcc   :  { %6244 = vmatprep.subr.msk.bf16.mxu1 %vm7131_vm4, %v6242_v5 }
 0xbcd   :  { %6247 = vmatpush3.bf16.xpose.msk.msra.mxu1 %vm7131_vm4, %v6242_v5 }
 0xbcf   :  { %v6571_v58 = vpop.permute.xlu0 %6570 }
 0xbd0   :  { %v6573_v48 = vunpack.i.h.bf16 %v6571_v58  ;;  %v6572_v16 = vunpack.i.l.bf16 %v6571_v58 }
 0xbd2   :  { %v6248_v19 = vpack.c.bf16 %v6573_v48, %v6572_v16 }
 0xbd3   :  { %v6581_v41 = vpop.permute.xlu0 %6580 }
 0xbd4   :  { %v6583_v26 = vunpack.i.h.bf16 %v6581_v41  ;;  %v6582_v15 = vunpack.i.l.bf16 %v6581_v41  ;;  %6250 = vmatprep.subr.msk.bf16.mxu1 %vm7131_vm4, %v6248_v19 }
 0xbd5   :  { %6253 = vmatpush3.bf16.xpose.msk.msra.mxu1 %vm7131_vm4, %v6248_v19 }
 0xbd6   :  { %v6224_v14 = vpack.c.bf16 %v6583_v26, %v6582_v15 }
 0xbd7   :  { %v2856_v34 = vpop.permute.xlu0 %2855  ;;  %v6576_v57 = vpop.permute.xlu1 %6575 }
 0xbd8   :  { %v6578_v44 = vunpack.i.h.bf16 %v6576_v57  ;;  %v6577_v25 = vunpack.i.l.bf16 %v6576_v57  ;;  %6226 = vmatprep.subr.msk.bf16.mxu0 %vm7131_vm4, %v6224_v14  ;;  %5821 = vmatprep.mubr.msk.f32.mxu1 %vm63_vm3, %v2856_v34 }
 0xbd9   :  { %6229 = vmatpush3.bf16.xpose.msk.msra.mxu0 %vm7131_vm4, %v6224_v14 }
 0xbda   :  { %v6254_v27 = vpack.c.bf16 %v6578_v44, %v6577_v25 }
 0xbdb   :  { %v6591_v38 = vpop.permute.xlu0 %6590  ;;  %v6586_v39 = vpop.permute.xlu1 %6585 }
 0xbdc   :  { %v6593_v32 = vunpack.i.h.bf16 %v6591_v38  ;;  %v6592_v20 = vunpack.i.l.bf16 %v6591_v38  ;;  %v6588_v36 = vunpack.i.h.bf16 %v6586_v39  ;;  %v6587_v3 = vunpack.i.l.bf16 %v6586_v39  ;;  %6256 = vmatprep.subr.msk.bf16.mxu1 %vm7131_vm4, %v6254_v27 }
 0xbdd   :  { %6259 = vmatpush3.bf16.xpose.msk.msra.mxu1 %vm7131_vm4, %v6254_v27 }
 0xbde   :  { %v6230_v9 = vpack.c.bf16 %v6593_v32, %v6592_v20  ;;  %v6284_v5 = vpack.c.bf16 %v6588_v36, %v6587_v3 }
 0xbdf   :  { %v2860_v58 = vpop.permute.xlu0 %2859  ;;  %v2858_v48 = vpop.permute.xlu1 %2857 }
 0xbe0   :  { %6232 = vmatprep.subr.msk.bf16.mxu0 %vm7131_vm4, %v6230_v9  ;;  %6286 = vmatprep.subr.msk.bf16.mxu1 %vm7131_vm4, %v6284_v5 }
 0xbe1   :  { %6235 = vmatpush3.bf16.xpose.msk.msra.mxu0 %vm7131_vm4, %v6230_v9 }
 0xbe3   :  { %v6601_v16 = vpop.permute.xlu0 %6600  ;;  %v6596_v19 = vpop.permute.xlu1 %6595 }
 0xbe4   :  { %v6603_v41 = vunpack.i.h.bf16 %v6601_v16  ;;  %v6602_v26 = vunpack.i.l.bf16 %v6601_v16  ;;  %v6598_v15 = vunpack.i.h.bf16 %v6596_v19  ;;  %v6597_v14 = vunpack.i.l.bf16 %v6596_v19  ;;  %5822 = vmatmul.mubr.msk.f32.vlgmr.msra.gmra.mrb[34].mxu1 %vm63_vm3, %v2858_v48 }
 0xbe5   :  { %5824 = vmatprep.mubr.msk.f32.mxu1 %vm63_vm3, %v2860_v58  ;;  %6289 = vmatpush3.bf16.xpose.msk.msra.mxu1 %vm7131_vm4, %v6284_v5 }
 0xbe6   :  { %v6236_v34 = vpack.c.bf16 %v6603_v41, %v6602_v26  ;;  %v6290_v57 = vpack.c.bf16 %v6598_v15, %v6597_v14 }
 0xbe7   :  { %v2864_v44 = vpop.permute.xlu0 %2863  ;;  %v6606_v25 = vpop.permute.xlu1 %6605 }
 0xbe8   :  { %v6608_v27 = vunpack.i.h.bf16 %v6606_v25  ;;  %v6607_v38 = vunpack.i.l.bf16 %v6606_v25  ;;  %6238 = vmatprep.subr.msk.bf16.mxu0 %vm7131_vm4, %v6236_v34  ;;  %6292 = vmatprep.subr.msk.bf16.mxu1 %vm7131_vm4, %v6290_v57 }
 0xbe9   :  { %6241 = vmatpush3.bf16.xpose.msk.msra.mxu0 %vm7131_vm4, %v6236_v34 }
 0xbea   :  { %v6296_v20 = vpack.c.bf16 %v6608_v27, %v6607_v38 }
 0xbeb   :  { %v6611_v39 = vpop.permute.xlu0 %6610  ;;  %v2862_v32 = vpop.permute.xlu1 %2861 }
 0xbec   :  { %5825 = vmatmul.mubr.msk.f32.gmra.mrb[36].mxu1 %vm63_vm3, %v2862_v32  ;;  %v6613_v9 = vunpack.i.h.bf16 %v6611_v39  ;;  %v6612_v5 = vunpack.i.l.bf16 %v6611_v39 }
 0xbed   :  { %5827 = vmatprep.mubr.msk.f32.mxu1 %vm63_vm3, %v2864_v44  ;;  %6295 = vmatpush3.bf16.xpose.msk.msra.mxu1 %vm7131_vm4, %v6290_v57 }
 0xbee   :  { %6298 = vmatprep.subr.msk.bf16.mxu1 %vm7131_vm4, %v6296_v20  ;;  %v6314_v16 = vpack.c.bf16 %v6613_v9, %v6612_v5 }
 0xbef   :  { %v3335_v36 = vpop.permute.xlu0 %3334  ;;  %v2866_v3 = vpop.permute.xlu1 %2865 }
 0xbf0   :  { %5801 = vmatmul.mubr.msk.f32.vlgmr.msra.gmra.mrb[40].mxu0 %vm63_vm3, %v8032_v1  ;;  %5828 = vmatmul.mubr.msk.f32.gmra.mrb[38].mxu1 %vm63_vm3, %v2866_v3 }
 0xbf1   :  { %5803 = vmatprep.mubr.msk.f32.mxu0 %vm63_vm3, %v8046_v2 }
 0xbf3   :  { %v6621_v58 = vpop.permute.xlu0 %6620  ;;  %v3333_v48 = vpop.permute.xlu1 %3332 }
 0xbf4   :  { %5804 = vmatmul.mubr.msk.f32.gmra.mrb[42].mxu0 %vm63_vm3, %v8048_v23  ;;  %5884 = vmatprep.mubr.msk.f32.mxu1 %vm63_vm3, %v3333_v48  ;;  %v6623_v34 = vunpack.i.h.bf16 %v6621_v58  ;;  %v6622_v57 = vunpack.i.l.bf16 %v6621_v58 }
 0xbf5   :  { %5806 = vmatprep.mubr.msk.f32.mxu0 %vm63_vm3, %v8066_v33  ;;  %6301 = vmatpush3.bf16.xpose.msk.msra.mxu1 %vm7131_vm4, %v6296_v20 }
 0xbf6   :  { %6316 = vmatprep.subr.msk.bf16.mxu1 %vm7131_vm4, %v6314_v16  ;;  %v6326_v25 = vpack.c.bf16 %v6623_v34, %v6622_v57 }
 0xbf7   :  { %v3339_v1 = vpop.permute.xlu0 %3338  ;;  %v6616_v19 = vpop.permute.xlu1 %6615 }
 0xbf8   :  { %v6618_v2 = vunpack.i.h.bf16 %v6616_v19  ;;  %v6617_v41 = vunpack.i.l.bf16 %v6616_v19  ;;  %5807 = vmatmul.mubr.msk.f32.gmra.mrb[44].mxu0 %vm63_vm3, %v8068_v6 }
 0xbfa   :  { %v6320_v15 = vpack.c.bf16 %v6618_v2, %v6617_v41 }
 0xbfb   :  { %v3343_v26 = vpop.permute.xlu0 %3342  ;;  %v3337_v23 = vpop.permute.xlu1 %3336 }
 0xbfc   :  { %5885 = vmatmul.mubr.msk.f32.vlgmr.msra.gmra.mrb[40].mxu1 %vm63_vm3, %v3335_v36 }
 0xbfd   :  { %5887 = vmatprep.mubr.msk.f32.mxu1 %vm63_vm3, %v3337_v23  ;;  %6319 = vmatpush3.bf16.xpose.msk.msra.mxu1 %vm7131_vm4, %v6314_v16 }
 0xbfe   :  { %6322 = vmatprep.subr.msk.bf16.mxu1 %vm7131_vm4, %v6320_v15 }
 0xbff   :  { %v3669_v33 = vpop.permute.xlu0 %3668  ;;  %v3341_v14 = vpop.permute.xlu1 %3340 }
 0xc00   :  { %5888 = vmatmul.mubr.msk.f32.gmra.mrb[42].mxu1 %vm63_vm3, %v3339_v1 }
 0xc01   :  { %5890 = vmatprep.mubr.msk.f32.mxu1 %vm63_vm3, %v3341_v14 }
 0xc03   :  { %v3673_v6 = vpop.permute.xlu0 %3672  ;;  %v3667_v44 = vpop.permute.xlu1 %3666 }
 0xc04   :  { %5891 = vmatmul.mubr.msk.f32.gmra.mrb[44].mxu1 %vm63_vm3, %v3343_v26 }
 0xc05   :  { %6325 = vmatpush3.bf16.xpose.msk.msra.mxu1 %vm7131_vm4, %v6320_v15  ;;  %5926 = vmatprep.mubr.msk.f32.mxu1 %vm63_vm3, %v3667_v44 }
 0xc06   :  { %6328 = vmatprep.subr.msk.bf16.mxu1 %vm7131_vm4, %v6326_v25 }
 0xc07   :  { %v3677_v27 = vpop.permute.xlu0 %3676  ;;  %v3671_v38 = vpop.permute.xlu1 %3670 }
 0xc0b   :  { %v6626_v39 = vpop.permute.xlu0 %6625  ;;  %v3675_v32 = vpop.permute.xlu1 %3674 }
 0xc0c   :  { %v6628_v20 = vunpack.i.h.bf16 %v6626_v39  ;;  %v6627_v36 = vunpack.i.l.bf16 %v6626_v39 }
 0xc0d   :  { %6331 = vmatpush3.bf16.xpose.msk.msra.mxu1 %vm7131_vm4, %v6326_v25 }
 0xc0e   :  { %v6260_v3 = vpack.c.bf16 %v6628_v20, %v6627_v36 }
 0xc0f   :  { %v6641_v9 = vpop.permute.xlu0 %6640  ;;  %v6631_v5 = vpop.permute.xlu1 %6630 }
 0xc10   :  { %v6643_v58 = vunpack.i.h.bf16 %v6641_v9  ;;  %v6642_v48 = vunpack.i.l.bf16 %v6641_v9  ;;  %v6633_v16 = vunpack.i.h.bf16 %v6631_v5  ;;  %v6632_v1 = vunpack.i.l.bf16 %v6631_v5  ;;  %6261 = vmatprep.subr.bf16.mxu0 %v6260_v3 }
 0xc11   :  { %6263 = vmatpush3.bf16.msra.mxu0 %v6260_v3 }
 0xc12   :  { %v6264_v19 = vpack.c.bf16 %v6633_v16, %v6632_v1  ;;  %v6268_v41 = vpack.c.bf16 %v6643_v58, %v6642_v48  ;;  %v9002_v1 = vld [vmem:[#allocation10_spill] sm:$0xff] }
 0xc13   :  { %v6636_v2 = vpop.permute.xlu1 %6635 }
 0xc14   :  { %v6638_v26 = vunpack.i.h.bf16 %v6636_v2  ;;  %v6637_v23 = vunpack.i.l.bf16 %v6636_v2  ;;  %6265 = vmatprep.subr.bf16.mxu0 %v6264_v19  ;;  %5927 = vmatmul.mubr.msk.f32.vlgmr.msra.gmra.mrb[46].mxu1 %vm63_vm3, %v3669_v33 }
 0xc15   :  { %6267 = vmatpush3.bf16.msra.mxu0 %v6264_v19  ;;  %5929 = vmatprep.mubr.msk.f32.mxu1 %vm63_vm3, %v3671_v38 }
 0xc16   :  { %6269 = vmatprep.subr.bf16.mxu0 %v6268_v41  ;;  %v8213_v24 = vpack.c.bf16 %v6638_v26, %v6637_v23 }
 0xc18   :  { %5930 = vmatmul.mubr.msk.f32.gmra.mrb[48].mxu1 %vm63_vm3, %v3673_v6 }
 0xc19   :  { %6271 = vmatpush3.bf16.msra.mxu0 %v6268_v41  ;;  %5932 = vmatprep.mubr.msk.f32.mxu1 %vm63_vm3, %v3675_v32 }
 0xc1a   :  { %6273 = vmatprep.subr.bf16.mxu0 %v8213_v24 }
 0xc1c   :  { %5933 = vmatmul.mubr.msk.f32.gmra.mrb[50].mxu1 %vm63_vm3, %v3677_v27 }
 0xcb7   :  { %v5823_v15 = vpop.f32.mrb[34].mxu1 }
 0xcb8   :  { %v2975_v14 = vadd.f32 %v5823_v15, %v7318_v53  ;;  %v2969_v34 = vpop.f32.mrb[35].mxu1 }
 0xcb9   :  { %v2970_v33 = vadd.f32 %v2969_v34, %v7320_v54 }
 0xcba   :  { %v8223_v57 = vsel %vm7314_vm5, %v2975_v14, -1e+30 }
 0xcbb   :  { %v3007_v6 = vsel %vm689_vm6, %v8223_v57, -inf }
 0xcbc   :  { %3008 = vmax.xlane.f32.xlu0 %v3007_v6  ;;  %v9005_v6 = vld [vmem:[#allocation14_spill] sm:$0xff] }
 0xcbf   :  { %v5826_v44 = vpop.f32.mrb[36].mxu1 }
 0xcc0   :  { %v2985_v25 = vadd.f32 %v5826_v44, %v7329_v47  ;;  %v2979_v38 = vpop.f32.mrb[37].mxu1 }
 0xcc1   :  { %v2980_v27 = vadd.f32 %v2979_v38, %v7333_v29 }
 0xcc2   :  { %v8259_v23 = vsel %vm7370_vm8, %v2985_v25, -1e+30 }
 0xcc3   :  { %v5802_v39 = vpop.f32.mrb[40].mxu0  ;;  %v5829_v32 = vpop.f32.mrb[38].mxu1  ;;  %v8252_v16 = vsel %vm7376_vm9, %v2980_v27, -1e+30  ;;  %v3013_v27 = vsel %vm689_vm6, %v8259_v23, -inf }
 0xcc4   :  { %v2760_v53 = vadd.f32 %v5802_v39, %v7337_v30  ;;  %v2995_v54 = vadd.f32 %v5829_v32, %v7339_v61  ;;  %v2754_v20 = vpop.f32.mrb[41].mxu0  ;;  %v2989_v36 = vpop.f32.mrb[39].mxu1  ;;  %v8245_v61 = vsel %vm7341_vm7, %v2970_v33, -1e+30  ;;  %v3010_v34 = vsel %vm689_vm6, %v8252_v16, -inf  ;;  %v9006_v39 = vld [vmem:[#allocation15_spill] sm:$0xff] }
 0xcc5   :  { %v2755_v3 = vadd.f32 %v2754_v20, %v7345_v63  ;;  %v2990_v9 = vadd.f32 %v2989_v36, %v7347_v0  ;;  %v3004_v41 = vsel %vm689_vm6, %v8245_v61, -inf }
 0xcc6   :  { %v8235_v5 = vsel %vm7314_vm5, %v2760_v53, -1e+30 }
 0xcc7   :  { %v8239_v47 = vsel %vm7341_vm7, %v2755_v3, -1e+30  ;;  %v5805_v29 = vpop.f32.mrb[42].mxu0  ;;  %v2792_v30 = vsel %vm689_vm6, %v8235_v5, -inf  ;;  %v8280_v3 = vsel %vm7380_vm10, %v2990_v9, -1e+30 }
 0xcc8   :  { %v2770_v63 = vadd.f32 %v5805_v29, %v7368_v8  ;;  %2793 = vmax.xlane.f32.xlu1 %v2792_v30  ;;  %v2764_v0 = vpop.f32.mrb[43].mxu0  ;;  %v2789_v58 = vsel %vm689_vm6, %v8239_v47, -inf  ;;  %v9004_v8 = vld [vmem:[#allocation13_spill] sm:$0xff]  ;;  %v9008_v29 = vld [vmem:[#allocation16_spill] sm:$0xff] }
 0xcc9   :  { %v2765_v19 = vadd.f32 %v2764_v0, %v9002_v1  ;;  %2790 = vmax.xlane.f32.xlu0 %v2789_v58  ;;  %v8287_v1 = vsel %vm7442_vm11, %v2995_v54, -1e+30 }
 0xcca   :  { %v8273_v25 = vsel %vm7370_vm8, %v2770_v63, -1e+30 }
 0xccb   :  { %v5808_v2 = vpop.f32.mrb[44].mxu0  ;;  %v8266_v33 = vsel %vm7376_vm9, %v2765_v19, -1e+30  ;;  %v2798_v58 = vsel %vm689_vm6, %v8273_v25, -inf  ;;  %v9010_v19 = vld [vmem:[#allocation17_spill] sm:$0xff] }
 0xccc   :  { %v2780_v15 = vadd.f32 %v5808_v2, %v9004_v8  ;;  %3005 = vmax.xlane.f32.xlu1 %v3004_v41  ;;  %v2774_v14 = vpop.f32.mrb[45].mxu0  ;;  %v2795_v20 = vsel %vm689_vm6, %v8266_v33, -inf  ;;  %v3016_v8 = vsel %vm689_vm6, %v8280_v3, -inf }
 0xccd   :  { %v2775_v44 = vadd.f32 %v2774_v14, %v9005_v6  ;;  %3011 = vmax.xlane.f32.xlu0 %v3010_v34  ;;  %v9011_v14 = vld [vmem:[#allocation19_spill] sm:$0xff] }
 0xcce   :  { %v8301_v54 = vsel %vm7442_vm11, %v2780_v15, -1e+30 }
 0xccf   :  { %v5886_v38 = vpop.f32.mrb[40].mxu1  ;;  %v8294_v9 = vsel %vm7380_vm10, %v2775_v44, -1e+30 }
 0xcd0   :  { %v3452_v32 = vadd.f32 %v5886_v38, %v9006_v39  ;;  %v3446_v53 = vpop.f32.mrb[41].mxu1  ;;  %3014 = vmax.xlane.f32.xlu1 %v3013_v27  ;;  %v3019_v38 = vsel %vm689_vm6, %v8287_v1, -inf  ;;  %v9012_v27 = vld [vmem:[#allocation20_spill] sm:$0xff] }
 0xcd1   :  { %v3447_v30 = vadd.f32 %v3446_v53, %v9008_v29  ;;  %2796 = vmax.xlane.f32.xlu0 %v2795_v20  ;;  %v2801_v20 = vsel %vm689_vm6, %v8294_v9, -inf  ;;  %v9013_v29 = vld [vmem:[#allocation21_spill] sm:$0xff] }
 0xcd2   :  { %v8315_v15 = vsel %vm7314_vm5, %v3452_v32, -1e+30 }
 0xcd3   :  { %v5889_v0 = vpop.f32.mrb[42].mxu1  ;;  %v8308_v44 = vsel %vm7341_vm7, %v3447_v30, -1e+30  ;;  %v3484_v30 = vsel %vm689_vm6, %v8315_v15, -inf }
 0xcd4   :  { %v3462_v2 = vadd.f32 %v5889_v0, %v9010_v19  ;;  %v3456_v41 = vpop.f32.mrb[43].mxu1  ;;  %2799 = vmax.xlane.f32.xlu1 %v2798_v58  ;;  %v2804_v58 = vsel %vm689_vm6, %v8301_v54, -inf  ;;  %v3481_v19 = vsel %vm689_vm6, %v8308_v44, -inf }
 0xcd5   :  { %v3457_v34 = vadd.f32 %v3456_v41, %v9011_v14  ;;  %3017 = vmax.xlane.f32.xlu0 %v3016_v8 }
 0xcd6   :  { %v8327_v8 = vsel %vm7370_vm8, %v3462_v2, -1e+30 }
 0xcd7   :  { %v5892_v6 = vpop.f32.mrb[44].mxu1  ;;  %v8321_v41 = vsel %vm7376_vm9, %v3457_v34, -1e+30  ;;  %v3490_v34 = vsel %vm689_vm6, %v8327_v8, -inf }
 0xcd8   :  { %v3472_v39 = vadd.f32 %v5892_v6, %v9012_v27  ;;  %v3466_v53 = vpop.f32.mrb[45].mxu1  ;;  %3020 = vmax.xlane.f32.xlu1 %v3019_v38  ;;  %v3487_v32 = vsel %vm689_vm6, %v8321_v41, -inf }
 0xcd9   :  { %v3467_v0 = vadd.f32 %v3466_v53, %v9013_v29  ;;  %2802 = vmax.xlane.f32.xlu0 %v2801_v20  ;;  %v9014_v53 = vld [vmem:[#allocation22_spill] sm:$0xff] }
 0xcda   :  { %v8339_v6 = vsel %vm7442_vm11, %v3472_v39, -1e+30 }
 0xcdb   :  { %v8333_v14 = vsel %vm7380_vm10, %v3467_v0, -1e+30  ;;  %v3496_v27 = vsel %vm689_vm6, %v8339_v6, -inf  ;;  %v9015_v0 = vld [vmem:[#allocation23_spill] sm:$0xff] }
 0xcdc   :  { %2805 = vmax.xlane.f32.xlu1 %v2804_v58  ;;  %v3493_v2 = vsel %vm689_vm6, %v8333_v14, -inf }
 0xcdd   :  { %3482 = vmax.xlane.f32.xlu0 %v3481_v19 }
 0xce0   :  { %3485 = vmax.xlane.f32.xlu1 %v3484_v30 }
 0xce1   :  { %3488 = vmax.xlane.f32.xlu0 %v3487_v32 }
 0xce4   :  { %3491 = vmax.xlane.f32.xlu1 %v3490_v34  ;;  %v9016_v34 = vld [vmem:[#allocation24_spill] sm:$0xff] }
 0xce5   :  { %3494 = vmax.xlane.f32.xlu0 %v3493_v2 }
 0xce7   :  { %v5928_v38 = vpop.f32.mrb[46].mxu1 }
 0xce8   :  { %v3786_v20 = vadd.f32 %v5928_v38, %v9014_v53  ;;  %v3780_v29 = vpop.f32.mrb[47].mxu1  ;;  %3497 = vmax.xlane.f32.xlu1 %v3496_v27  ;;  %v9017_v27 = vld [vmem:[#allocation25_spill] sm:$0xff] }
 0xce9   :  { %v3781_v58 = vadd.f32 %v3780_v29, %v9015_v0  ;;  %v9018_v0 = vld [vmem:[#allocation26_spill] sm:$0xff] }
 0xcea   :  { %v8349_v19 = vsel %vm7314_vm5, %v3786_v20, -1e+30 }
 0xceb   :  { %v8353_v39 = vsel %vm7341_vm7, %v3781_v58, -1e+30  ;;  %v5931_v30 = vpop.f32.mrb[48].mxu1  ;;  %v3818_v32 = vsel %vm689_vm6, %v8349_v19, -inf }
 0xcec   :  { %v3796_v2 = vadd.f32 %v5931_v30, %v9016_v34  ;;  %v3790_v59 = vpop.f32.mrb[49].mxu1  ;;  %3819 = vmax.xlane.f32.xlu1 %v3818_v32  ;;  %v3815_v38 = vsel %vm689_vm6, %v8353_v39, -inf  ;;  %v9019_v32 = vld [vmem:[#allocation27_spill] sm:$0xff] }
 0xced   :  { %v3791_v53 = vadd.f32 %v3790_v59, %v9017_v27  ;;  %3816 = vmax.xlane.f32.xlu0 %v3815_v38 }
 0xcee   :  { %v8363_v51 = vsel %vm7370_vm8, %v3796_v2, -1e+30 }
 0xcef   :  { %v8367_v40 = vsel %vm7376_vm9, %v3791_v53, -1e+30  ;;  %v5934_v20 = vpop.f32.mrb[50].mxu1  ;;  %v3824_v29 = vsel %vm689_vm6, %v8363_v51, -inf }
 0xcf0   :  { %v3806_v58 = vadd.f32 %v5934_v20, %v9018_v0  ;;  %v3800_v30 = vpop.f32.mrb[51].mxu1  ;;  %3825 = vmax.xlane.f32.xlu1 %v3824_v29  ;;  %v3821_v59 = vsel %vm689_vm6, %v8367_v40, -inf }
 0xcf1   :  { %v3801_v34 = vadd.f32 %v3800_v30, %v9019_v32  ;;  %3822 = vmax.xlane.f32.xlu0 %v3821_v59 }
 0xcf2   :  { %v8377_v26 = vsel %vm7442_vm11, %v3806_v58, -1e+30 }
 0xcf3   :  { %v8381_v48 = vsel %vm7380_vm10, %v3801_v34, -1e+30  ;;  %v3830_v2 = vsel %vm689_vm6, %v8377_v26, -inf }
 0xcf4   :  { %3831 = vmax.xlane.f32.xlu1 %v3830_v2  ;;  %v3827_v38 = vsel %vm689_vm6, %v8381_v48, -inf }
 0xcf5   :  { %3828 = vmax.xlane.f32.xlu0 %v3827_v38 }
 0xd05   :  { %6650 = vrot.lane.b32.xlu1 %v8077_v37, %s6965_s11 }
 0xd0b   :  { %6645 = vrot.lane.b32.xlu0 %v8056_v10, %s6965_s11 }
 0xd49   :  { %v3009_v63 = vpop.xlane.xlu0 %3008 }
 0xd4a   :  { %v3023_v27 = vsub.f32 %v8223_v57, %v3009_v63 }
 0xd4c   :  { %v3030_v36 = vmul.f32 1.442695, %v3023_v27 }
 0xd4e   :  { %6796 = vpow2.f32 %v3030_v36 }
 0xd55   :  { %v2794_v53 = vpop.xlane.xlu1 %2793 }
 0xd56   :  { %v2808_v20 = vsub.f32 %v8235_v5, %v2794_v53  ;;  %v2791_v29 = vpop.xlane.xlu0 %2790 }
 0xd57   :  { %v2807_v30 = vsub.f32 %v8239_v47, %v2791_v29 }
 0xd58   :  { %v8393_v0 = vpop.eup %6796  ;;  %v2815_v58 = vmul.f32 1.442695, %v2808_v20 }
 0xd59   :  { %v3006_v59 = vpop.xlane.xlu1 %3005  ;;  %v3043_v37 = vsel %vm689_vm6, %v8393_v0, 0.0  ;;  %v2813_v32 = vmul.f32 1.442695, %v2807_v30 }
 0xd5a   :  { %6798 = vpow2.f32 %v2815_v58  ;;  %v3022_v10 = vsub.f32 %v8245_v61, %v3006_v59  ;;  %3044 = vadd.xlane.f32.xlu1 %v3043_v37  ;;  %v3012_v57 = vpop.xlane.xlu0 %3011 }
 0xd5b   :  { %v3024_v2 = vsub.f32 %v8252_v16, %v3012_v57 }
 0xd5c   :  { %v3028_v34 = vmul.f32 1.442695, %v3022_v10 }
 0xd5d   :  { %v3015_v5 = vpop.xlane.xlu1 %3014  ;;  %v3032_v27 = vmul.f32 1.442695, %v3024_v2 }
 0xd5e   :  { %6800 = vpow2.f32 %v3028_v34  ;;  %v3025_v38 = vsub.f32 %v8259_v23, %v3015_v5  ;;  %v2797_v63 = vpop.xlane.xlu0 %2796 }
 0xd5f   :  { %v2809_v47 = vsub.f32 %v8266_v33, %v2797_v63  ;;  %6802 = vpow2.f32 %v2813_v32 }
 0xd60   :  { %v3034_v36 = vmul.f32 1.442695, %v3025_v38 }
 0xd61   :  { %v2800_v53 = vpop.xlane.xlu1 %2799  ;;  %v2817_v29 = vmul.f32 1.442695, %v2809_v47 }
 0xd62   :  { %6804 = vpow2.f32 %v3034_v36  ;;  %v2810_v61 = vsub.f32 %v8273_v25, %v2800_v53  ;;  %v3018_v20 = vpop.xlane.xlu0 %3017 }
 0xd63   :  { %v3026_v58 = vsub.f32 %v8280_v3, %v3018_v20  ;;  %6806 = vpow2.f32 %v3032_v27 }
 0xd64   :  { %v8404_v30 = vpop.eup %6798  ;;  %v2819_v16 = vmul.f32 1.442695, %v2810_v61 }
 0xd65   :  { %v3036_v59 = vmul.f32 1.442695, %v3026_v58  ;;  %v3021_v23 = vpop.xlane.xlu1 %3020  ;;  %v2828_v33 = vsel %vm689_vm6, %v8404_v30, 0.0 }
 0xd66   :  { %6808 = vpow2.f32 %v2819_v16  ;;  %v3027_v37 = vsub.f32 %v8287_v1, %v3021_v23  ;;  %2829 = vadd.xlane.f32.xlu1 %v2828_v33  ;;  %v2803_v10 = vpop.xlane.xlu0 %2802 }
 0xd67   :  { %6810 = vpow2.f32 %v2817_v29  ;;  %v2811_v25 = vsub.f32 %v8294_v9, %v2803_v10 }
 0xd68   :  { %v8410_v57 = vpop.eup %6800  ;;  %6812 = vpow2.f32 %v3036_v59  ;;  %v3038_v3 = vmul.f32 1.442695, %v3027_v37 }
 0xd69   :  { %v2821_v32 = vmul.f32 1.442695, %v2811_v25  ;;  %v2806_v34 = vpop.xlane.xlu1 %2805  ;;  %v3040_v2 = vsel %vm689_vm6, %v8410_v57, 0.0  ;;  %v8414_v5 = vpop.eup %6802 }
 0xd6a   :  { %v2812_v38 = vsub.f32 %v8301_v54, %v2806_v34  ;;  %3041 = vadd.xlane.f32.xlu0 %v3040_v2  ;;  %v3483_v1 = vpop.xlane.xlu0 %3482  ;;  %6814 = vpow2.f32 %v3038_v3  ;;  %v2825_v36 = vsel %vm689_vm6, %v8414_v5, 0.0 }
 0xd6b   :  { %6816 = vpow2.f32 %v2821_v32  ;;  %v3499_v58 = vsub.f32 %v8308_v44, %v3483_v1 }
 0xd6c   :  { %v8417_v63 = vpop.eup %6804  ;;  %v2823_v9 = vmul.f32 1.442695, %v2812_v38 }
 0xd6d   :  { %v3486_v47 = vpop.xlane.xlu1 %3485  ;;  %v3049_v27 = vsel %vm689_vm6, %v8417_v63, 0.0  ;;  %v8423_v53 = vpop.eup %6806 }
 0xd6e   :  { %v3500_v61 = vsub.f32 %v8315_v15, %v3486_v47  ;;  %3050 = vadd.xlane.f32.xlu1 %v3049_v27  ;;  %2826 = vadd.xlane.f32.xlu0 %v2825_v36  ;;  %v3489_v54 = vpop.xlane.xlu0 %3488  ;;  %6818 = vpow2.f32 %v2823_v9  ;;  %v3046_v15 = vsel %vm689_vm6, %v8423_v53, 0.0 }
 0xd6f   :  { %v3501_v20 = vsub.f32 %v8321_v41, %v3489_v54  ;;  %v3505_v41 = vmul.f32 1.442695, %v3499_v58 }
 0xd70   :  { %v8427_v29 = vpop.eup %6808  ;;  %v3507_v16 = vmul.f32 1.442695, %v3500_v61 }
 0xd71   :  { %v8430_v59 = vpop.eup %6810  ;;  %v3509_v23 = vmul.f32 1.442695, %v3501_v20  ;;  %v3492_v33 = vpop.xlane.xlu1 %3491  ;;  %v2834_v37 = vsel %vm689_vm6, %v8427_v29, 0.0 }
 0xd72   :  { %v8436_v10 = vpop.eup %6812  ;;  %2835 = vadd.xlane.f32.xlu1 %v2834_v37  ;;  %3047 = vadd.xlane.f32.xlu0 %v3046_v15  ;;  %v3502_v44 = vsub.f32 %v8327_v8, %v3492_v33  ;;  %v3495_v3 = vpop.xlane.xlu0 %3494  ;;  %v2831_v34 = vsel %vm689_vm6, %v8430_v59, 0.0 }
 0xd73   :  { %6820 = vpow2.f32 %v3509_v23  ;;  %v3052_v2 = vsel %vm689_vm6, %v8436_v10, 0.0  ;;  %v3503_v8 = vsub.f32 %v8333_v14, %v3495_v3 }
 0xd74   :  { %6822 = vpow2.f32 %v3507_v16  ;;  %v8439_v25 = vpop.eup %6814  ;;  %v3511_v9 = vmul.f32 1.442695, %v3502_v44 }
 0xd75   :  { %v3498_v32 = vpop.xlane.xlu1 %3497  ;;  %v8445_v38 = vpop.eup %6816  ;;  %6824 = vpow2.f32 %v3505_v41  ;;  %v3055_v36 = vsel %vm689_vm6, %v8439_v25, 0.0  ;;  %v3513_v14 = vmul.f32 1.442695, %v3503_v8 }
 0xd76   :  { %v3504_v1 = vsub.f32 %v8339_v6, %v3498_v32  ;;  %2832 = vadd.xlane.f32.xlu1 %v2831_v34  ;;  %3053 = vadd.xlane.f32.xlu0 %v3052_v2  ;;  %v2837_v61 = vsel %vm689_vm6, %v8445_v38, 0.0 }
 0xd78   :  { %v3515_v47 = vmul.f32 1.442695, %v3504_v1  ;;  %v8453_v54 = vpop.eup %6818 }
 0xd79   :  { %v3820_v27 = vpop.xlane.xlu1 %3819  ;;  %v2840_v37 = vsel %vm689_vm6, %v8453_v54, 0.0 }
 0xd7a   :  { %6826 = vpow2.f32 %v3515_v47  ;;  %v3834_v20 = vsub.f32 %v8349_v19, %v3820_v27  ;;  %3056 = vadd.xlane.f32.xlu1 %v3055_v36  ;;  %2838 = vadd.xlane.f32.xlu0 %v2837_v61  ;;  %v3817_v6 = vpop.xlane.xlu0 %3816 }
 0xd7b   :  { %v3833_v58 = vsub.f32 %v8353_v39, %v3817_v6  ;;  %6828 = vpow2.f32 %v3511_v9 }
 0xd7c   :  { %v3841_v16 = vmul.f32 1.442695, %v3834_v20 }
 0xd7d   :  { %v8457_v23 = vpop.eup %6820  ;;  %v3826_v33 = vpop.xlane.xlu1 %3825  ;;  %v3839_v39 = vmul.f32 1.442695, %v3833_v58 }
 0xd7e   :  { %v8461_v15 = vpop.eup %6822  ;;  %6830 = vpow2.f32 %v3841_v16  ;;  %v3836_v41 = vsub.f32 %v8363_v51, %v3826_v33  ;;  %2841 = vadd.xlane.f32.xlu1 %v2840_v37  ;;  %v3823_v19 = vpop.xlane.xlu0 %3822  ;;  %v3523_v44 = vsel %vm689_vm6, %v8457_v23, 0.0 }
 0xd7f   :  { %v3835_v3 = vsub.f32 %v8367_v40, %v3823_v19  ;;  %3524 = vadd.xlane.f32.xlu0 %v3523_v44  ;;  %6832 = vpow2.f32 %v3513_v14  ;;  %v3520_v1 = vsel %vm689_vm6, %v8461_v15, 0.0  ;;  %v8469_v9 = vpop.eup %6824 }
 0xd80   :  { %v3845_v32 = vmul.f32 1.442695, %v3836_v41  ;;  %v3517_v36 = vsel %vm689_vm6, %v8469_v9, 0.0 }
 0xd81   :  { %v3843_v34 = vmul.f32 1.442695, %v3835_v3  ;;  %v3832_v2 = vpop.xlane.xlu1 %3831 }
 0xd82   :  { %6834 = vpow2.f32 %v3845_v32  ;;  %v3838_v51 = vsub.f32 %v8377_v26, %v3832_v2  ;;  %3521 = vadd.xlane.f32.xlu1 %v3520_v1  ;;  %v3829_v8 = vpop.xlane.xlu0 %3828 }
 0xd83   :  { %6836 = vpow2.f32 %v3839_v39  ;;  %v3837_v27 = vsub.f32 %v8381_v48, %v3829_v8 }
 0xd84   :  { %v8472_v47 = vpop.eup %6826  ;;  %6838 = vpow2.f32 %v3843_v34  ;;  %v3849_v40 = vmul.f32 1.442695, %v3838_v51 }
 0xd85   :  { %v3532_v61 = vsel %vm689_vm6, %v8472_v47, 0.0  ;;  %v8479_v20 = vpop.eup %6828  ;;  %v3847_v6 = vmul.f32 1.442695, %v3837_v27  ;;  %v6651_v1 = vpop.permute.xlu1 %6650 }
 0xd86   :  { %3518 = vadd.xlane.f32.xlu1 %v3517_v36  ;;  %3533 = vadd.xlane.f32.xlu0 %v3532_v61  ;;  %6840 = vpow2.f32 %v3849_v40  ;;  %v3526_v58 = vsel %vm689_vm6, %v8479_v20, 0.0  ;;  %v6646_v51 = vpop.permute.xlu0 %6645 }
 0xd87   :  { %6842 = vpow2.f32 %v3847_v6  ;;  %v6648_v21 = vunpack.i.h.bf16 %v6646_v51 }
 0xd88   :  { %v8481_v26 = vpop.eup %6830 }
 0xd89   :  { %v3854_v48 = vsel %vm689_vm6, %v8481_v26, 0.0  ;;  %v8487_v14 = vpop.eup %6832 }
 0xd8a   :  { %3527 = vadd.xlane.f32.xlu1 %v3526_v58  ;;  %3855 = vadd.xlane.f32.xlu0 %v3854_v48  ;;  %v3529_v41 = vsel %vm689_vm6, %v8487_v14, 0.0  ;;  %v6653_v58 = vunpack.i.h.bf16 %v6651_v1  ;;  %v6652_v48 = vunpack.i.l.bf16 %v6651_v1 }
 0xd8c   :  { %v8489_v16 = vpop.eup %6834 }
 0xd8d   :  { %v8491_v33 = vpop.eup %6836  ;;  %v3860_v37 = vsel %vm689_vm6, %v8489_v16, 0.0 }
 0xd8e   :  { %v8497_v19 = vpop.eup %6838  ;;  %3861 = vadd.xlane.f32.xlu0 %v3860_v37  ;;  %3530 = vadd.xlane.f32.xlu1 %v3529_v41  ;;  %v3851_v44 = vsel %vm689_vm6, %v8491_v33, 0.0 }
 0xd8f   :  { %v3857_v39 = vsel %vm689_vm6, %v8497_v19, 0.0 }
 0xd90   :  { %v8503_v3 = vpop.eup %6840 }
 0xd91   :  { %v3866_v32 = vsel %vm689_vm6, %v8503_v3, 0.0  ;;  %v8507_v34 = vpop.eup %6842 }
 0xd92   :  { %3852 = vadd.xlane.f32.xlu1 %v3851_v44  ;;  %3858 = vadd.xlane.f32.xlu0 %v3857_v39  ;;  %v3863_v2 = vsel %vm689_vm6, %v8507_v34, 0.0 }
 0xd96   :  { %3867 = vadd.xlane.f32.xlu0 %v3866_v32  ;;  %v6280_v32 = vpack.c.bf16 %v6653_v58, %v6652_v48 }
 0xd9a   :  { %3864 = vadd.xlane.f32.xlu0 %v3863_v2 }
 0xda3   :  { %6660 = vrot.lane.b32.xlu1 %v6659_v7, %s6959_s23 }
 0xda7   :  { %6665 = vrot.lane.b32.xlu1 %v6664_v43, %s6959_s23  ;;  %v6647_v43 = vunpack.i.l.bf16 %v6646_v51 }
 0xda9   :  { %v6276_v37 = vpack.c.bf16 %v6648_v21, %v6647_v43 }
 0xdb0   :  { %6655 = vrot.lane.b32.xlu0 %v6654_v11, %s6959_s23 }
 0xde7   :  { %v3045_v8 = vpop.xlane.xlu1 %3044 }
 0xde8   :  { %6844 = vrcp.f32 %v3045_v8 }
 0xdf2   :  { %v6845_v61 = vpop.eup %6844 }
 0xdf3   :  { %v2830_v40 = vpop.xlane.xlu1 %2829  ;;  %v3065_v11 = vmul.f32 %v6845_v61, %v8393_v0 }
 0xdf7   :  { %v3042_v27 = vpop.xlane.xlu0 %3041 }
 0xdf8   :  { %6846 = vrcp.f32 %v3042_v27 }
 0xdfb   :  { %v3051_v36 = vpop.xlane.xlu1 %3050  ;;  %v2827_v31 = vpop.xlane.xlu0 %2826 }
 0xdfc   :  { %6848 = vrcp.f32 %v3051_v36 }
 0xdff   :  { %v2836_v49 = vpop.xlane.xlu1 %2835  ;;  %v3048_v7 = vpop.xlane.xlu0 %3047 }
 0xe00   :  { %6850 = vrcp.f32 %v3048_v7 }
 0xe02   :  { %v6847_v55 = vpop.eup %6846 }
 0xe03   :  { %v2833_v6 = vpop.xlane.xlu1 %2832  ;;  %v3054_v60 = vpop.xlane.xlu0 %3053  ;;  %v3064_v28 = vmul.f32 %v6847_v55, %v8410_v57 }
 0xe04   :  { %6852 = vrcp.f32 %v3054_v60 }
 0xe05   :  { %5842 = vmatprep.mubr.msk.f32.mxu0 %vm689_vm6, %v3064_v28  ;;  %6854 = vrcp.f32 %v2827_v31 }
 0xe06   :  { %5843 = vmatmul.mubr.msk.f32.vlgmr.msra.gmra.mrb[46].mxu0 %vm689_vm6, %v3065_v11  ;;  %v6849_v39 = vpop.eup %6848 }
 0xe07   :  { %6275 = vmatpush3.bf16.msra.mxu0 %v8213_v24  ;;  %v3057_v41 = vpop.xlane.xlu1 %3056  ;;  %v2839_v44 = vpop.xlane.xlu0 %2838  ;;  %v3067_v1 = vmul.f32 %v6849_v39, %v8417_v63 }
 0xe08   :  { %6856 = vrcp.f32 %v3057_v41  ;;  %6277 = vmatprep.subr.bf16.mxu0 %v6276_v37 }
 0xe09   :  { %6858 = vrcp.f32 %v2830_v40 }
 0xe0a   :  { %v6851_v57 = vpop.eup %6850  ;;  %6860 = vrcp.f32 %v2833_v6 }
 0xe0b   :  { %6279 = vmatpush3.bf16.msra.mxu0 %v6276_v37  ;;  %v2842_v0 = vpop.xlane.xlu1 %2841  ;;  %v3066_v2 = vmul.f32 %v6851_v57, %v8423_v53  ;;  %6862 = vrcp.f32 %v2836_v49 }
 0xe0c   :  { %6281 = vmatprep.subr.bf16.mxu0 %v6280_v32  ;;  %6864 = vrcp.f32 %v2839_v44  ;;  %v3525_v51 = vpop.xlane.xlu0 %3524 }
 0xe0d   :  { %5845 = vmatprep.mubr.msk.f32.mxu0 %vm689_vm6, %v3066_v2  ;;  %6866 = vrcp.f32 %v2842_v0 }
 0xe0e   :  { %v6853_v24 = vpop.eup %6852  ;;  %5846 = vmatmul.mubr.msk.f32.gmra.mrb[48].mxu0 %vm689_vm6, %v3067_v1 }
 0xe0f   :  { %v3522_v8 = vpop.xlane.xlu1 %3521  ;;  %6283 = vmatpush3.bf16.msra.mxu0 %v6280_v32  ;;  %v3068_v40 = vmul.f32 %v6853_v24, %v8436_v10  ;;  %v6855_v27 = vpop.eup %6854 }
 0xe10   :  { %6303 = vmatprep.subr.bf16.mxu0 %v8043_v45  ;;  %v2849_v7 = vmul.f32 %v6855_v27, %v8414_v5 }
 0xe11   :  { %5848 = vmatprep.mubr.msk.f32.mxu0 %vm689_vm6, %v3068_v40 }
 0xe12   :  { %v6857_v36 = vpop.eup %6856 }
 0xe13   :  { %v3519_v63 = vpop.xlane.xlu1 %3518  ;;  %v3534_v53 = vpop.xlane.xlu0 %3533  ;;  %v3069_v31 = vmul.f32 %v6857_v36, %v8439_v25 }
 0xe14   :  { %v6859_v49 = vpop.eup %6858  ;;  %6868 = vrcp.f32 %v3519_v63 }
 0xe15   :  { %v6861_v61 = vpop.eup %6860  ;;  %5849 = vmatmul.mubr.msk.f32.gmra.mrb[50].mxu0 %vm689_vm6, %v3069_v31  ;;  %6870 = vrcp.f32 %v3522_v8  ;;  %v2850_v10 = vmul.f32 %v6859_v49, %v8404_v30 }
 0xe16   :  { %5863 = vmatprep.mubr.msk.f32.mxu0 %vm689_vm6, %v2849_v7  ;;  %6872 = vrcp.f32 %v3525_v51  ;;  %v6863_v43 = vpop.eup %6862  ;;  %v2851_v6 = vmul.f32 %v6861_v61, %v8430_v59 }
 0xe17   :  { %v3528_v55 = vpop.xlane.xlu1 %3527  ;;  %v3856_v21 = vpop.xlane.xlu0 %3855  ;;  %v2852_v30 = vmul.f32 %v6863_v43, %v8427_v29 }
 0xe18   :  { %v6865_v60 = vpop.eup %6864  ;;  %6874 = vrcp.f32 %v3528_v55 }
 0xe19   :  { %5864 = vmatmul.mubr.msk.f32.vlgmr.msra.gmra.mrb[46].mxu0 %vm689_vm6, %v2850_v10  ;;  %v6867_v28 = vpop.eup %6866  ;;  %v2853_v11 = vmul.f32 %v6865_v60, %v8445_v38  ;;  %v8593_v60 = vld [vmem:[%s8926_s2 + $0x10] sm:$0xff] }
 0xe1a   :  { %6305 = vmatpush3.bf16.msra.mxu0 %v8043_v45  ;;  %5866 = vmatprep.mubr.msk.f32.mxu0 %vm689_vm6, %v2851_v6  ;;  %v2854_v48 = vmul.f32 %v6867_v28, %v8453_v54 }
 0xe1b   :  { %6307 = vmatprep.subr.bf16.mxu0 %v8062_v50  ;;  %v3531_v5 = vpop.xlane.xlu1 %3530  ;;  %v3862_v25 = vpop.xlane.xlu0 %3861 }
 0xe1c   :  { %6876 = vrcp.f32 %v3531_v5  ;;  %v9020_v5 = vsub.s32 1, %v7078_v52 }
 0xe1d   :  { %5867 = vmatmul.mubr.msk.f32.gmra.mrb[48].mxu0 %vm689_vm6, %v2852_v30  ;;  %6878 = vrcp.f32 %v3534_v53 }
 0xe1e   :  { %v6869_v59 = vpop.eup %6868  ;;  %6309 = vmatpush3.bf16.msra.mxu0 %v8062_v50  ;;  %5869 = vmatprep.mubr.msk.f32.mxu0 %vm689_vm6, %v2853_v11 }
 0xe1f   :  { %6311 = vmatprep.subr.bf16.mxu0 %v8083_v22  ;;  %v3853_v45 = vpop.xlane.xlu1 %3852  ;;  %v3859_v58 = vpop.xlane.xlu0 %3858  ;;  %v3541_v29 = vmul.f32 %v6869_v59, %v8469_v9 }
 0xe20   :  { %v6871_v37 = vpop.eup %6870  ;;  %6880 = vrcp.f32 %v3853_v45 }
 0xe21   :  { %v6873_v41 = vpop.eup %6872  ;;  %5870 = vmatmul.mubr.msk.f32.gmra.mrb[50].mxu0 %vm689_vm6, %v2854_v48  ;;  %v3542_v50 = vmul.f32 %v6871_v37, %v8461_v15  ;;  %6882 = vrcp.f32 %v3856_v21 }
 0xe22   :  { %6313 = vmatpush3.bf16.msra.mxu0 %v8083_v22  ;;  %5905 = vmatprep.mubr.msk.f32.mxu0 %vm689_vm6, %v3541_v29  ;;  %v6875_v44 = vpop.eup %6874  ;;  %v3543_v39 = vmul.f32 %v6873_v41, %v8457_v23  ;;  %6884 = vrcp.f32 %v3859_v58 }
 0xe23   :  { %v3868_v38 = vpop.xlane.xlu0 %3867  ;;  %v6661_v9 = vpop.permute.xlu1 %6660  ;;  %v3544_v57 = vmul.f32 %v6875_v44, %v8479_v20  ;;  %6886 = vrcp.f32 %v3862_v25  ;;  %v4027_v25 = vrot.slane %v8593_v60, %v9020_v5 }
 0xe24   :  { %v6663_v24 = vunpack.i.h.bf16 %v6661_v9  ;;  %v6662_v51 = vunpack.i.l.bf16 %v6661_v9 }
 0xe25   :  { %5906 = vmatmul.mubr.msk.f32.vlgmr.msra.gmra.mrb[46].mxu0 %vm689_vm6, %v3542_v50 }
 0xe26   :  { %v6877_v54 = vpop.eup %6876  ;;  %5908 = vmatprep.mubr.msk.f32.mxu0 %vm689_vm6, %v3543_v39 }
 0xe27   :  { %v3865_v32 = vpop.xlane.xlu0 %3864  ;;  %v3545_v0 = vmul.f32 %v6877_v54, %v8487_v14  ;;  %v6879_v22 = vpop.eup %6878  ;;  %v6336_v14 = vpack.c.bf16 %v6663_v24, %v6662_v51 }
 0xe28   :  { %v3546_v23 = vmul.f32 %v6879_v22, %v8472_v47  ;;  %v6666_v27 = vpop.permute.xlu1 %6665  ;;  %6888 = vrcp.f32 %v3865_v32 }
 0xe29   :  { %5909 = vmatmul.mubr.msk.f32.gmra.mrb[48].mxu0 %vm689_vm6, %v3544_v57  ;;  %v6668_v36 = vunpack.i.h.bf16 %v6666_v27  ;;  %v6667_v63 = vunpack.i.l.bf16 %v6666_v27  ;;  %6890 = vrcp.f32 %v3868_v38 }
 0xe2a   :  { %v6881_v2 = vpop.eup %6880  ;;  %5911 = vmatprep.mubr.msk.f32.mxu0 %vm689_vm6, %v3545_v0 }
 0xe2b   :  { %v6656_v15 = vpop.permute.xlu0 %6655  ;;  %v3875_v1 = vmul.f32 %v6881_v2, %v8491_v33  ;;  %v6340_v47 = vpack.c.bf16 %v6668_v36, %v6667_v63  ;;  %v6883_v33 = vpop.eup %6882 }
 0xe2c   :  { %v6658_v8 = vunpack.i.h.bf16 %v6656_v15  ;;  %v6657_v40 = vunpack.i.l.bf16 %v6656_v15  ;;  %v6885_v53 = vpop.eup %6884  ;;  %v3876_v31 = vmul.f32 %v6883_v33, %v8481_v26  ;;  %v2505_v26 = vld [vmem:[%s8925_s1 + $0x140] sm:$0xff] }
 0xe2d   :  { %5912 = vmatmul.mubr.msk.f32.gmra.mrb[50].mxu0 %vm689_vm6, %v3546_v23  ;;  %v6887_v49 = vpop.eup %6886  ;;  %v3877_v7 = vmul.f32 %v6885_v53, %v8497_v19  ;;  %v2506_v19 = vld [vmem:[%s8925_s1 + $0x150] sm:$0xff] }
 0xe2e   :  { %v6332_v20 = vpack.c.bf16 %v6658_v8, %v6657_v40  ;;  %5947 = vmatprep.mubr.msk.f32.mxu0 %vm689_vm6, %v3875_v1  ;;  %v3878_v10 = vmul.f32 %v6887_v49, %v8489_v16  ;;  %v6344_v16 = vpack.c.bf16 %v2506_v19, %v2505_v26 }
 0xe30   :  { %6333 = vmatprep.subr.bf16.mxu0 %v6332_v20 }
 0xe31   :  { %6335 = vmatpush3.bf16.msra.mxu0 %v6332_v20 }
 0xe32   :  { %6337 = vmatprep.subr.bf16.mxu0 %v6336_v14  ;;  %v6889_v61 = vpop.eup %6888 }
 0xe33   :  { %v6891_v55 = vpop.eup %6890  ;;  %v3879_v21 = vmul.f32 %v6889_v61, %v8507_v34  ;;  %v2507_v34 = vld [vmem:[%s8925_s1 + $0x160] sm:$0xff] }
 0xe34   :  { %v3880_v43 = vmul.f32 %v6891_v55, %v8503_v3  ;;  %v2508_v3 = vld [vmem:[%s8925_s1 + $0x170] sm:$0xff] }
 0xe35   :  { %6339 = vmatpush3.bf16.msra.mxu0 %v6336_v14  ;;  %v6348_v6 = vpack.c.bf16 %v2508_v3, %v2507_v34 }
 0xe36   :  { %6341 = vmatprep.subr.bf16.mxu0 %v6340_v47 }
 0xe39   :  { %6343 = vmatpush3.bf16.msra.mxu0 %v6340_v47 }
 0xe3a   :  { %6345 = vmatprep.subr.bf16.mxu0 %v6344_v16 }
 0xe3c   :  { %5948 = vmatmul.mubr.msk.f32.vlgmr.msra.gmra.mrb[46].mxu0 %vm689_vm6, %v3876_v31 }
 0xe3d   :  { %5950 = vmatprep.mubr.msk.f32.mxu0 %vm689_vm6, %v3877_v7  ;;  %6347 = vmatpush3.bf16.msra.mxu0 %v6344_v16 }
 0xe3e   :  { %6349 = vmatprep.subr.bf16.mxu0 %v6348_v6 }
 0xe40   :  { %5951 = vmatmul.mubr.msk.f32.gmra.mrb[48].mxu0 %vm689_vm6, %v3878_v10 }
 0xe41   :  { %5953 = vmatprep.mubr.msk.f32.mxu0 %vm689_vm6, %v3879_v21  ;;  %6351 = vmatpush3.bf16.msra.mxu0 %v6348_v6 }
 0xe44   :  { %5954 = vmatmul.mubr.msk.f32.gmra.mrb[50].mxu0 %vm689_vm6, %v3880_v43 }
 0xf0f   :  { %v5949_v30 = vpop.f32.mrb[46].mxu0 }
 0xf10   :  { %v4029_v28 = vadd.f32 %v5949_v30, %v4027_v25  ;;  %v3989_v11 = vpop.f32.mrb[47].mxu0 }
 0xf11   :  { %v4028_v59 = vadd.f32 %v4027_v25, %v3989_v11 }
 0xf12   :  { %v4035_v45 = vadd.f32 %v4029_v28, %v7999_v12 }
 0xf13   :  { %v4034_v58 = vadd.f32 %v4028_v59, %v7994_v17  ;;  %v5952_v48 = vpop.f32.mrb[48].mxu0 }
 0xf14   :  { %v4041_v29 = vsel %vm55_vm2, %v4035_v45, 0.0  ;;  %v4031_v37 = vadd.f32 %v5952_v48, %v4027_v25  ;;  %v3999_v41 = vpop.f32.mrb[49].mxu0 }
 0xf15   :  { %v4040_v50 = vsel %vm55_vm2, %v4034_v58, 0.0  ;;  %v4030_v38 = vadd.f32 %v4027_v25, %v3999_v41  ;;  %v9021_v41 = vsub.s32 2, %v7078_v52 }
 0xf16   :  { %v4042_v44 = vadd.f32 %v4041_v29, %v4040_v50  ;;  %v4037_v39 = vadd.f32 %v4031_v37, %v8009_v35 }
 0xf17   :  { %v4036_v54 = vadd.f32 %v4030_v38, %v8004_v42  ;;  %v5955_v9 = vpop.f32.mrb[50].mxu0  ;;  %v4099_v50 = vrot.slane %v8593_v60, %v9021_v41 }
 0xf18   :  { %v4033_v32 = vadd.f32 %v5955_v9, %v4027_v25  ;;  %v4009_v57 = vpop.f32.mrb[51].mxu0  ;;  %v4045_v22 = vsel %vm55_vm2, %v4037_v39, 0.0 }
 0xf19   :  { %v4043_v12 = vsel %vm55_vm2, %v4036_v54, 0.0  ;;  %v4032_v0 = vadd.f32 %v4027_v25, %v4009_v57 }
 0xf1a   :  { %v4044_v17 = vadd.f32 %v4043_v12, %v4042_v44  ;;  %v4039_v2 = vadd.f32 %v4033_v32, %v8019_v13  ;;  %v9022_v44 = vsub.s32 3, %v7078_v52 }
 0xf1b   :  { %v4038_v15 = vadd.f32 %v4032_v0, %v8014_v56 }
 0xf1c   :  { %v4046_v23 = vadd.f32 %v4045_v22, %v4044_v17  ;;  %v4049_v35 = vsel %vm55_vm2, %v4039_v2, 0.0 }
 0xf1d   :  { %v4047_v1 = vsel %vm55_vm2, %v4038_v15, 0.0 }
 0xf1e   :  { %v4048_v24 = vadd.f32 %v4047_v1, %v4046_v23 }
 0xf20   :  { %v4050_v42 = vadd.f32 %v4049_v35, %v4048_v24 }
 0xf22   :  { %v4051_v51 = vrot.slane %v4050_v42, 4 }
 0xf24   :  { %v4052_v8 = vadd.f32 %v4051_v51, %v4050_v42 }
 0xf26   :  { %v4053_v40 = vrot.slane %v4052_v8, 2 }
 0xf28   :  { %v4054_v27 = vadd.f32 %v4053_v40, %v4052_v8 }
 0xf2a   :  { %v4055_v20 = vrot.slane %v4054_v27, 1 }
 0xf2c   :  { %v4056_v14 = vadd.f32 %v4055_v20, %v4054_v27  ;;  %v2509_v27 = vld [vmem:[%s8925_s1 + $0x180] sm:$0xff]  ;;  %v2510_v20 = vld [vmem:[%s8925_s1 + $0x190] sm:$0xff] }
 0xf2e   :  { %v4057_v36 = vmul.f32 0.020833334, %v4056_v14  ;;  %v6352_v14 = vpack.c.bf16 %v2510_v20, %v2509_v27 }
 0xf30   :  { %v4058_v63 = vsub.f32 %v4034_v58, %v4057_v36  ;;  %v4059_v47 = vsub.f32 %v4035_v45, %v4057_v36  ;;  %v4060_v33 = vsub.f32 %v4036_v54, %v4057_v36  ;;  %v4061_v13 = vsub.f32 %v4037_v39, %v4057_v36  ;;  %6353 = vmatprep.subr.bf16.mxu1 %v6352_v14 }
 0xf31   :  { %v4062_v53 = vsub.f32 %v4038_v15, %v4057_v36  ;;  %v4063_v56 = vsub.f32 %v4039_v2, %v4057_v36  ;;  %v4109_v39 = vrot.slane %v8593_v60, %v9022_v44  ;;  %6355 = vmatpush3.bf16.msra.mxu1 %v6352_v14  ;;  %v2511_v36 = vld [vmem:[%s8925_s1 + $0x1a0] sm:$0xff] }
 0xf32   :  { %v4064_v31 = vmul.f32 %v4058_v63, %v4058_v63  ;;  %v4065_v49 = vmul.f32 %v4059_v47, %v4059_v47  ;;  %v4066_v7 = vmul.f32 %v4060_v33, %v4060_v33  ;;  %v4067_v61 = vmul.f32 %v4061_v13, %v4061_v13 }
 0xf33   :  { %v4068_v43 = vmul.f32 %v4062_v53, %v4062_v53  ;;  %v4069_v16 = vmul.f32 %v4063_v56, %v4063_v56 }
 0xf34   :  { %v4070_v10 = vsel %vm55_vm2, %v4064_v31, 0.0  ;;  %v4071_v55 = vsel %vm55_vm2, %v4065_v49, 0.0  ;;  %v4073_v26 = vsel %vm55_vm2, %v4066_v7, 0.0  ;;  %v4075_v34 = vsel %vm55_vm2, %v4067_v61, 0.0  ;;  %v2516_v31 = vld [vmem:[%s8925_s1 + $0x1f0] sm:$0xff] }
 0xf35   :  { %v4072_v21 = vadd.f32 %v4071_v55, %v4070_v10  ;;  %v4077_v6 = vsel %vm55_vm2, %v4068_v43, 0.0  ;;  %v4079_v25 = vsel %vm55_vm2, %v4069_v16, 0.0  ;;  %v9023_v7 = vsub.s32 4, %v7078_v52 }
 0xf37   :  { %v4074_v19 = vadd.f32 %v4073_v26, %v4072_v21  ;;  %v4119_v61 = vrot.slane %v8593_v60, %v9023_v7 }
 0xf39   :  { %v4076_v3 = vadd.f32 %v4075_v34, %v4074_v19 }
 0xf3b   :  { %v4078_v5 = vadd.f32 %v4077_v6, %v4076_v3 }
 0xf3d   :  { %v4080_v30 = vadd.f32 %v4079_v25, %v4078_v5 }
 0xf3f   :  { %v4081_v28 = vrot.slane %v4080_v30, 4 }
 0xf41   :  { %v4082_v11 = vadd.f32 %v4081_v28, %v4080_v30 }
 0xf43   :  { %v4083_v59 = vrot.slane %v4082_v11, 2 }
 0xf45   :  { %v4084_v45 = vadd.f32 %v4083_v59, %v4082_v11 }
 0xf47   :  { %v4085_v58 = vrot.slane %v4084_v45, 1 }
 0xf49   :  { %v4086_v48 = vadd.f32 %v4085_v58, %v4084_v45 }
 0xf4b   :  { %v4087_v29 = vmul.f32 0.020833334, %v4086_v48 }
 0xf4d   :  { %v4088_v37 = vadd.f32 1e-05, %v4087_v29 }
 0xf4f   :  { %6892 = vrsqrt.f32 %v4088_v37 }
 0xf59   :  { %v6893_v38 = vpop.eup %6892 }
 0xf5a   :  { %v4094_v54 = vmul.f32 %v6893_v38, %v4062_v53  ;;  %v4090_v9 = vmul.f32 %v6893_v38, %v4058_v63  ;;  %v4091_v32 = vmul.f32 %v6893_v38, %v4059_v47  ;;  %v4092_v57 = vmul.f32 %v6893_v38, %v4060_v33  ;;  %v2512_v63 = vld [vmem:[%s8925_s1 + $0x1b0] sm:$0xff]  ;;  %v2513_v33 = vld [vmem:[%s8925_s1 + $0x1c0] sm:$0xff] }
 0xf5b   :  { %v4093_v12 = vmul.f32 %v6893_v38, %v4061_v13  ;;  %v4095_v0 = vmul.f32 %v6893_v38, %v4063_v56  ;;  %v6356_v47 = vpack.c.bf16 %v2512_v63, %v2511_v36  ;;  %v2514_v13 = vld [vmem:[%s8925_s1 + $0x1d0] sm:$0xff]  ;;  %v2515_v56 = vld [vmem:[%s8925_s1 + $0x1e0] sm:$0xff] }
 0xf5c   :  { %v4100_v17 = vmul.f32 %v4099_v50, %v4090_v9  ;;  %v4101_v22 = vmul.f32 %v4099_v50, %v4091_v32  ;;  %v4102_v2 = vmul.f32 %v4099_v50, %v4092_v57  ;;  %v4104_v24 = vmul.f32 %v4099_v50, %v4094_v54 }
 0xf5d   :  { %v4103_v1 = vmul.f32 %v4099_v50, %v4093_v12  ;;  %v4105_v51 = vmul.f32 %v4099_v50, %v4095_v0  ;;  %6357 = vmatprep.subr.bf16.mxu1 %v6356_v47  ;;  %v6360_v53 = vpack.c.bf16 %v2514_v13, %v2513_v33  ;;  %v6364_v49 = vpack.c.bf16 %v2516_v31, %v2515_v56 }
 0xf5e   :  { %v8622_v15 = vadd.f32 %v4109_v39, %v4100_v17  ;;  %v8624_v23 = vadd.f32 %v4109_v39, %v4101_v22  ;;  %v8628_v35 = vadd.f32 %v4109_v39, %v4102_v2  ;;  %v8636_v8 = vadd.f32 %v4109_v39, %v4104_v24  ;;  %6359 = vmatpush3.bf16.msra.mxu1 %v6356_v47 }
 0xf5f   :  { %v8634_v42 = vadd.f32 %v4109_v39, %v4103_v1  ;;  %v8642_v40 = vadd.f32 %v4109_v39, %v4105_v51  ;;  %6361 = vmatprep.subr.bf16.mxu1 %v6360_v53 }
 0xf60   :  { %5964 = vmatprep.mubr.msk.f32.mxu0 %vm55_vm2, %v8622_v15 }
 0xf61   :  { %5965 = vmatmul.mubr.msk.f32.vlgmr.msra.gmra.mrb[52].mxu0 %vm55_vm2, %v8624_v23 }
 0xf62   :  { %5967 = vmatprep.mubr.msk.f32.mxu0 %vm55_vm2, %v8628_v35  ;;  %6363 = vmatpush3.bf16.msra.mxu1 %v6360_v53 }
 0xf63   :  { %6365 = vmatprep.subr.bf16.mxu1 %v6364_v49 }
 0xf65   :  { %5968 = vmatmul.mubr.msk.f32.gmra.mrb[54].mxu0 %vm55_vm2, %v8634_v42 }
 0xf66   :  { %5970 = vmatprep.mubr.msk.f32.mxu0 %vm55_vm2, %v8636_v8  ;;  %6367 = vmatpush3.bf16.msra.mxu1 %v6364_v49 }
 0xf69   :  { %5971 = vmatmul.mubr.msk.f32.gmra.mrb[56].mxu0 %vm55_vm2, %v8642_v40 }
 0xf6a   :  { %6006 = vmatprep.mubr.msk.f32.mxu0 %vm6957_vm1, %v9000_v18 }
0x1034   :  { %v5966_v10 = vpop.f32.mrb[52].mxu0 }
0x1035   :  { %v8675_v55 = vadd.f32 %v5966_v10, %v4119_v61  ;;  %v4204_v21 = vpop.f32.mrb[53].mxu0 }
0x1036   :  { %v8677_v43 = vadd.f32 %v4204_v21, %v4119_v61 }
0x1037   :  { %v8680_v26 = vmul.f32 0.70710677, %v8675_v55 }
0x1038   :  { %v8683_v19 = vmul.f32 0.70710677, %v8677_v43  ;;  %v5969_v16 = vpop.f32.mrb[54].mxu0 }
0x1039   :  { %v4258_v34 = vand.u32 2147483647, %v8680_v26  ;;  %v8686_v3 = vadd.f32 %v5969_v16, %v4119_v61  ;;  %v4214_v6 = vpop.f32.mrb[55].mxu0  ;;  %vm4246_vm3 = vcmp.ge.f32.partialorder %v8680_v26, 0.0  ;;  %v4234_v26 = vmul.f32 0.5, %v8675_v55 }
0x103a   :  { %v4257_v5 = vand.u32 2147483647, %v8683_v19  ;;  %v8689_v25 = vadd.f32 %v4214_v6, %v4119_v61  ;;  %vm4245_vm4 = vcmp.ge.f32.partialorder %v8683_v19, 0.0 }
0x103b   :  { %v4264_v30 = vmul.f32 0.3275911, %v4258_v34  ;;  %v8692_v11 = vmul.f32 0.70710677, %v8686_v3  ;;  %v4336_v32 = vsub.f32 0.0, %v4258_v34 }
0x103c   :  { %v4263_v28 = vmul.f32 0.3275911, %v4257_v5  ;;  %v8695_v45 = vmul.f32 0.70710677, %v8689_v25  ;;  %v5972_v58 = vpop.f32.mrb[56].mxu0  ;;  %v4335_v17 = vsub.f32 0.0, %v4257_v5 }
0x103d   :  { %v4270_v59 = vadd.f32 1.0, %v4264_v30  ;;  %v4260_v29 = vand.u32 2147483647, %v8692_v11  ;;  %v4224_v37 = vpop.f32.mrb[57].mxu0  ;;  %v8699_v38 = vadd.f32 %v5972_v58, %v4119_v61  ;;  %v4342_v1 = vmul.f32 %v4336_v32, %v4258_v34 }
0x103e   :  { %v4269_v48 = vadd.f32 1.0, %v4263_v28  ;;  %v4259_v50 = vand.u32 2147483647, %v8695_v45  ;;  %v8701_v39 = vadd.f32 %v4224_v37, %v4119_v61  ;;  %v4341_v63 = vmul.f32 %v4335_v17, %v4257_v5 }
0x103f   :  { %6894 = vrcp.f32 %v4270_v59  ;;  %v4266_v41 = vmul.f32 0.3275911, %v4260_v29  ;;  %v8704_v9 = vmul.f32 0.70710677, %v8699_v38  ;;  %v4338_v27 = vsub.f32 0.0, %v4260_v29 }
0x1040   :  { %6896 = vrcp.f32 %v4269_v48  ;;  %v4265_v54 = vmul.f32 0.3275911, %v4259_v50  ;;  %v8707_v57 = vmul.f32 0.70710677, %v8701_v39  ;;  %v4349_v53 = vmul.f32 1.442695, %v4342_v1 }
0x1041   :  { %v4272_v44 = vadd.f32 1.0, %v4266_v41  ;;  %v4262_v0 = vand.u32 2147483647, %v8704_v9  ;;  %v4344_v31 = vmul.f32 %v4338_v27, %v4260_v29  ;;  %v4337_v49 = vsub.f32 0.0, %v4259_v50 }
0x1042   :  { %v4271_v12 = vadd.f32 1.0, %v4265_v54  ;;  %v4261_v22 = vand.u32 2147483647, %v8707_v57  ;;  %v4347_v10 = vmul.f32 1.442695, %v4341_v63  ;;  %vm4248_vm5 = vcmp.ge.f32.partialorder %v8692_v11, 0.0 }
0x1043   :  { %6898 = vrcp.f32 %v4272_v44  ;;  %v4268_v2 = vmul.f32 0.3275911, %v4262_v0  ;;  %v4340_v34 = vsub.f32 0.0, %v4262_v0  ;;  %v4353_v59 = vmul.f32 1.442695, %v4344_v31 }
0x1044   :  { %6900 = vrcp.f32 %v4271_v12  ;;  %v4267_v24 = vmul.f32 0.3275911, %v4261_v22  ;;  %v4343_v58 = vmul.f32 %v4337_v49, %v4259_v50  ;;  %v4339_v37 = vsub.f32 0.0, %v4261_v22 }
0x1045   :  { %v4274_v20 = vadd.f32 1.0, %v4268_v2  ;;  %v4346_v54 = vmul.f32 %v4340_v34, %v4262_v0  ;;  %vm4247_vm6 = vcmp.ge.f32.partialorder %v8695_v45, 0.0  ;;  %vm4250_vm7 = vcmp.ge.f32.partialorder %v8704_v9, 0.0 }
0x1046   :  { %v4273_v47 = vadd.f32 1.0, %v4267_v24  ;;  %v4351_v24 = vmul.f32 1.442695, %v4343_v58  ;;  %v4345_v63 = vmul.f32 %v4339_v37, %v4261_v22  ;;  %vm4249_vm8 = vcmp.ge.f32.partialorder %v8707_v57, 0.0 }
0x1047   :  { %6902 = vrcp.f32 %v4274_v20  ;;  %v4357_v0 = vmul.f32 1.442695, %v4346_v54  ;;  %v4255_v9 = vsel %vm4249_vm8, 1.0, %v6966_v46  ;;  %v4237_v57 = vmul.f32 0.5, %v8701_v39  ;;  %v4599_v39 = vld [vmem:[%s8927_s3 + $0x60] sm:$0xff] }
0x1048   :  { %6904 = vrcp.f32 %v4273_v47  ;;  %v4355_v22 = vmul.f32 1.442695, %v4345_v63 }
0x1049   :  { %v6895_v51 = vpop.eup %6894  ;;  %6906 = vpow2.f32 %v4349_v53 }
0x104a   :  { %v6897_v14 = vpop.eup %6896  ;;  %v4282_v36 = vmul.f32 1.0614054, %v6895_v51  ;;  %6908 = vpow2.f32 %v4347_v10 }
0x104b   :  { %v4281_v33 = vmul.f32 1.0614054, %v6897_v14  ;;  %6910 = vpow2.f32 %v4353_v59 }
0x104c   :  { %v4288_v13 = vadd.f32 -1.4531521, %v4282_v36  ;;  %6912 = vpow2.f32 %v4351_v24 }
0x104d   :  { %v4287_v56 = vadd.f32 -1.4531521, %v4281_v33  ;;  %v8711_v7 = vpop.eup %6898  ;;  %6914 = vpow2.f32 %v4357_v0 }
0x104e   :  { %v4294_v61 = vmul.f32 %v6895_v51, %v4288_v13  ;;  %v4284_v16 = vmul.f32 1.0614054, %v8711_v7  ;;  %v8714_v5 = vpop.eup %6900  ;;  %6916 = vpow2.f32 %v4355_v22 }
0x104f   :  { %v4293_v21 = vmul.f32 %v6897_v14, %v4287_v56  ;;  %v4283_v29 = vmul.f32 1.0614054, %v8714_v5 }
0x1050   :  { %v4300_v6 = vadd.f32 1.4214138, %v4294_v61  ;;  %v4290_v28 = vadd.f32 -1.4531521, %v4284_v16 }
0x1051   :  { %v4299_v30 = vadd.f32 1.4214138, %v4293_v21  ;;  %v4289_v12 = vadd.f32 -1.4531521, %v4283_v29  ;;  %v8718_v17 = vpop.eup %6902 }
0x1052   :  { %v4306_v48 = vmul.f32 %v6895_v51, %v4300_v6  ;;  %v4296_v44 = vmul.f32 %v8711_v7, %v4290_v28  ;;  %v8720_v27 = vpop.eup %6904  ;;  %v4286_v36 = vmul.f32 1.0614054, %v8718_v17 }
0x1053   :  { %v4305_v41 = vmul.f32 %v6897_v14, %v4299_v30  ;;  %v4295_v20 = vmul.f32 %v8714_v5, %v4289_v12  ;;  %v4285_v13 = vmul.f32 1.0614054, %v8720_v27  ;;  %v6907_v21 = vpop.eup %6906 }
0x1054   :  { %v4312_v32 = vadd.f32 -0.28449672, %v4306_v48  ;;  %v4302_v1 = vadd.f32 1.4214138, %v4296_v44  ;;  %v4292_v31 = vadd.f32 -1.4531521, %v4286_v36  ;;  %v6909_v58 = vpop.eup %6908 }
0x1055   :  { %v4311_v2 = vadd.f32 -0.28449672, %v4305_v41  ;;  %v4301_v56 = vadd.f32 1.4214138, %v4295_v20  ;;  %v4291_v10 = vadd.f32 -1.4531521, %v4285_v13 }
0x1056   :  { %v4318_v50 = vmul.f32 %v6895_v51, %v4312_v32  ;;  %v4308_v33 = vmul.f32 %v8711_v7, %v4302_v1  ;;  %v4298_v6 = vmul.f32 %v8718_v17, %v4292_v31  ;;  %v4251_v36 = vsel %vm4245_vm4, 1.0, %v6966_v46 }
0x1057   :  { %v4317_v47 = vmul.f32 %v6897_v14, %v4311_v2  ;;  %v4307_v34 = vmul.f32 %v8714_v5, %v4301_v56  ;;  %v4297_v59 = vmul.f32 %v8720_v27, %v4291_v10  ;;  %v4252_v2 = vsel %vm4246_vm3, 1.0, %v6966_v46 }
0x1058   :  { %v4324_v53 = vadd.f32 0.2548296, %v4318_v50  ;;  %v4314_v61 = vadd.f32 -0.28449672, %v4308_v33  ;;  %v4304_v37 = vadd.f32 1.4214138, %v4298_v6 }
0x1059   :  { %v4323_v49 = vadd.f32 0.2548296, %v4317_v47  ;;  %v4313_v29 = vadd.f32 -0.28449672, %v4307_v34  ;;  %v4303_v44 = vadd.f32 1.4214138, %v4297_v59 }
0x105a   :  { %v4330_v16 = vmul.f32 %v6895_v51, %v4324_v53  ;;  %v4320_v28 = vmul.f32 %v8711_v7, %v4314_v61  ;;  %v4310_v12 = vmul.f32 %v8718_v17, %v4304_v37 }
0x105b   :  { %v4329_v30 = vmul.f32 %v6897_v14, %v4323_v49  ;;  %v4319_v32 = vmul.f32 %v8714_v5, %v4313_v29  ;;  %v6911_v14 = vpop.eup %6910  ;;  %v4309_v50 = vmul.f32 %v8720_v27, %v4303_v44  ;;  %v4233_v49 = vmul.f32 0.5, %v8677_v43 }
0x105c   :  { %v4360_v48 = vmul.f32 %v6907_v21, %v4330_v16  ;;  %v4326_v51 = vadd.f32 0.2548296, %v4320_v28  ;;  %v4316_v47 = vadd.f32 -0.28449672, %v4310_v12  ;;  %v6913_v31 = vpop.eup %6912  ;;  %v4254_v21 = vsel %vm4248_vm5, 1.0, %v6966_v46 }
0x105d   :  { %v4359_v41 = vmul.f32 %v6909_v58, %v4329_v30  ;;  %v4325_v63 = vadd.f32 0.2548296, %v4319_v32  ;;  %v4315_v13 = vadd.f32 -0.28449672, %v4309_v50  ;;  %v6915_v28 = vpop.eup %6914  ;;  %v4253_v43 = vsel %vm4247_vm6, 1.0, %v6966_v46 }
0x105e   :  { %v4366_v54 = vsub.f32 1.0, %v4360_v48  ;;  %v4332_v24 = vmul.f32 %v8711_v7, %v4326_v51  ;;  %v4322_v7 = vmul.f32 %v8718_v17, %v4316_v47  ;;  %v6917_v58 = vpop.eup %6916  ;;  %v4236_v44 = vmul.f32 0.5, %v8686_v3 }
0x105f   :  { %v4365_v1 = vsub.f32 1.0, %v4359_v41  ;;  %v4331_v56 = vmul.f32 %v8714_v5, %v4325_v63  ;;  %v4321_v10 = vmul.f32 %v8720_v27, %v4315_v13  ;;  %v6967_v63 = vmov 0.0|0.0   ;;  %v4596_v13 = vld [vmem:[%s8927_s3 + $0x48] sm:$0xff] }
0x1060   :  { %v4372_v20 = vmul.f32 %v4366_v54, %v4252_v2  ;;  %v4362_v0 = vmul.f32 %v6911_v14, %v4332_v24  ;;  %v4328_v16 = vadd.f32 0.2548296, %v4322_v7  ;;  %6368 = vmatprep.subr.bf16.mxu0 %v6967_v63  ;;  %6374 = vmatprep.subr.bf16.mxu1 %v6967_v63  ;;  %v6968_v7 = vmov 50  }
0x1061   :  { %v4371_v33 = vmul.f32 %v4365_v1, %v4251_v36  ;;  %v4361_v11 = vmul.f32 %v6913_v31, %v4331_v56  ;;  %v4327_v6 = vadd.f32 0.2548296, %v4321_v10  ;;  %v4595_v36 = vld [vmem:[%s8927_s3 + $0x40] sm:$0xff]  ;;  %6669 = vset.pattern.permute.xlu0 %v6968_v7 }
0x1062   :  { %v4378_v53 = vadd.f32 1.0, %v4372_v20  ;;  %v4368_v19 = vsub.f32 1.0, %v4362_v0  ;;  %v4334_v30 = vmul.f32 %v8718_v17, %v4328_v16  ;;  %v4235_v17 = vmul.f32 0.5, %v8689_v25  ;;  %v4601_v0 = vld [vmem:[%s8927_s3 + $0x70] sm:$0xff]  ;;  %v6928_v31 = vld [vmem:[%s8924_s0] sm:$0xff] }
0x1063   :  { %v4377_v61 = vadd.f32 1.0, %v4371_v33  ;;  %v4367_v5 = vsub.f32 1.0, %v4361_v11  ;;  %v4333_v59 = vmul.f32 %v8720_v27, %v4327_v6  ;;  %v4256_v27 = vsel %vm4250_vm7, 1.0, %v6966_v46  ;;  %v4598_v46 = vld [vmem:[%s8927_s3 + $0x58] sm:$0xff]  ;;  %v4600_v33 = vld [vmem:[%s8927_s3 + $0x68] sm:$0xff]  ;;  %5068 = vperm.xlu0 %6669, %v6928_v31  }
0x1064   :  { %v4374_v55 = vmul.f32 %v4368_v19, %v4254_v21  ;;  %v4384_v22 = vmul.f32 %v4378_v53, %v4234_v26  ;;  %v4364_v45 = vmul.f32 %v6915_v28, %v4334_v30  ;;  %v4238_v25 = vmul.f32 0.5, %v8699_v38  ;;  %v4594_v38 = vld [vmem:[%s8927_s3 + $0x38] sm:$0xff]  ;;  %v4597_v53 = vld [vmem:[%s8927_s3 + $0x50] sm:$0xff] }
0x1065   :  { %v4383_v34 = vmul.f32 %v4377_v61, %v4233_v49  ;;  %v4373_v48 = vmul.f32 %v4367_v5, %v4253_v43  ;;  %v4363_v37 = vmul.f32 %v6917_v58, %v4333_v59  ;;  %v6369_v20 = vpack.c.bf16 %v4599_v39, %v4598_v46 }
0x1066   :  { %v4380_v29 = vadd.f32 1.0, %v4374_v55  ;;  %v4370_v51 = vsub.f32 1.0, %v4364_v45  ;;  %v6375_v47 = vpack.c.bf16 %v4595_v36, %v4594_v38  ;;  %v6372_v26 = vpack.c.bf16 %v4601_v0, %v4600_v33 }
0x1067   :  { %5989 = vmatprep.mubr.msk.f32.mxu1 %vm2291_vm14, %v4383_v34  ;;  %v4379_v41 = vadd.f32 1.0, %v4373_v48  ;;  %v4369_v54 = vsub.f32 1.0, %v4363_v37  ;;  %6370 = vmatpush3.bf16.msra.mxu0 %v6369_v20  ;;  %v6378_v56 = vpack.c.bf16 %v4597_v53, %v4596_v13  ;;  %v4511_v49 = vrot.slane %v8593_v60, %v2413_v62 }
0x1068   :  { %5990 = vmatmul.mubr.msk.f32.vlgmr.msra.gmra.mrb[52].mxu1 %vm2291_vm14, %v4384_v22  ;;  %v4376_v12 = vmul.f32 %v4370_v51, %v4256_v27  ;;  %v4386_v14 = vmul.f32 %v4380_v29, %v4236_v44  ;;  %6371 = vmatprep.subr.bf16.mxu0 %v6967_v63 }
0x1069   :  { %v4385_v32 = vmul.f32 %v4379_v41, %v4235_v17  ;;  %v4375_v2 = vmul.f32 %v4369_v54, %v4255_v9  ;;  %6376 = vmatpush3.bf16.msra.mxu1 %v6375_v47 }
0x106a   :  { %v4382_v1 = vadd.f32 1.0, %v4376_v12  ;;  %6377 = vmatprep.subr.bf16.mxu1 %v6967_v63 }
0x106b   :  { %5992 = vmatprep.mubr.msk.f32.mxu1 %vm2291_vm14, %v4385_v32  ;;  %v4381_v24 = vadd.f32 1.0, %v4375_v2  ;;  %6373 = vmatpush3.bf16.msra.mxu0 %v6372_v26 }
0x106c   :  { %5993 = vmatmul.mubr.msk.f32.gmra.mrb[54].mxu1 %vm2291_vm14, %v4386_v14  ;;  %v4388_v50 = vmul.f32 %v4382_v1, %v4238_v25  ;;  %6380 = vmatprep.subr.bf16.mxu0 %v6967_v63 }
0x106d   :  { %v4387_v3 = vmul.f32 %v4381_v24, %v4237_v57  ;;  %6379 = vmatpush3.bf16.msra.mxu1 %v6378_v56 }
0x106e   :  { %6386 = vmatprep.subr.bf16.mxu1 %v6967_v63 }
0x106f   :  { %5995 = vmatprep.mubr.msk.f32.mxu1 %vm2291_vm14, %v4387_v3 }
0x1070   :  { %5996 = vmatmul.mubr.msk.f32.gmra.mrb[56].mxu1 %vm2291_vm14, %v4388_v50 }
0x1071   :  { %6017 = vmatprep.mubr.msk.f32.mxu1 %vm6957_vm1, %v9000_v18 }
0x113b   :  { %v5991_v61 = vpop.f32.mrb[52].mxu1 }
0x113c   :  { %v4503_v19 = vadd.f32 %v5991_v61, %v8624_v23  ;;  %v4473_v10 = vpop.f32.mrb[53].mxu1 }
0x113d   :  { %v4502_v21 = vadd.f32 %v4473_v10, %v8622_v15 }
0x113e   :  { %v4513_v11 = vadd.f32 %v4511_v49, %v4503_v19 }
0x113f   :  { %v4512_v16 = vadd.f32 %v4511_v49, %v4502_v21  ;;  %v5994_v22 = vpop.f32.mrb[54].mxu1 }
0x1140   :  { %v4519_v34 = vsel %vm55_vm2, %v4513_v11, 0.0  ;;  %v4505_v5 = vadd.f32 %v5994_v22, %v8634_v42  ;;  %v4483_v30 = vpop.f32.mrb[55].mxu1 }
0x1141   :  { %v4518_v55 = vsel %vm55_vm2, %v4512_v16, 0.0  ;;  %v4504_v28 = vadd.f32 %v4483_v30, %v8628_v35 }
0x1142   :  { %v4520_v6 = vadd.f32 %v4519_v34, %v4518_v55  ;;  %v4515_v62 = vadd.f32 %v4511_v49, %v4505_v5  ;;  %v9024_v5 = vsub.s32 7, %v7078_v52  ;;  %v4827_v52 = vld [vmem:[%s8927_s3 + $0xa0] sm:$0xff] }
0x1143   :  { %v4514_v43 = vadd.f32 %v4511_v49, %v4504_v28  ;;  %v5997_v59 = vpop.f32.mrb[56].mxu1  ;;  %v4748_v28 = vld [vmem:[%s8927_s3 + $0x78] sm:$0xff] }
0x1144   :  { %v4507_v15 = vadd.f32 %v5997_v59, %v8642_v40  ;;  %v4493_v58 = vpop.f32.mrb[57].mxu1  ;;  %v4523_v29 = vsel %vm55_vm2, %v4515_v62, 0.0  ;;  %v8829_v30 = vrot.slane %v8593_v60, %v9024_v5  ;;  %v9025_v5 = vld [vmem:[#allocation8_spill] sm:$0xff] }
0x1145   :  { %v4521_v23 = vsel %vm55_vm2, %v4514_v43, 0.0  ;;  %v4506_v45 = vadd.f32 %v4493_v58, %v8636_v8 }
0x1146   :  { %v4522_v48 = vadd.f32 %v4521_v23, %v4520_v6  ;;  %v4517_v37 = vadd.f32 %v4511_v49, %v4507_v15  ;;  %v4577_v6 = vrot.slane %v8593_v60, %v2479_v4  ;;  %v4749_v23 = vld [vmem:[%s8927_s3 + $0x80] sm:$0xff]  ;;  %v4826_v4 = vld [vmem:[%s8927_s3 + $0x98] sm:$0xff] }
0x1147   :  { %v4516_v17 = vadd.f32 %v4511_v49, %v4506_v45 }
0x1148   :  { %v4524_v41 = vadd.f32 %v4523_v29, %v4522_v48  ;;  %v4527_v35 = vsel %vm55_vm2, %v4517_v37, 0.0  ;;  %v6381_v29 = vpack.c.bf16 %v4749_v23, %v4748_v28 }
0x1149   :  { %v4525_v42 = vsel %vm55_vm2, %v4516_v17, 0.0 }
0x114a   :  { %v4526_v51 = vadd.f32 %v4525_v42, %v4524_v41 }
0x114c   :  { %v4528_v44 = vadd.f32 %v4527_v35, %v4526_v51  ;;  %v4751_v51 = vld [vmem:[%s8927_s3 + $0x90] sm:$0xff]  ;;  %v4828_v35 = vld [vmem:[%s8927_s3 + $0xa8] sm:$0xff] }
0x114e   :  { %v4529_v27 = vrot.slane %v4528_v44, 4 }
0x1150   :  { %v4530_v54 = vadd.f32 %v4529_v27, %v4528_v44  ;;  %v4829_v44 = vld [vmem:[%s8927_s3 + $0xb0] sm:$0xff] }
0x1152   :  { %v4531_v32 = vrot.slane %v4530_v54, 2 }
0x1154   :  { %v4532_v12 = vadd.f32 %v4531_v32, %v4530_v54  ;;  %v6390_v54 = vpack.c.bf16 %v4829_v44, %v4828_v35  ;;  %v4904_v32 = vld [vmem:[%s8927_s3 + $0xb8] sm:$0xff] }
0x1156   :  { %v4533_v40 = vrot.slane %v4532_v12, 1 }
0x1158   :  { %v4534_v9 = vadd.f32 %v4533_v40, %v4532_v12 }
0x115a   :  { %v4535_v14 = vmul.f32 0.020833334, %v4534_v9  ;;  %v4905_v9 = vld [vmem:[%s8927_s3 + $0xc0] sm:$0xff] }
0x115c   :  { %v4536_v2 = vsub.f32 %v4512_v16, %v4535_v14  ;;  %v4537_v8 = vsub.f32 %v4513_v11, %v4535_v14  ;;  %v4538_v1 = vsub.f32 %v4514_v43, %v4535_v14  ;;  %v4539_v57 = vsub.f32 %v4515_v62, %v4535_v14 }
0x115d   :  { %v4540_v24 = vsub.f32 %v4516_v17, %v4535_v14  ;;  %v4541_v25 = vsub.f32 %v4517_v37, %v4535_v14  ;;  %v6387_v37 = vpack.c.bf16 %v4827_v52, %v4826_v4  ;;  %v4750_v17 = vld [vmem:[%s8927_s3 + $0x88] sm:$0xff]  ;;  %v4982_v14 = vld [vmem:[%s8927_s3 + $0xd8] sm:$0xff] }
0x115e   :  { %v4542_v3 = vmul.f32 %v4536_v2, %v4536_v2  ;;  %v4543_v50 = vmul.f32 %v4537_v8, %v4537_v8  ;;  %v4544_v46 = vmul.f32 %v4538_v1, %v4538_v1  ;;  %v4545_v39 = vmul.f32 %v4539_v57, %v4539_v57 }
0x115f   :  { %v4546_v47 = vmul.f32 %v4540_v24, %v4540_v24  ;;  %v4547_v13 = vmul.f32 %v4541_v25, %v4541_v25  ;;  %v6384_v27 = vpack.c.bf16 %v4751_v51, %v4750_v17 }
0x1160   :  { %v4548_v38 = vsel %vm55_vm2, %v4542_v3, 0.0  ;;  %v4549_v20 = vsel %vm55_vm2, %v4543_v50, 0.0  ;;  %v4551_v33 = vsel %vm55_vm2, %v4544_v46, 0.0  ;;  %v4553_v26 = vsel %vm55_vm2, %v4545_v39, 0.0  ;;  %v4907_v3 = vld [vmem:[%s8927_s3 + $0xd0] sm:$0xff]  ;;  %v4984_v50 = vld [vmem:[%s8927_s3 + $0xe8] sm:$0xff] }
0x1161   :  { %v4550_v36 = vadd.f32 %v4549_v20, %v4548_v38  ;;  %v4555_v56 = vsel %vm55_vm2, %v4546_v47, 0.0  ;;  %v4557_v31 = vsel %vm55_vm2, %v4547_v13, 0.0  ;;  %v4985_v46 = vld [vmem:[%s8927_s3 + $0xf0] sm:$0xff] }
0x1162   :  { %v6402_v38 = vpack.c.bf16 %v4985_v46, %v4984_v50 }
0x1163   :  { %v4552_v0 = vadd.f32 %v4551_v33, %v4550_v36 }
0x1165   :  { %v4554_v53 = vadd.f32 %v4553_v26, %v4552_v0 }
0x1167   :  { %v4556_v7 = vadd.f32 %v4555_v56, %v4554_v53 }
0x1169   :  { %v4558_v49 = vadd.f32 %v4557_v31, %v4556_v7 }
0x116b   :  { %v4559_v61 = vrot.slane %v4558_v49, 4 }
0x116d   :  { %v4560_v19 = vadd.f32 %v4559_v61, %v4558_v49 }
0x116f   :  { %v4561_v10 = vrot.slane %v4560_v19, 2 }
0x1171   :  { %v4562_v21 = vadd.f32 %v4561_v10, %v4560_v19 }
0x1173   :  { %v4563_v11 = vrot.slane %v4562_v21, 1 }
0x1175   :  { %v4564_v16 = vadd.f32 %v4563_v11, %v4562_v21 }
0x1177   :  { %v4565_v34 = vmul.f32 0.020833334, %v4564_v16 }
0x1179   :  { %v4566_v55 = vadd.f32 1e-05, %v4565_v34  ;;  %v5279_v34 = vld [vmem:[%s8927_s3 + $0xf8] ss:$0 sm:$0xff] }
0x117b   :  { %6918 = vrsqrt.f32 %v4566_v55 }
0x1185   :  { %v6919_v22 = vpop.eup %6918 }
0x1186   :  { %v4572_v62 = vmul.f32 %v6919_v22, %v4540_v24  ;;  %v4569_v43 = vmul.f32 %v6919_v22, %v4537_v8  ;;  %v4568_v59 = vmul.f32 %v6919_v22, %v4536_v2  ;;  %v4570_v60 = vmul.f32 %v6919_v22, %v4538_v1  ;;  %v4983_v2 = vld [vmem:[%s8927_s3 + $0xe0] sm:$0xff] }
0x1187   :  { %v4571_v15 = vmul.f32 %v6919_v22, %v4539_v57  ;;  %v4573_v58 = vmul.f32 %v6919_v22, %v4541_v25  ;;  %v6393_v8 = vpack.c.bf16 %v4905_v9, %v4904_v32  ;;  %v6399_v1 = vpack.c.bf16 %v4983_v2, %v4982_v14  ;;  %v4906_v57 = vld [vmem:[%s8927_s3 + $0xc8] sm:$0xff]  ;;  %v5069_v22 = vpop.permute.xlu0 %5068 }
0x1188   :  { %v4579_v48 = vmul.f32 %v4577_v6, %v4569_v43  ;;  %v4578_v45 = vmul.f32 %v4577_v6, %v4568_v59  ;;  %v4580_v12 = vmul.f32 %v4577_v6, %v4570_v60  ;;  %v6396_v39 = vpack.c.bf16 %v4907_v3, %v4906_v57  ;;  %v9027_v59 = vld [vmem:[#allocation6_spill] sm:$0xff] }
0x1189   :  { %v4581_v40 = vmul.f32 %v4577_v6, %v4571_v15  ;;  %v4582_v20 = vmul.f32 %v4577_v6, %v4572_v62  ;;  %v4583_v36 = vmul.f32 %v4577_v6, %v4573_v58  ;;  %v9026_v62 = vld [vmem:[#allocation7_spill] sm:$0xff] }
0x118a   :  { %v4589_v41 = vadd.f32 %v8829_v30, %v4579_v48  ;;  %v4588_v42 = vadd.f32 %v8829_v30, %v4578_v45  ;;  %v4590_v24 = vadd.f32 %v8829_v30, %v4580_v12 }
0x118b   :  { %v4591_v25 = vadd.f32 %v8829_v30, %v4581_v40  ;;  %v4592_v47 = vadd.f32 %v8829_v30, %v4582_v20  ;;  %v4593_v33 = vadd.f32 %v8829_v30, %v4583_v36 }
0x118c   :  { %6007 = vmatmul.mubr.msk.f32.vlgmr.msra.gmra.mrb[58].mxu0 %vm55_vm2, %v4589_v41  ;;  %6018 = vmatmul.mubr.msk.f32.vlgmr.msra.gmra.mrb[58].mxu1 %vm55_vm2, %v4588_v42 }
0x118d   :  { %6382 = vmatpush3.bf16.msra.mxu0 %v6381_v29  ;;  %6388 = vmatpush3.bf16.msra.mxu1 %v6387_v37 }
0x118e   :  { %6383 = vmatprep.subr.bf16.mxu0 %v6967_v63  ;;  %6389 = vmatprep.subr.bf16.mxu1 %v6967_v63 }
0x118f   :  { %6028 = vmatprep.mubr.msk.f32.mxu0 %vm6957_vm1, %v9000_v18  ;;  %6039 = vmatprep.mubr.msk.f32.mxu1 %vm6957_vm1, %v9000_v18 }
0x1191   :  { %6385 = vmatpush3.bf16.msra.mxu0 %v6384_v27  ;;  %6391 = vmatpush3.bf16.msra.mxu1 %v6390_v54 }
0x1192   :  { %6392 = vmatprep.subr.bf16.mxu0 %v6967_v63  ;;  %6398 = vmatprep.subr.bf16.mxu1 %v6967_v63 }
0x1194   :  { %6029 = vmatmul.mubr.msk.f32.vlgmr.msra.gmra.mrb[60].mxu0 %vm55_vm2, %v4590_v24  ;;  %6040 = vmatmul.mubr.msk.f32.vlgmr.msra.gmra.mrb[60].mxu1 %vm55_vm2, %v4591_v25 }
0x1195   :  { %6394 = vmatpush3.bf16.msra.mxu0 %v6393_v8  ;;  %6400 = vmatpush3.bf16.msra.mxu1 %v6399_v1 }
0x1196   :  { %6395 = vmatprep.subr.bf16.mxu0 %v6967_v63  ;;  %6401 = vmatprep.subr.bf16.mxu1 %v6967_v63 }
0x1197   :  { %6050 = vmatprep.mubr.msk.f32.mxu0 %vm6957_vm1, %v9000_v18  ;;  %6061 = vmatprep.mubr.msk.f32.mxu1 %vm6957_vm1, %v9000_v18 }
0x1199   :  { %6397 = vmatpush3.bf16.msra.mxu0 %v6396_v39  ;;  %6403 = vmatpush3.bf16.msra.mxu1 %v6402_v38 }
0x119c   :  { %6051 = vmatmul.mubr.msk.f32.vlgmr.msra.gmra.mrb[62].mxu0 %vm55_vm2, %v4592_v47  ;;  %6062 = vmatmul.mubr.msk.f32.vlgmr.msra.gmra.mrb[62].mxu1 %vm55_vm2, %v4593_v33 }
0x125f   :  { %v4671_v0 = vpop.f32.mrb[58].mxu0  ;;  %v4744_v13 = vpop.f32.mrb[58].mxu1 }
0x1260   :  { %v4745_v63 = vadd.f32 %v4744_v13, %v4671_v0  ;;  %v6008_v26 = vpop.f32.mrb[59].mxu0  ;;  %v6019_v53 = vpop.f32.mrb[59].mxu1 }
0x1267   :  { %v4821_v56 = vpop.f32.mrb[60].mxu0  ;;  %v4899_v7 = vpop.f32.mrb[60].mxu1 }
0x1268   :  { %v4825_v31 = vadd.f32 %v4821_v56, %v4745_v63  ;;  %v6030_v49 = vpop.f32.mrb[61].mxu0  ;;  %v6041_v18 = vpop.f32.mrb[61].mxu1 }
0x126a   :  { %v4903_v61 = vadd.f32 %v4899_v7, %v4825_v31 }
0x126f   :  { %v4977_v19 = vpop.f32.mrb[62].mxu0  ;;  %v5055_v10 = vpop.f32.mrb[62].mxu1 }
0x1270   :  { %v4981_v21 = vadd.f32 %v4977_v19, %v4903_v61  ;;  %v6052_v11 = vpop.f32.mrb[63].mxu0  ;;  %v6063_v16 = vpop.f32.mrb[63].mxu1 }
0x1272   :  { %v5059_v55 = vadd.f32 %v5055_v10, %v4981_v21 }
0x1274   :  { %v5065_v6 = vadd.f32 %v5279_v34, %v5059_v55 }
0x1276   :  { %v5066_v30 = vsub.f32 %v5065_v6, %v9025_v5 }
0x1278   :  { %v5071_v28 = vmul.f32 %v5069_v22, %v5066_v30 }
0x127a   :  { %v5072_v43 = vmul.f32 %v5071_v28, %v9026_v62 }
0x127c   :  { %v5073_v23 = vadd.f32 %v5072_v43, %v9027_v59 }
0x127e   :  { %5074 = vst.msk [vmem:[#allocation3] sm:$0xff] %vm23_vm0, %v5073_v23 }
0x127f   :  { %6940 = shalt.err (!%p6937_p4)
}
0x1280   :  { %s6941_s25 = scalar_lea.hbm %s8928_s4, 128 }
0x1281   :  { %p6942_p5 = scmp.ne.s32.totalorder %s8928_s4, %s6941_s25  ;;  %p6945_p6 = scmp.lt.u32.totalorder %s6941_s25, %s8928_s4 }
0x1283   :  { %p6947_p7 = pnand %p6945_p6, %p6942_p5 }
0x1285   :  { %6950 = shalt.err (!%p6947_p7)
}
0x1286   :  { %5084 = dma.vmem_to_hbm [thread:$0]  %s5082_s19, 128, %s8928_s4, [#allocation4]  }
0x1287   :  { %6951 = dma.done.wait [#allocation4], 128  }
0x1288   :  { %6952 = vsyncadd [#allocation4], 4294967168 }
0x1289   :  { %5088 = vsyncpa [#allocation4], 1 }

</bundles_post_ra>
